<compile_context>
chip_gen: v6e
topology: v6e:2x2x1
jax: 0.10.0
libtpu: 0.0.40
codegen_flags: <defaults>
</compile_context>

<pallas_src>
import functools

import jax
import jax.numpy as jnp
import numpy as np
from jax import lax
from jax.experimental import pallas as pl
from jax.experimental.pallas import tpu as pltpu

B_TILE = 8      # sublane multiple: every (B, .) tile fills all 8 sublanes
LANE = 128


def _full_spec(shape):
    """Whole-array VMEM block, independent of the batch-tile grid index."""
    n = len(shape)
    return pl.BlockSpec(shape, lambda b: (0,) * n)


def lstm_bi2_fc_kernel(
    emb_ref, mask_ref,
    w_ih0_ref, b0_ref, w_hh0f_ref, w_hh0b_ref,
    w_ih1_hf_ref, w_ih1_hb_ref, b1_ref, w_hh1f_ref, w_hh1b_ref,
    fc_w_ref, fc_b_ref,
    out_ref,
    xg_ref, seq0f_ref, seq0b_ref,
    *, S, B, H,
):
    """Fused 2-layer bidirectional LSTM (length-masked) + final linear layer.

    emb_ref:   (S, B, E)    embedded tokens (seq-first, like torch.nn.LSTM)
    mask_ref:  (S, B, 1)    1.0 where t < length[b], else 0.0
    w_ih0:     (E, 8H)      layer-0 input->gates, fwd|bwd gate cols fused
    w_hh0f/b:  (H, 4H)      layer-0 hidden->gates per direction
    w_ih1_hf:  (H, 8H)      layer-1 input->gates rows multiplying layer-0 fwd h
    w_ih1_hb:  (H, 8H)      layer-1 input->gates rows multiplying layer-0 bwd h
    b0/b1:     (1, 8H)      fused biases (b_ih + b_hh, fwd|bwd)
    fc_w:      (2H, O_pad)  final linear weight (lane-padded), fc_b: (1, O_pad)
    out_ref:   (B, O_pad)
    xg_ref:    (S, B, 8H)   scratch: precomputed input gates (reused per layer)
    seq0f/b:   (S, B, H)    scratch: layer-0 per-timestep outputs per direction
    """
    G = 4 * H
    SB = S * B
    unroll = True if S <= 16 else 4   # full unroll only for short sequences

    def half_cell(gates, h, c, pred):
        i = jax.nn.sigmoid(gates[:, 0 * H:1 * H])
        f = jax.nn.sigmoid(gates[:, 1 * H:2 * H])
        g = jnp.tanh(gates[:, 2 * H:3 * H])
        o = jax.nn.sigmoid(gates[:, 3 * H:4 * H])
        c_new = f * c + i * g
        h_new = o * jnp.tanh(c_new)
        # pack_padded_sequence semantics: padded steps do not update the state.
        return jnp.where(pred, h_new, h), jnp.where(pred, c_new, c)

    def run_layer(w_hh_f_ref, w_hh_b_ref, write_seq):
        # Weights loaded per-phase (small live range, ~8 vregs for this scan).
        w_hh_f = w_hh_f_ref[...]
        w_hh_b = w_hh_b_ref[...]

        def step(s, carry):
            h_f, c_f, h_b, c_b = carry
            tf = s
            tb = S - 1 - s
            # Precomputed x-gates: fwd gates live in lanes [:4H], bwd in [4H:].
            gates_f = xg_ref[tf][:, :G] + jnp.dot(
                h_f, w_hh_f, preferred_element_type=jnp.float32)
            gates_b = xg_ref[tb][:, G:] + jnp.dot(
                h_b, w_hh_b, preferred_element_type=jnp.float32)
            pred_f = mask_ref[tf] > 0.0
            pred_b = mask_ref[tb] > 0.0
            h_f, c_f = half_cell(gates_f, h_f, c_f, pred_f)
            h_b, c_b = half_cell(gates_b, h_b, c_b, pred_b)
            if write_seq:
                seq0f_ref[tf] = h_f
                seq0b_ref[tb] = h_b
            return (h_f, c_f, h_b, c_b)

        z = jnp.zeros((B, H), jnp.float32)
        return lax.fori_loop(0, S, step, (z, z, z, z), unroll=unroll)

    # ---- layer 0: one big input projection (M = S*B, N = 8H), then scan ----
    x0 = emb_ref[...].reshape(SB, -1)
    xg_ref[...] = (
        jnp.dot(x0, w_ih0_ref[...], preferred_element_type=jnp.float32)
        + b0_ref[...]
    ).reshape(S, B, 2 * G)
    run_layer(w_hh0f_ref, w_hh0b_ref, write_seq=True)

    # ---- layer 1: inputs are cat(fwd, bwd) layer-0 outputs kept in VMEM.
    #      Projection via two accumulating dots (no lane concat anywhere). ----
    s0f = seq0f_ref[...].reshape(SB, H)
    s0b = seq0b_ref[...].reshape(SB, H)
    xg_ref[...] = (
        jnp.dot(s0f, w_ih1_hf_ref[...], preferred_element_type=jnp.float32)
        + jnp.dot(s0b, w_ih1_hb_ref[...], preferred_element_type=jnp.float32)
        + b1_ref[...]
    ).reshape(S, B, 2 * G)
    h1f, _, h1b, _ = run_layer(w_hh1f_ref, w_hh1b_ref, write_seq=False)

    # ---- FC epilogue on cat(hidden[-2], hidden[-1]) as split accumulating dots
    fc_w = fc_w_ref[...]
    out_ref[...] = (
        jnp.dot(h1f, fc_w[:H], preferred_element_type=jnp.float32)
        + jnp.dot(h1b, fc_w[H:], preferred_element_type=jnp.float32)
        + fc_b_ref[...]
    )


def rnn_forward(text, text_lengths, params):
    """JAX/Pallas equivalent of RNN.forward (eval mode: all dropouts are p=0)."""
    # TODO(synk): at large S*B, move this gather into the kernel (scalar-prefetch
    #             token ids + DMA embedding rows) to avoid the (S,B,E) HBM trip.
    embedded = jnp.take(params["embedding"], text, axis=0)       # (S, B, E)
    S, B, E = embedded.shape
    H = params["w_hh0f"].shape[0]
    O = params["fc_w"].shape[1]

    b_pad = pl.cdiv(B, B_TILE) * B_TILE
    o_pad = pl.cdiv(O, LANE) * LANE

    # Pad batch to a sublane multiple; padded rows get length 0 (mask == 0).
    emb_p = jnp.zeros((S, b_pad, E), jnp.float32).at[:, :B, :].set(embedded)
    len_p = jnp.zeros((b_pad,), text_lengths.dtype).at[:B].set(text_lengths)
    mask = (jnp.arange(S)[:, None] < len_p[None, :]).astype(jnp.float32)[..., None]

    # Direction-fused gate weights: one N = 8H (=256) matmul yields both
    # directions' (i,f,g,o) gates.  Layer-1 / FC weights pre-split by input half
    # so the kernel never concatenates along the lane axis.
    w_ih0 = jnp.concatenate([params["w_ih0f"], params["w_ih0b"]], axis=1)    # (E, 8H)
    b0 = jnp.concatenate([params["b0f"], params["b0b"]], axis=1)             # (1, 8H)
    w_ih1_hf = jnp.concatenate(
        [params["w_ih1f"][:H], params["w_ih1b"][:H]], axis=1)                # (H, 8H)
    w_ih1_hb = jnp.concatenate(
        [params["w_ih1f"][H:], params["w_ih1b"][H:]], axis=1)                # (H, 8H)
    b1 = jnp.concatenate([params["b1f"], params["b1b"]], axis=1)             # (1, 8H)
    fc_w_p = jnp.zeros((2 * H, o_pad), jnp.float32).at[:, :O].set(params["fc_w"])
    fc_b_p = jnp.zeros((1, o_pad), jnp.float32).at[:, :O].set(params["fc_b"])

    inputs = (emb_p, mask, w_ih0, b0, params["w_hh0f"], params["w_hh0b"],
              w_ih1_hf, w_ih1_hb, b1, params["w_hh1f"], params["w_hh1b"],
              fc_w_p, fc_b_p)

    in_specs = [
        pl.BlockSpec((S, B_TILE, E), lambda b: (0, b, 0)),
        pl.BlockSpec((S, B_TILE, 1), lambda b: (0, b, 0)),
    ] + [_full_spec(x.shape) for x in inputs[2:]]

    kern = functools.partial(lstm_bi2_fc_kernel, S=S, B=B_TILE, H=H)
    out = pl.pallas_call(
        kern,
        out_shape=jax.ShapeDtypeStruct((b_pad, o_pad), jnp.float32),
        grid=(b_pad // B_TILE,),
        in_specs=in_specs,
        out_specs=pl.BlockSpec((B_TILE, o_pad), lambda b: (b, 0)),
        scratch_shapes=[
            pltpu.VMEM((S, B_TILE, 8 * H), jnp.float32),   # precomputed x-gates
            pltpu.VMEM((S, B_TILE, H), jnp.float32),       # layer-0 fwd outputs
            pltpu.VMEM((S, B_TILE, H), jnp.float32),       # layer-0 bwd outputs
        ],
        compiler_params=pltpu.CompilerParams(
            dimension_semantics=("parallel",),             # batch tiles -> both v7x TCs
            vmem_limit_bytes=32 * 1024 * 1024,             # explicit VMEM budget
        ),
    )(*inputs)
    # fc(...).squeeze(1) is a no-op for output_dim > 1 -> drop batch & lane pads.
    return out[:B, :O]


def reference_forward(text, text_lengths, params):
    """Pure-JAX reference replicating the PyTorch packed bi-LSTM semantics."""
    emb = jnp.take(params["embedding"], text, axis=0)        # (S, B, E)
    S, B, _ = emb.shape
    H = params["w_hh0f"].shape[0]
    mask = (jnp.arange(S)[:, None] < text_lengths[None, :]).astype(jnp.float32)

    def cell(x, h, c, m, w_ih, w_hh, b):
        gates = x @ w_ih + h @ w_hh + b
        i = jax.nn.sigmoid(gates[:, :H])
        f = jax.nn.sigmoid(gates[:, H:2 * H])
        g = jnp.tanh(gates[:, 2 * H:3 * H])
        o = jax.nn.sigmoid(gates[:, 3 * H:])
        c_new = f * c + i * g
        h_new = o * jnp.tanh(c_new)
        m = m[:, None]
        return m * h_new + (1 - m) * h, m * c_new + (1 - m) * c

    def run(xs, w_ih, w_hh, b, reverse):
        h = jnp.zeros((B, H), jnp.float32)
        c = jnp.zeros((B, H), jnp.float32)
        outs = [None] * S
        order = range(S - 1, -1, -1) if reverse else range(S)
        for t in order:
            h, c = cell(xs[t], h, c, mask[t], w_ih, w_hh, b)
            outs[t] = h
        return jnp.stack(outs, axis=0), h

    o0f, _ = run(emb, params["w_ih0f"], params["w_hh0f"], params["b0f"], False)
    o0b, _ = run(emb, params["w_ih0b"], params["w_hh0b"], params["b0b"], True)
    x1 = jnp.concatenate([o0f, o0b], axis=-1)                # (S, B, 2H)
    _, h1f = run(x1, params["w_ih1f"], params["w_hh1f"], params["b1f"], False)
    _, h1b = run(x1, params["w_ih1b"], params["w_hh1b"], params["b1b"], True)
    hidden = jnp.concatenate([h1f, h1b], axis=-1)            # (B, 2H)
    return hidden @ params["fc_w"] + params["fc_b"]


if __name__ == "__main__":
    # Small shapes consistent with the module (seq-first, like torch.nn.LSTM).
    S, B = 8, 2          # sequence length, batch
    E, H = 32, 32        # embedding_dim, hidden_dim
    vocab_size = 50
    output_dim = 5

    key = jax.random.PRNGKey(0)
    keys = jax.random.split(key, 20)
    kit = iter(keys)

    def rnd(shape, k):
        return jax.random.normal(k, shape, jnp.float32) * 0.1

    # nn.Embedding(padding_idx=0): row 0 zeroed.
    emb_table = rnd((vocab_size, E), next(kit)).at[0].set(0.0)

    params = {"embedding": emb_table}
    # layer 0 input = E; layer 1 input = 2H (bidirectional). Gate order (i,f,g,o).
    # PyTorch weight_ih/weight_hh are stored here transposed; bias = b_ih + b_hh.
    for layer, in_dim in ((0, E), (1, 2 * H)):
        for d in ("f", "b"):
            params[f"w_ih{layer}{d}"] = rnd((in_dim, 4 * H), next(kit))
            params[f"w_hh{layer}{d}"] = rnd((H, 4 * H), next(kit))
            params[f"b{layer}{d}"] = rnd((1, 4 * H), next(kit))
    params["fc_w"] = rnd((2 * H, output_dim), next(kit))
    params["fc_b"] = rnd((1, output_dim), next(kit))

    # Variable-length batch (descending, as pack_padded_sequence requires); pads = id 0.
    text_lengths = jnp.array([8, 5], dtype=jnp.int32)
    ids = jax.random.randint(next(kit), (S, B), 1, vocab_size, dtype=jnp.int32)
    valid = jnp.arange(S)[:, None] < text_lengths[None, :]
    text = jnp.where(valid, ids, 0)

    logits = jax.jit(rnn_forward)(text, text_lengths, params)
    jax.block_until_ready(logits)

    ref = reference_forward(text, text_lengths, params)
    np.testing.assert_allclose(
        np.asarray(logits), np.asarray(ref), rtol=1e-4, atol=1e-4
    )
    assert logits.shape == (B, output_dim)
    print("KERNEL_OK")
</pallas_src>

<mosaic_0001>
module attributes {stable_mosaic.version = 11 : i64} {
  func.func @lstm_bi2_fc_kernel(%arg0: i32, %arg1: memref<8x8x32xf32, #tpu.memory_space<vmem>>, %arg2: memref<8x8x1xf32, #tpu.memory_space<vmem>>, %arg3: memref<32x256xf32, #tpu.memory_space<vmem>>, %arg4: memref<1x256xf32, #tpu.memory_space<vmem>>, %arg5: memref<32x128xf32, #tpu.memory_space<vmem>>, %arg6: memref<32x128xf32, #tpu.memory_space<vmem>>, %arg7: memref<32x256xf32, #tpu.memory_space<vmem>>, %arg8: memref<32x256xf32, #tpu.memory_space<vmem>>, %arg9: memref<1x256xf32, #tpu.memory_space<vmem>>, %arg10: memref<32x128xf32, #tpu.memory_space<vmem>>, %arg11: memref<32x128xf32, #tpu.memory_space<vmem>>, %arg12: memref<64x128xf32, #tpu.memory_space<vmem>>, %arg13: memref<1x128xf32, #tpu.memory_space<vmem>>, %arg14: memref<8x128xf32, #tpu.memory_space<vmem>>, %arg15: memref<8x8x256xf32, #tpu.memory_space<vmem>>, %arg16: memref<8x8x32xf32, #tpu.memory_space<vmem>>, %arg17: memref<8x8x32xf32, #tpu.memory_space<vmem>>) attributes {dimension_semantics = [#tpu.dimension_semantics<parallel>], iteration_bounds = array<i64: 1>, scalar_prefetch = 0 : i64, scratch_operands = 3 : i64, tpu.core_type = #tpu.core_type<tc>, window_params = [{transform_indices = @transform_0, window_bounds = array<i64: 8, 8, 32>}, {transform_indices = @transform_1, window_bounds = array<i64: 8, 8, 1>}, {pipeline_mode = #tpu.pipeline_mode<synchronous>, transform_indices = @transform_2, window_bounds = array<i64: 32, 256>}, {pipeline_mode = #tpu.pipeline_mode<synchronous>, transform_indices = @transform_3, window_bounds = array<i64: 1, 256>}, {pipeline_mode = #tpu.pipeline_mode<synchronous>, transform_indices = @transform_4, window_bounds = array<i64: 32, 128>}, {pipeline_mode = #tpu.pipeline_mode<synchronous>, transform_indices = @transform_5, window_bounds = array<i64: 32, 128>}, {pipeline_mode = #tpu.pipeline_mode<synchronous>, transform_indices = @transform_6, window_bounds = array<i64: 32, 256>}, {pipeline_mode = #tpu.pipeline_mode<synchronous>, transform_indices = @transform_7, window_bounds = array<i64: 32, 256>}, {pipeline_mode = #tpu.pipeline_mode<synchronous>, transform_indices = @transform_8, window_bounds = array<i64: 1, 256>}, {pipeline_mode = #tpu.pipeline_mode<synchronous>, transform_indices = @transform_9, window_bounds = array<i64: 32, 128>}, {pipeline_mode = #tpu.pipeline_mode<synchronous>, transform_indices = @transform_10, window_bounds = array<i64: 32, 128>}, {pipeline_mode = #tpu.pipeline_mode<synchronous>, transform_indices = @transform_11, window_bounds = array<i64: 64, 128>}, {pipeline_mode = #tpu.pipeline_mode<synchronous>, transform_indices = @transform_12, window_bounds = array<i64: 1, 128>}, {transform_indices = @transform_13, window_bounds = array<i64: 8, 128>}]} {
    %c0 = arith.constant 0 : index
    %c0_0 = arith.constant 0 : index
    %c0_1 = arith.constant 0 : index
    %0 = vector.load %arg1[%c0, %c0_0, %c0_1] : memref<8x8x32xf32, #tpu.memory_space<vmem>>, vector<8x8x32xf32>
    %1 = vector.shape_cast %0 : vector<8x8x32xf32> to vector<64x32xf32>
    %c0_2 = arith.constant 0 : index
    %c0_3 = arith.constant 0 : index
    %2 = vector.load %arg3[%c0_2, %c0_3] : memref<32x256xf32, #tpu.memory_space<vmem>>, vector<32x256xf32>
    %cst = arith.constant dense<0.000000e+00> : vector<64x256xf32>
    %3 = tpu.matmul %1, %2, %cst {dimension_numbers = #tpu.dot_dimension_numbers<[1], [0], [0], [1], [0, 0, 1, 1], [], []>} : vector<64x32xf32>, vector<32x256xf32>, vector<64x256xf32> -> vector<64x256xf32>
    %c0_4 = arith.constant 0 : index
    %c0_5 = arith.constant 0 : index
    %4 = vector.load %arg4[%c0_4, %c0_5] : memref<1x256xf32, #tpu.memory_space<vmem>>, vector<1x256xf32>
    %5 = vector.broadcast %4 : vector<1x256xf32> to vector<64x256xf32>
    %6 = arith.addf %3, %5 : vector<64x256xf32>
    %7 = vector.shape_cast %6 : vector<64x256xf32> to vector<8x8x256xf32>
    %c0_6 = arith.constant 0 : index
    %c0_7 = arith.constant 0 : index
    %c0_8 = arith.constant 0 : index
    %8 = vector.load %arg15[%c0_6, %c0_7, %c0_8] : memref<8x8x256xf32, #tpu.memory_space<vmem>>, vector<8x8x256xf32>
    tpu.vector_store %arg15[%c0_6, %c0_7, %c0_8], %7 {strides = array<i32>} : memref<8x8x256xf32, #tpu.memory_space<vmem>>, vector<8x8x256xf32>,
    %c0_9 = arith.constant 0 : index
    %c0_10 = arith.constant 0 : index
    %9 = vector.load %arg5[%c0_9, %c0_10] : memref<32x128xf32, #tpu.memory_space<vmem>>, vector<32x128xf32>
    %c0_11 = arith.constant 0 : index
    %c0_12 = arith.constant 0 : index
    %10 = vector.load %arg6[%c0_11, %c0_12] : memref<32x128xf32, #tpu.memory_space<vmem>>, vector<32x128xf32>
    %cst_13 = arith.constant 0.000000e+00 : f32
    %11 = vector.broadcast %cst_13 : f32 to vector<8x32xf32>
    %c0_i32 = arith.constant 0 : i32
    %c7_i32 = arith.constant 7 : i32
    %12 = arith.subi %c7_i32, %c0_i32 : i32
    %13 = arith.index_cast %c0_i32 : i32 to index
    %c0_14 = arith.constant 0 : index
    %c0_15 = arith.constant 0 : index
    %14 = vector.load %arg15[%13, %c0_14, %c0_15] : memref<8x8x256xf32, #tpu.memory_space<vmem>>, vector<1x8x256xf32>
    %15 = vector.shape_cast %14 : vector<1x8x256xf32> to vector<8x256xf32>
    %16 = vector.extract_strided_slice %15 {offsets = [0, 0], sizes = [8, 128], strides = [1, 1]} : vector<8x256xf32> to vector<8x128xf32>
    %cst_16 = arith.constant dense<0.000000e+00> : vector<8x128xf32>
    %17 = tpu.matmul %11, %9, %cst_16 {dimension_numbers = #tpu.dot_dimension_numbers<[1], [0], [0], [1], [0, 0, 1, 1], [], []>} : vector<8x32xf32>, vector<32x128xf32>, vector<8x128xf32> -> vector<8x128xf32>
    %18 = arith.addf %16, %17 : vector<8x128xf32>
    %19 = arith.index_cast %12 : i32 to index
    %c0_17 = arith.constant 0 : index
    %c0_18 = arith.constant 0 : index
    %20 = vector.load %arg15[%19, %c0_17, %c0_18] : memref<8x8x256xf32, #tpu.memory_space<vmem>>, vector<1x8x256xf32>
    %21 = vector.shape_cast %20 : vector<1x8x256xf32> to vector<8x256xf32>
    %22 = vector.extract_strided_slice %21 {offsets = [0, 128], sizes = [8, 128], strides = [1, 1]} : vector<8x256xf32> to vector<8x128xf32>
    %cst_19 = arith.constant dense<0.000000e+00> : vector<8x128xf32>
    %23 = tpu.matmul %11, %10, %cst_19 {dimension_numbers = #tpu.dot_dimension_numbers<[1], [0], [0], [1], [0, 0, 1, 1], [], []>} : vector<8x32xf32>, vector<32x128xf32>, vector<8x128xf32> -> vector<8x128xf32>
    %24 = arith.addf %22, %23 : vector<8x128xf32>
    %25 = arith.index_cast %c0_i32 : i32 to index
    %c0_20 = arith.constant 0 : index
    %c0_21 = arith.constant 0 : index
    %26 = vector.load %arg2[%25, %c0_20, %c0_21] : memref<8x8x1xf32, #tpu.memory_space<vmem>>, vector<1x8x1xf32>
    %27 = vector.shape_cast %26 : vector<1x8x1xf32> to vector<8x1xf32>
    %cst_22 = arith.constant 0.000000e+00 : f32
    %28 = vector.broadcast %cst_22 : f32 to vector<8x1xf32>
    %29 = arith.cmpf ogt, %27, %28 : vector<8x1xf32>
    %30 = arith.index_cast %12 : i32 to index
    %c0_23 = arith.constant 0 : index
    %c0_24 = arith.constant 0 : index
    %31 = vector.load %arg2[%30, %c0_23, %c0_24] : memref<8x8x1xf32, #tpu.memory_space<vmem>>, vector<1x8x1xf32>
    %32 = vector.shape_cast %31 : vector<1x8x1xf32> to vector<8x1xf32>
    %cst_25 = arith.constant 0.000000e+00 : f32
    %33 = vector.broadcast %cst_25 : f32 to vector<8x1xf32>
    %34 = arith.cmpf ogt, %32, %33 : vector<8x1xf32>
    %35 = vector.extract_strided_slice %18 {offsets = [0, 0], sizes = [8, 32], strides = [1, 1]} : vector<8x128xf32> to vector<8x32xf32>
    %36 = arith.negf %35 : vector<8x32xf32>
    %37 = math.exp %36 : vector<8x32xf32>
    %cst_26 = arith.constant 1.000000e+00 : f32
    %38 = vector.broadcast %cst_26 : f32 to vector<8x32xf32>
    %39 = arith.addf %38, %37 : vector<8x32xf32>
    %40 = arith.divf %38, %39 : vector<8x32xf32>
    %41 = vector.extract_strided_slice %18 {offsets = [0, 32], sizes = [8, 32], strides = [1, 1]} : vector<8x128xf32> to vector<8x32xf32>
    %42 = arith.negf %41 : vector<8x32xf32>
    %43 = math.exp %42 : vector<8x32xf32>
    %cst_27 = arith.constant 1.000000e+00 : f32
    %44 = vector.broadcast %cst_27 : f32 to vector<8x32xf32>
    %45 = arith.addf %44, %43 : vector<8x32xf32>
    %46 = arith.divf %44, %45 : vector<8x32xf32>
    %47 = vector.extract_strided_slice %18 {offsets = [0, 64], sizes = [8, 32], strides = [1, 1]} : vector<8x128xf32> to vector<8x32xf32>
    %48 = math.tanh %47 : vector<8x32xf32>
    %49 = vector.extract_strided_slice %18 {offsets = [0, 96], sizes = [8, 32], strides = [1, 1]} : vector<8x128xf32> to vector<8x32xf32>
    %50 = arith.negf %49 : vector<8x32xf32>
    %51 = math.exp %50 : vector<8x32xf32>
    %cst_28 = arith.constant 1.000000e+00 : f32
    %52 = vector.broadcast %cst_28 : f32 to vector<8x32xf32>
    %53 = arith.addf %52, %51 : vector<8x32xf32>
    %54 = arith.divf %52, %53 : vector<8x32xf32>
    %55 = arith.mulf %46, %11 : vector<8x32xf32>
    %56 = arith.mulf %40, %48 : vector<8x32xf32>
    %57 = arith.addf %55, %56 : vector<8x32xf32>
    %58 = math.tanh %57 : vector<8x32xf32>
    %59 = arith.mulf %54, %58 : vector<8x32xf32>
    %60 = vector.shape_cast %29 : vector<8x1xi1> to vector<8x1xi1>
    %61 = vector.broadcast %60 : vector<8x1xi1> to vector<8x32xi1>
    %62 = arith.select %61, %59, %11 : vector<8x32xi1>, vector<8x32xf32>
    %63 = vector.shape_cast %29 : vector<8x1xi1> to vector<8x1xi1>
    %64 = vector.broadcast %63 : vector<8x1xi1> to vector<8x32xi1>
    %65 = arith.select %64, %57, %11 : vector<8x32xi1>, vector<8x32xf32>
    %66 = vector.extract_strided_slice %24 {offsets = [0, 0], sizes = [8, 32], strides = [1, 1]} : vector<8x128xf32> to vector<8x32xf32>
    %67 = arith.negf %66 : vector<8x32xf32>
    %68 = math.exp %67 : vector<8x32xf32>
    %cst_29 = arith.constant 1.000000e+00 : f32
    %69 = vector.broadcast %cst_29 : f32 to vector<8x32xf32>
    %70 = arith.addf %69, %68 : vector<8x32xf32>
    %71 = arith.divf %69, %70 : vector<8x32xf32>
    %72 = vector.extract_strided_slice %24 {offsets = [0, 32], sizes = [8, 32], strides = [1, 1]} : vector<8x128xf32> to vector<8x32xf32>
    %73 = arith.negf %72 : vector<8x32xf32>
    %74 = math.exp %73 : vector<8x32xf32>
    %cst_30 = arith.constant 1.000000e+00 : f32
    %75 = vector.broadcast %cst_30 : f32 to vector<8x32xf32>
    %76 = arith.addf %75, %74 : vector<8x32xf32>
    %77 = arith.divf %75, %76 : vector<8x32xf32>
    %78 = vector.extract_strided_slice %24 {offsets = [0, 64], sizes = [8, 32], strides = [1, 1]} : vector<8x128xf32> to vector<8x32xf32>
    %79 = math.tanh %78 : vector<8x32xf32>
    %80 = vector.extract_strided_slice %24 {offsets = [0, 96], sizes = [8, 32], strides = [1, 1]} : vector<8x128xf32> to vector<8x32xf32>
    %81 = arith.negf %80 : vector<8x32xf32>
    %82 = math.exp %81 : vector<8x32xf32>
    %cst_31 = arith.constant 1.000000e+00 : f32
    %83 = vector.broadcast %cst_31 : f32 to vector<8x32xf32>
    %84 = arith.addf %83, %82 : vector<8x32xf32>
    %85 = arith.divf %83, %84 : vector<8x32xf32>
    %86 = arith.mulf %77, %11 : vector<8x32xf32>
    %87 = arith.mulf %71, %79 : vector<8x32xf32>
    %88 = arith.addf %86, %87 : vector<8x32xf32>
    %89 = math.tanh %88 : vector<8x32xf32>
    %90 = arith.mulf %85, %89 : vector<8x32xf32>
    %91 = vector.shape_cast %34 : vector<8x1xi1> to vector<8x1xi1>
    %92 = vector.broadcast %91 : vector<8x1xi1> to vector<8x32xi1>
    %93 = arith.select %92, %90, %11 : vector<8x32xi1>, vector<8x32xf32>
    %94 = vector.shape_cast %34 : vector<8x1xi1> to vector<8x1xi1>
    %95 = vector.broadcast %94 : vector<8x1xi1> to vector<8x32xi1>
    %96 = arith.select %95, %88, %11 : vector<8x32xi1>, vector<8x32xf32>
    %97 = arith.index_cast %c0_i32 : i32 to index
    %c0_32 = arith.constant 0 : index
    %c0_33 = arith.constant 0 : index
    %98 = vector.load %arg16[%97, %c0_32, %c0_33] : memref<8x8x32xf32, #tpu.memory_space<vmem>>, vector<1x8x32xf32>
    %99 = vector.shape_cast %98 : vector<1x8x32xf32> to vector<8x32xf32>
    %100 = vector.shape_cast %62 : vector<8x32xf32> to vector<1x8x32xf32>
    tpu.vector_store %arg16[%97, %c0_32, %c0_33], %100 {strides = array<i32>} : memref<8x8x32xf32, #tpu.memory_space<vmem>>, vector<1x8x32xf32>,
    %101 = arith.index_cast %12 : i32 to index
    %c0_34 = arith.constant 0 : index
    %c0_35 = arith.constant 0 : index
    %102 = vector.load %arg17[%101, %c0_34, %c0_35] : memref<8x8x32xf32, #tpu.memory_space<vmem>>, vector<1x8x32xf32>
    %103 = vector.shape_cast %102 : vector<1x8x32xf32> to vector<8x32xf32>
    %104 = vector.shape_cast %93 : vector<8x32xf32> to vector<1x8x32xf32>
    tpu.vector_store %arg17[%101, %c0_34, %c0_35], %104 {strides = array<i32>} : memref<8x8x32xf32, #tpu.memory_space<vmem>>, vector<1x8x32xf32>,
    %c1_i32 = arith.constant 1 : i32
    %c7_i32_36 = arith.constant 7 : i32
    %105 = arith.subi %c7_i32_36, %c1_i32 : i32
    %106 = arith.index_cast %c1_i32 : i32 to index
    %c0_37 = arith.constant 0 : index
    %c0_38 = arith.constant 0 : index
    %107 = vector.load %arg15[%106, %c0_37, %c0_38] : memref<8x8x256xf32, #tpu.memory_space<vmem>>, vector<1x8x256xf32>
    %108 = vector.shape_cast %107 : vector<1x8x256xf32> to vector<8x256xf32>
    %109 = vector.extract_strided_slice %108 {offsets = [0, 0], sizes = [8, 128], strides = [1, 1]} : vector<8x256xf32> to vector<8x128xf32>
    %cst_39 = arith.constant dense<0.000000e+00> : vector<8x128xf32>
    %110 = tpu.matmul %62, %9, %cst_39 {dimension_numbers = #tpu.dot_dimension_numbers<[1], [0], [0], [1], [0, 0, 1, 1], [], []>} : vector<8x32xf32>, vector<32x128xf32>, vector<8x128xf32> -> vector<8x128xf32>
    %111 = arith.addf %109, %110 : vector<8x128xf32>
    %112 = arith.index_cast %105 : i32 to index
    %c0_40 = arith.constant 0 : index
    %c0_41 = arith.constant 0 : index
    %113 = vector.load %arg15[%112, %c0_40, %c0_41] : memref<8x8x256xf32, #tpu.memory_space<vmem>>, vector<1x8x256xf32>
    %114 = vector.shape_cast %113 : vector<1x8x256xf32> to vector<8x256xf32>
    %115 = vector.extract_strided_slice %114 {offsets = [0, 128], sizes = [8, 128], strides = [1, 1]} : vector<8x256xf32> to vector<8x128xf32>
    %cst_42 = arith.constant dense<0.000000e+00> : vector<8x128xf32>
    %116 = tpu.matmul %93, %10, %cst_42 {dimension_numbers = #tpu.dot_dimension_numbers<[1], [0], [0], [1], [0, 0, 1, 1], [], []>} : vector<8x32xf32>, vector<32x128xf32>, vector<8x128xf32> -> vector<8x128xf32>
    %117 = arith.addf %115, %116 : vector<8x128xf32>
    %118 = arith.index_cast %c1_i32 : i32 to index
    %c0_43 = arith.constant 0 : index
    %c0_44 = arith.constant 0 : index
    %119 = vector.load %arg2[%118, %c0_43, %c0_44] : memref<8x8x1xf32, #tpu.memory_space<vmem>>, vector<1x8x1xf32>
    %120 = vector.shape_cast %119 : vector<1x8x1xf32> to vector<8x1xf32>
    %cst_45 = arith.constant 0.000000e+00 : f32
    %121 = vector.broadcast %cst_45 : f32 to vector<8x1xf32>
    %122 = arith.cmpf ogt, %120, %121 : vector<8x1xf32>
    %123 = arith.index_cast %105 : i32 to index
    %c0_46 = arith.constant 0 : index
    %c0_47 = arith.constant 0 : index
    %124 = vector.load %arg2[%123, %c0_46, %c0_47] : memref<8x8x1xf32, #tpu.memory_space<vmem>>, vector<1x8x1xf32>
    %125 = vector.shape_cast %124 : vector<1x8x1xf32> to vector<8x1xf32>
    %cst_48 = arith.constant 0.000000e+00 : f32
    %126 = vector.broadcast %cst_48 : f32 to vector<8x1xf32>
    %127 = arith.cmpf ogt, %125, %126 : vector<8x1xf32>
    %128 = vector.extract_strided_slice %111 {offsets = [0, 0], sizes = [8, 32], strides = [1, 1]} : vector<8x128xf32> to vector<8x32xf32>
    %129 = arith.negf %128 : vector<8x32xf32>
    %130 = math.exp %129 : vector<8x32xf32>
    %cst_49 = arith.constant 1.000000e+00 : f32
    %131 = vector.broadcast %cst_49 : f32 to vector<8x32xf32>
    %132 = arith.addf %131, %130 : vector<8x32xf32>
    %133 = arith.divf %131, %132 : vector<8x32xf32>
    %134 = vector.extract_strided_slice %111 {offsets = [0, 32], sizes = [8, 32], strides = [1, 1]} : vector<8x128xf32> to vector<8x32xf32>
    %135 = arith.negf %134 : vector<8x32xf32>
    %136 = math.exp %135 : vector<8x32xf32>
    %cst_50 = arith.constant 1.000000e+00 : f32
    %137 = vector.broadcast %cst_50 : f32 to vector<8x32xf32>
    %138 = arith.addf %137, %136 : vector<8x32xf32>
    %139 = arith.divf %137, %138 : vector<8x32xf32>
    %140 = vector.extract_strided_slice %111 {offsets = [0, 64], sizes = [8, 32], strides = [1, 1]} : vector<8x128xf32> to vector<8x32xf32>
    %141 = math.tanh %140 : vector<8x32xf32>
    %142 = vector.extract_strided_slice %111 {offsets = [0, 96], sizes = [8, 32], strides = [1, 1]} : vector<8x128xf32> to vector<8x32xf32>
    %143 = arith.negf %142 : vector<8x32xf32>
    %144 = math.exp %143 : vector<8x32xf32>
    %cst_51 = arith.constant 1.000000e+00 : f32
    %145 = vector.broadcast %cst_51 : f32 to vector<8x32xf32>
    %146 = arith.addf %145, %144 : vector<8x32xf32>
    %147 = arith.divf %145, %146 : vector<8x32xf32>
    %148 = arith.mulf %139, %65 : vector<8x32xf32>
    %149 = arith.mulf %133, %141 : vector<8x32xf32>
    %150 = arith.addf %148, %149 : vector<8x32xf32>
    %151 = math.tanh %150 : vector<8x32xf32>
    %152 = arith.mulf %147, %151 : vector<8x32xf32>
    %153 = vector.shape_cast %122 : vector<8x1xi1> to vector<8x1xi1>
    %154 = vector.broadcast %153 : vector<8x1xi1> to vector<8x32xi1>
    %155 = arith.select %154, %152, %62 : vector<8x32xi1>, vector<8x32xf32>
    %156 = vector.shape_cast %122 : vector<8x1xi1> to vector<8x1xi1>
    %157 = vector.broadcast %156 : vector<8x1xi1> to vector<8x32xi1>
    %158 = arith.select %157, %150, %65 : vector<8x32xi1>, vector<8x32xf32>
    %159 = vector.extract_strided_slice %117 {offsets = [0, 0], sizes = [8, 32], strides = [1, 1]} : vector<8x128xf32> to vector<8x32xf32>
    %160 = arith.negf %159 : vector<8x32xf32>
    %161 = math.exp %160 : vector<8x32xf32>
    %cst_52 = arith.constant 1.000000e+00 : f32
    %162 = vector.broadcast %cst_52 : f32 to vector<8x32xf32>
    %163 = arith.addf %162, %161 : vector<8x32xf32>
    %164 = arith.divf %162, %163 : vector<8x32xf32>
    %165 = vector.extract_strided_slice %117 {offsets = [0, 32], sizes = [8, 32], strides = [1, 1]} : vector<8x128xf32> to vector<8x32xf32>
    %166 = arith.negf %165 : vector<8x32xf32>
    %167 = math.exp %166 : vector<8x32xf32>
    %cst_53 = arith.constant 1.000000e+00 : f32
    %168 = vector.broadcast %cst_53 : f32 to vector<8x32xf32>
    %169 = arith.addf %168, %167 : vector<8x32xf32>
    %170 = arith.divf %168, %169 : vector<8x32xf32>
    %171 = vector.extract_strided_slice %117 {offsets = [0, 64], sizes = [8, 32], strides = [1, 1]} : vector<8x128xf32> to vector<8x32xf32>
    %172 = math.tanh %171 : vector<8x32xf32>
    %173 = vector.extract_strided_slice %117 {offsets = [0, 96], sizes = [8, 32], strides = [1, 1]} : vector<8x128xf32> to vector<8x32xf32>
    %174 = arith.negf %173 : vector<8x32xf32>
    %175 = math.exp %174 : vector<8x32xf32>
    %cst_54 = arith.constant 1.000000e+00 : f32
    %176 = vector.broadcast %cst_54 : f32 to vector<8x32xf32>
    %177 = arith.addf %176, %175 : vector<8x32xf32>
    %178 = arith.divf %176, %177 : vector<8x32xf32>
    %179 = arith.mulf %170, %96 : vector<8x32xf32>
    %180 = arith.mulf %164, %172 : vector<8x32xf32>
    %181 = arith.addf %179, %180 : vector<8x32xf32>
    %182 = math.tanh %181 : vector<8x32xf32>
    %183 = arith.mulf %178, %182 : vector<8x32xf32>
    %184 = vector.shape_cast %127 : vector<8x1xi1> to vector<8x1xi1>
    %185 = vector.broadcast %184 : vector<8x1xi1> to vector<8x32xi1>
    %186 = arith.select %185, %183, %93 : vector<8x32xi1>, vector<8x32xf32>
    %187 = vector.shape_cast %127 : vector<8x1xi1> to vector<8x1xi1>
    %188 = vector.broadcast %187 : vector<8x1xi1> to vector<8x32xi1>
    %189 = arith.select %188, %181, %96 : vector<8x32xi1>, vector<8x32xf32>
    %190 = arith.index_cast %c1_i32 : i32 to index
    %c0_55 = arith.constant 0 : index
    %c0_56 = arith.constant 0 : index
    %191 = vector.load %arg16[%190, %c0_55, %c0_56] : memref<8x8x32xf32, #tpu.memory_space<vmem>>, vector<1x8x32xf32>
    %192 = vector.shape_cast %191 : vector<1x8x32xf32> to vector<8x32xf32>
    %193 = vector.shape_cast %155 : vector<8x32xf32> to vector<1x8x32xf32>
    tpu.vector_store %arg16[%190, %c0_55, %c0_56], %193 {strides = array<i32>} : memref<8x8x32xf32, #tpu.memory_space<vmem>>, vector<1x8x32xf32>,
    %194 = arith.index_cast %105 : i32 to index
    %c0_57 = arith.constant 0 : index
    %c0_58 = arith.constant 0 : index
    %195 = vector.load %arg17[%194, %c0_57, %c0_58] : memref<8x8x32xf32, #tpu.memory_space<vmem>>, vector<1x8x32xf32>
    %196 = vector.shape_cast %195 : vector<1x8x32xf32> to vector<8x32xf32>
    %197 = vector.shape_cast %186 : vector<8x32xf32> to vector<1x8x32xf32>
    tpu.vector_store %arg17[%194, %c0_57, %c0_58], %197 {strides = array<i32>} : memref<8x8x32xf32, #tpu.memory_space<vmem>>, vector<1x8x32xf32>,
    %c2_i32 = arith.constant 2 : i32
    %c7_i32_59 = arith.constant 7 : i32
    %198 = arith.subi %c7_i32_59, %c2_i32 : i32
    %199 = arith.index_cast %c2_i32 : i32 to index
    %c0_60 = arith.constant 0 : index
    %c0_61 = arith.constant 0 : index
    %200 = vector.load %arg15[%199, %c0_60, %c0_61] : memref<8x8x256xf32, #tpu.memory_space<vmem>>, vector<1x8x256xf32>
    %201 = vector.shape_cast %200 : vector<1x8x256xf32> to vector<8x256xf32>
    %202 = vector.extract_strided_slice %201 {offsets = [0, 0], sizes = [8, 128], strides = [1, 1]} : vector<8x256xf32> to vector<8x128xf32>
    %cst_62 = arith.constant dense<0.000000e+00> : vector<8x128xf32>
    %203 = tpu.matmul %155, %9, %cst_62 {dimension_numbers = #tpu.dot_dimension_numbers<[1], [0], [0], [1], [0, 0, 1, 1], [], []>} : vector<8x32xf32>, vector<32x128xf32>, vector<8x128xf32> -> vector<8x128xf32>
    %204 = arith.addf %202, %203 : vector<8x128xf32>
    %205 = arith.index_cast %198 : i32 to index
    %c0_63 = arith.constant 0 : index
    %c0_64 = arith.constant 0 : index
    %206 = vector.load %arg15[%205, %c0_63, %c0_64] : memref<8x8x256xf32, #tpu.memory_space<vmem>>, vector<1x8x256xf32>
    %207 = vector.shape_cast %206 : vector<1x8x256xf32> to vector<8x256xf32>
    %208 = vector.extract_strided_slice %207 {offsets = [0, 128], sizes = [8, 128], strides = [1, 1]} : vector<8x256xf32> to vector<8x128xf32>
    %cst_65 = arith.constant dense<0.000000e+00> : vector<8x128xf32>
    %209 = tpu.matmul %186, %10, %cst_65 {dimension_numbers = #tpu.dot_dimension_numbers<[1], [0], [0], [1], [0, 0, 1, 1], [], []>} : vector<8x32xf32>, vector<32x128xf32>, vector<8x128xf32> -> vector<8x128xf32>
    %210 = arith.addf %208, %209 : vector<8x128xf32>
    %211 = arith.index_cast %c2_i32 : i32 to index
    %c0_66 = arith.constant 0 : index
    %c0_67 = arith.constant 0 : index
    %212 = vector.load %arg2[%211, %c0_66, %c0_67] : memref<8x8x1xf32, #tpu.memory_space<vmem>>, vector<1x8x1xf32>
    %213 = vector.shape_cast %212 : vector<1x8x1xf32> to vector<8x1xf32>
    %cst_68 = arith.constant 0.000000e+00 : f32
    %214 = vector.broadcast %cst_68 : f32 to vector<8x1xf32>
    %215 = arith.cmpf ogt, %213, %214 : vector<8x1xf32>
    %216 = arith.index_cast %198 : i32 to index
    %c0_69 = arith.constant 0 : index
    %c0_70 = arith.constant 0 : index
    %217 = vector.load %arg2[%216, %c0_69, %c0_70] : memref<8x8x1xf32, #tpu.memory_space<vmem>>, vector<1x8x1xf32>
    %218 = vector.shape_cast %217 : vector<1x8x1xf32> to vector<8x1xf32>
    %cst_71 = arith.constant 0.000000e+00 : f32
    %219 = vector.broadcast %cst_71 : f32 to vector<8x1xf32>
    %220 = arith.cmpf ogt, %218, %219 : vector<8x1xf32>
    %221 = vector.extract_strided_slice %204 {offsets = [0, 0], sizes = [8, 32], strides = [1, 1]} : vector<8x128xf32> to vector<8x32xf32>
    %222 = arith.negf %221 : vector<8x32xf32>
    %223 = math.exp %222 : vector<8x32xf32>
    %cst_72 = arith.constant 1.000000e+00 : f32
    %224 = vector.broadcast %cst_72 : f32 to vector<8x32xf32>
    %225 = arith.addf %224, %223 : vector<8x32xf32>
    %226 = arith.divf %224, %225 : vector<8x32xf32>
    %227 = vector.extract_strided_slice %204 {offsets = [0, 32], sizes = [8, 32], strides = [1, 1]} : vector<8x128xf32> to vector<8x32xf32>
    %228 = arith.negf %227 : vector<8x32xf32>
    %229 = math.exp %228 : vector<8x32xf32>
    %cst_73 = arith.constant 1.000000e+00 : f32
    %230 = vector.broadcast %cst_73 : f32 to vector<8x32xf32>
    %231 = arith.addf %230, %229 : vector<8x32xf32>
    %232 = arith.divf %230, %231 : vector<8x32xf32>
    %233 = vector.extract_strided_slice %204 {offsets = [0, 64], sizes = [8, 32], strides = [1, 1]} : vector<8x128xf32> to vector<8x32xf32>
    %234 = math.tanh %233 : vector<8x32xf32>
    %235 = vector.extract_strided_slice %204 {offsets = [0, 96], sizes = [8, 32], strides = [1, 1]} : vector<8x128xf32> to vector<8x32xf32>
    %236 = arith.negf %235 : vector<8x32xf32>
    %237 = math.exp %236 : vector<8x32xf32>
    %cst_74 = arith.constant 1.000000e+00 : f32
    %238 = vector.broadcast %cst_74 : f32 to vector<8x32xf32>
    %239 = arith.addf %238, %237 : vector<8x32xf32>
    %240 = arith.divf %238, %239 : vector<8x32xf32>
    %241 = arith.mulf %232, %158 : vector<8x32xf32>
    %242 = arith.mulf %226, %234 : vector<8x32xf32>
    %243 = arith.addf %241, %242 : vector<8x32xf32>
    %244 = math.tanh %243 : vector<8x32xf32>
    %245 = arith.mulf %240, %244 : vector<8x32xf32>
    %246 = vector.shape_cast %215 : vector<8x1xi1> to vector<8x1xi1>
    %247 = vector.broadcast %246 : vector<8x1xi1> to vector<8x32xi1>
    %248 = arith.select %247, %245, %155 : vector<8x32xi1>, vector<8x32xf32>
    %249 = vector.shape_cast %215 : vector<8x1xi1> to vector<8x1xi1>
    %250 = vector.broadcast %249 : vector<8x1xi1> to vector<8x32xi1>
    %251 = arith.select %250, %243, %158 : vector<8x32xi1>, vector<8x32xf32>
    %252 = vector.extract_strided_slice %210 {offsets = [0, 0], sizes = [8, 32], strides = [1, 1]} : vector<8x128xf32> to vector<8x32xf32>
    %253 = arith.negf %252 : vector<8x32xf32>
    %254 = math.exp %253 : vector<8x32xf32>
    %cst_75 = arith.constant 1.000000e+00 : f32
    %255 = vector.broadcast %cst_75 : f32 to vector<8x32xf32>
    %256 = arith.addf %255, %254 : vector<8x32xf32>
    %257 = arith.divf %255, %256 : vector<8x32xf32>
    %258 = vector.extract_strided_slice %210 {offsets = [0, 32], sizes = [8, 32], strides = [1, 1]} : vector<8x128xf32> to vector<8x32xf32>
    %259 = arith.negf %258 : vector<8x32xf32>
    %260 = math.exp %259 : vector<8x32xf32>
    %cst_76 = arith.constant 1.000000e+00 : f32
    %261 = vector.broadcast %cst_76 : f32 to vector<8x32xf32>
    %262 = arith.addf %261, %260 : vector<8x32xf32>
    %263 = arith.divf %261, %262 : vector<8x32xf32>
    %264 = vector.extract_strided_slice %210 {offsets = [0, 64], sizes = [8, 32], strides = [1, 1]} : vector<8x128xf32> to vector<8x32xf32>
    %265 = math.tanh %264 : vector<8x32xf32>
    %266 = vector.extract_strided_slice %210 {offsets = [0, 96], sizes = [8, 32], strides = [1, 1]} : vector<8x128xf32> to vector<8x32xf32>
    %267 = arith.negf %266 : vector<8x32xf32>
    %268 = math.exp %267 : vector<8x32xf32>
    %cst_77 = arith.constant 1.000000e+00 : f32
    %269 = vector.broadcast %cst_77 : f32 to vector<8x32xf32>
    %270 = arith.addf %269, %268 : vector<8x32xf32>
    %271 = arith.divf %269, %270 : vector<8x32xf32>
    %272 = arith.mulf %263, %189 : vector<8x32xf32>
    %273 = arith.mulf %257, %265 : vector<8x32xf32>
    %274 = arith.addf %272, %273 : vector<8x32xf32>
    %275 = math.tanh %274 : vector<8x32xf32>
    %276 = arith.mulf %271, %275 : vector<8x32xf32>
    %277 = vector.shape_cast %220 : vector<8x1xi1> to vector<8x1xi1>
    %278 = vector.broadcast %277 : vector<8x1xi1> to vector<8x32xi1>
    %279 = arith.select %278, %276, %186 : vector<8x32xi1>, vector<8x32xf32>
    %280 = vector.shape_cast %220 : vector<8x1xi1> to vector<8x1xi1>
    %281 = vector.broadcast %280 : vector<8x1xi1> to vector<8x32xi1>
    %282 = arith.select %281, %274, %189 : vector<8x32xi1>, vector<8x32xf32>
    %283 = arith.index_cast %c2_i32 : i32 to index
    %c0_78 = arith.constant 0 : index
    %c0_79 = arith.constant 0 : index
    %284 = vector.load %arg16[%283, %c0_78, %c0_79] : memref<8x8x32xf32, #tpu.memory_space<vmem>>, vector<1x8x32xf32>
    %285 = vector.shape_cast %284 : vector<1x8x32xf32> to vector<8x32xf32>
    %286 = vector.shape_cast %248 : vector<8x32xf32> to vector<1x8x32xf32>
    tpu.vector_store %arg16[%283, %c0_78, %c0_79], %286 {strides = array<i32>} : memref<8x8x32xf32, #tpu.memory_space<vmem>>, vector<1x8x32xf32>,
    %287 = arith.index_cast %198 : i32 to index
    %c0_80 = arith.constant 0 : index
    %c0_81 = arith.constant 0 : index
    %288 = vector.load %arg17[%287, %c0_80, %c0_81] : memref<8x8x32xf32, #tpu.memory_space<vmem>>, vector<1x8x32xf32>
    %289 = vector.shape_cast %288 : vector<1x8x32xf32> to vector<8x32xf32>
    %290 = vector.shape_cast %279 : vector<8x32xf32> to vector<1x8x32xf32>
    tpu.vector_store %arg17[%287, %c0_80, %c0_81], %290 {strides = array<i32>} : memref<8x8x32xf32, #tpu.memory_space<vmem>>, vector<1x8x32xf32>,
    %c3_i32 = arith.constant 3 : i32
    %c7_i32_82 = arith.constant 7 : i32
    %291 = arith.subi %c7_i32_82, %c3_i32 : i32
    %292 = arith.index_cast %c3_i32 : i32 to index
    %c0_83 = arith.constant 0 : index
    %c0_84 = arith.constant 0 : index
    %293 = vector.load %arg15[%292, %c0_83, %c0_84] : memref<8x8x256xf32, #tpu.memory_space<vmem>>, vector<1x8x256xf32>
    %294 = vector.shape_cast %293 : vector<1x8x256xf32> to vector<8x256xf32>
    %295 = vector.extract_strided_slice %294 {offsets = [0, 0], sizes = [8, 128], strides = [1, 1]} : vector<8x256xf32> to vector<8x128xf32>
    %cst_85 = arith.constant dense<0.000000e+00> : vector<8x128xf32>
    %296 = tpu.matmul %248, %9, %cst_85 {dimension_numbers = #tpu.dot_dimension_numbers<[1], [0], [0], [1], [0, 0, 1, 1], [], []>} : vector<8x32xf32>, vector<32x128xf32>, vector<8x128xf32> -> vector<8x128xf32>
    %297 = arith.addf %295, %296 : vector<8x128xf32>
    %298 = arith.index_cast %291 : i32 to index
    %c0_86 = arith.constant 0 : index
    %c0_87 = arith.constant 0 : index
    %299 = vector.load %arg15[%298, %c0_86, %c0_87] : memref<8x8x256xf32, #tpu.memory_space<vmem>>, vector<1x8x256xf32>
    %300 = vector.shape_cast %299 : vector<1x8x256xf32> to vector<8x256xf32>
    %301 = vector.extract_strided_slice %300 {offsets = [0, 128], sizes = [8, 128], strides = [1, 1]} : vector<8x256xf32> to vector<8x128xf32>
    %cst_88 = arith.constant dense<0.000000e+00> : vector<8x128xf32>
    %302 = tpu.matmul %279, %10, %cst_88 {dimension_numbers = #tpu.dot_dimension_numbers<[1], [0], [0], [1], [0, 0, 1, 1], [], []>} : vector<8x32xf32>, vector<32x128xf32>, vector<8x128xf32> -> vector<8x128xf32>
    %303 = arith.addf %301, %302 : vector<8x128xf32>
    %304 = arith.index_cast %c3_i32 : i32 to index
    %c0_89 = arith.constant 0 : index
    %c0_90 = arith.constant 0 : index
    %305 = vector.load %arg2[%304, %c0_89, %c0_90] : memref<8x8x1xf32, #tpu.memory_space<vmem>>, vector<1x8x1xf32>
    %306 = vector.shape_cast %305 : vector<1x8x1xf32> to vector<8x1xf32>
    %cst_91 = arith.constant 0.000000e+00 : f32
    %307 = vector.broadcast %cst_91 : f32 to vector<8x1xf32>
    %308 = arith.cmpf ogt, %306, %307 : vector<8x1xf32>
    %309 = arith.index_cast %291 : i32 to index
    %c0_92 = arith.constant 0 : index
    %c0_93 = arith.constant 0 : index
    %310 = vector.load %arg2[%309, %c0_92, %c0_93] : memref<8x8x1xf32, #tpu.memory_space<vmem>>, vector<1x8x1xf32>
    %311 = vector.shape_cast %310 : vector<1x8x1xf32> to vector<8x1xf32>
    %cst_94 = arith.constant 0.000000e+00 : f32
    %312 = vector.broadcast %cst_94 : f32 to vector<8x1xf32>
    %313 = arith.cmpf ogt, %311, %312 : vector<8x1xf32>
    %314 = vector.extract_strided_slice %297 {offsets = [0, 0], sizes = [8, 32], strides = [1, 1]} : vector<8x128xf32> to vector<8x32xf32>
    %315 = arith.negf %314 : vector<8x32xf32>
    %316 = math.exp %315 : vector<8x32xf32>
    %cst_95 = arith.constant 1.000000e+00 : f32
    %317 = vector.broadcast %cst_95 : f32 to vector<8x32xf32>
    %318 = arith.addf %317, %316 : vector<8x32xf32>
    %319 = arith.divf %317, %318 : vector<8x32xf32>
    %320 = vector.extract_strided_slice %297 {offsets = [0, 32], sizes = [8, 32], strides = [1, 1]} : vector<8x128xf32> to vector<8x32xf32>
    %321 = arith.negf %320 : vector<8x32xf32>
    %322 = math.exp %321 : vector<8x32xf32>
    %cst_96 = arith.constant 1.000000e+00 : f32
    %323 = vector.broadcast %cst_96 : f32 to vector<8x32xf32>
    %324 = arith.addf %323, %322 : vector<8x32xf32>
    %325 = arith.divf %323, %324 : vector<8x32xf32>
    %326 = vector.extract_strided_slice %297 {offsets = [0, 64], sizes = [8, 32], strides = [1, 1]} : vector<8x128xf32> to vector<8x32xf32>
    %327 = math.tanh %326 : vector<8x32xf32>
    %328 = vector.extract_strided_slice %297 {offsets = [0, 96], sizes = [8, 32], strides = [1, 1]} : vector<8x128xf32> to vector<8x32xf32>
    %329 = arith.negf %328 : vector<8x32xf32>
    %330 = math.exp %329 : vector<8x32xf32>
    %cst_97 = arith.constant 1.000000e+00 : f32
    %331 = vector.broadcast %cst_97 : f32 to vector<8x32xf32>
    %332 = arith.addf %331, %330 : vector<8x32xf32>
    %333 = arith.divf %331, %332 : vector<8x32xf32>
    %334 = arith.mulf %325, %251 : vector<8x32xf32>
    %335 = arith.mulf %319, %327 : vector<8x32xf32>
    %336 = arith.addf %334, %335 : vector<8x32xf32>
    %337 = math.tanh %336 : vector<8x32xf32>
    %338 = arith.mulf %333, %337 : vector<8x32xf32>
    %339 = vector.shape_cast %308 : vector<8x1xi1> to vector<8x1xi1>
    %340 = vector.broadcast %339 : vector<8x1xi1> to vector<8x32xi1>
    %341 = arith.select %340, %338, %248 : vector<8x32xi1>, vector<8x32xf32>
    %342 = vector.shape_cast %308 : vector<8x1xi1> to vector<8x1xi1>
    %343 = vector.broadcast %342 : vector<8x1xi1> to vector<8x32xi1>
    %344 = arith.select %343, %336, %251 : vector<8x32xi1>, vector<8x32xf32>
    %345 = vector.extract_strided_slice %303 {offsets = [0, 0], sizes = [8, 32], strides = [1, 1]} : vector<8x128xf32> to vector<8x32xf32>
    %346 = arith.negf %345 : vector<8x32xf32>
    %347 = math.exp %346 : vector<8x32xf32>
    %cst_98 = arith.constant 1.000000e+00 : f32
    %348 = vector.broadcast %cst_98 : f32 to vector<8x32xf32>
    %349 = arith.addf %348, %347 : vector<8x32xf32>
    %350 = arith.divf %348, %349 : vector<8x32xf32>
    %351 = vector.extract_strided_slice %303 {offsets = [0, 32], sizes = [8, 32], strides = [1, 1]} : vector<8x128xf32> to vector<8x32xf32>
    %352 = arith.negf %351 : vector<8x32xf32>
    %353 = math.exp %352 : vector<8x32xf32>
    %cst_99 = arith.constant 1.000000e+00 : f32
    %354 = vector.broadcast %cst_99 : f32 to vector<8x32xf32>
    %355 = arith.addf %354, %353 : vector<8x32xf32>
    %356 = arith.divf %354, %355 : vector<8x32xf32>
    %357 = vector.extract_strided_slice %303 {offsets = [0, 64], sizes = [8, 32], strides = [1, 1]} : vector<8x128xf32> to vector<8x32xf32>
    %358 = math.tanh %357 : vector<8x32xf32>
    %359 = vector.extract_strided_slice %303 {offsets = [0, 96], sizes = [8, 32], strides = [1, 1]} : vector<8x128xf32> to vector<8x32xf32>
    %360 = arith.negf %359 : vector<8x32xf32>
    %361 = math.exp %360 : vector<8x32xf32>
    %cst_100 = arith.constant 1.000000e+00 : f32
    %362 = vector.broadcast %cst_100 : f32 to vector<8x32xf32>
    %363 = arith.addf %362, %361 : vector<8x32xf32>
    %364 = arith.divf %362, %363 : vector<8x32xf32>
    %365 = arith.mulf %356, %282 : vector<8x32xf32>
    %366 = arith.mulf %350, %358 : vector<8x32xf32>
    %367 = arith.addf %365, %366 : vector<8x32xf32>
    %368 = math.tanh %367 : vector<8x32xf32>
    %369 = arith.mulf %364, %368 : vector<8x32xf32>
    %370 = vector.shape_cast %313 : vector<8x1xi1> to vector<8x1xi1>
    %371 = vector.broadcast %370 : vector<8x1xi1> to vector<8x32xi1>
    %372 = arith.select %371, %369, %279 : vector<8x32xi1>, vector<8x32xf32>
    %373 = vector.shape_cast %313 : vector<8x1xi1> to vector<8x1xi1>
    %374 = vector.broadcast %373 : vector<8x1xi1> to vector<8x32xi1>
    %375 = arith.select %374, %367, %282 : vector<8x32xi1>, vector<8x32xf32>
    %376 = arith.index_cast %c3_i32 : i32 to index
    %c0_101 = arith.constant 0 : index
    %c0_102 = arith.constant 0 : index
    %377 = vector.load %arg16[%376, %c0_101, %c0_102] : memref<8x8x32xf32, #tpu.memory_space<vmem>>, vector<1x8x32xf32>
    %378 = vector.shape_cast %377 : vector<1x8x32xf32> to vector<8x32xf32>
    %379 = vector.shape_cast %341 : vector<8x32xf32> to vector<1x8x32xf32>
    tpu.vector_store %arg16[%376, %c0_101, %c0_102], %379 {strides = array<i32>} : memref<8x8x32xf32, #tpu.memory_space<vmem>>, vector<1x8x32xf32>,
    %380 = arith.index_cast %291 : i32 to index
    %c0_103 = arith.constant 0 : index
    %c0_104 = arith.constant 0 : index
    %381 = vector.load %arg17[%380, %c0_103, %c0_104] : memref<8x8x32xf32, #tpu.memory_space<vmem>>, vector<1x8x32xf32>
    %382 = vector.shape_cast %381 : vector<1x8x32xf32> to vector<8x32xf32>
    %383 = vector.shape_cast %372 : vector<8x32xf32> to vector<1x8x32xf32>
    tpu.vector_store %arg17[%380, %c0_103, %c0_104], %383 {strides = array<i32>} : memref<8x8x32xf32, #tpu.memory_space<vmem>>, vector<1x8x32xf32>,
    %c4_i32 = arith.constant 4 : i32
    %c7_i32_105 = arith.constant 7 : i32
    %384 = arith.subi %c7_i32_105, %c4_i32 : i32
    %385 = arith.index_cast %c4_i32 : i32 to index
    %c0_106 = arith.constant 0 : index
    %c0_107 = arith.constant 0 : index
    %386 = vector.load %arg15[%385, %c0_106, %c0_107] : memref<8x8x256xf32, #tpu.memory_space<vmem>>, vector<1x8x256xf32>
    %387 = vector.shape_cast %386 : vector<1x8x256xf32> to vector<8x256xf32>
    %388 = vector.extract_strided_slice %387 {offsets = [0, 0], sizes = [8, 128], strides = [1, 1]} : vector<8x256xf32> to vector<8x128xf32>
    %cst_108 = arith.constant dense<0.000000e+00> : vector<8x128xf32>
    %389 = tpu.matmul %341, %9, %cst_108 {dimension_numbers = #tpu.dot_dimension_numbers<[1], [0], [0], [1], [0, 0, 1, 1], [], []>} : vector<8x32xf32>, vector<32x128xf32>, vector<8x128xf32> -> vector<8x128xf32>
    %390 = arith.addf %388, %389 : vector<8x128xf32>
    %391 = arith.index_cast %384 : i32 to index
    %c0_109 = arith.constant 0 : index
    %c0_110 = arith.constant 0 : index
    %392 = vector.load %arg15[%391, %c0_109, %c0_110] : memref<8x8x256xf32, #tpu.memory_space<vmem>>, vector<1x8x256xf32>
    %393 = vector.shape_cast %392 : vector<1x8x256xf32> to vector<8x256xf32>
    %394 = vector.extract_strided_slice %393 {offsets = [0, 128], sizes = [8, 128], strides = [1, 1]} : vector<8x256xf32> to vector<8x128xf32>
    %cst_111 = arith.constant dense<0.000000e+00> : vector<8x128xf32>
    %395 = tpu.matmul %372, %10, %cst_111 {dimension_numbers = #tpu.dot_dimension_numbers<[1], [0], [0], [1], [0, 0, 1, 1], [], []>} : vector<8x32xf32>, vector<32x128xf32>, vector<8x128xf32> -> vector<8x128xf32>
    %396 = arith.addf %394, %395 : vector<8x128xf32>
    %397 = arith.index_cast %c4_i32 : i32 to index
    %c0_112 = arith.constant 0 : index
    %c0_113 = arith.constant 0 : index
    %398 = vector.load %arg2[%397, %c0_112, %c0_113] : memref<8x8x1xf32, #tpu.memory_space<vmem>>, vector<1x8x1xf32>
    %399 = vector.shape_cast %398 : vector<1x8x1xf32> to vector<8x1xf32>
    %cst_114 = arith.constant 0.000000e+00 : f32
    %400 = vector.broadcast %cst_114 : f32 to vector<8x1xf32>
    %401 = arith.cmpf ogt, %399, %400 : vector<8x1xf32>
    %402 = arith.index_cast %384 : i32 to index
    %c0_115 = arith.constant 0 : index
    %c0_116 = arith.constant 0 : index
    %403 = vector.load %arg2[%402, %c0_115, %c0_116] : memref<8x8x1xf32, #tpu.memory_space<vmem>>, vector<1x8x1xf32>
    %404 = vector.shape_cast %403 : vector<1x8x1xf32> to vector<8x1xf32>
    %cst_117 = arith.constant 0.000000e+00 : f32
    %405 = vector.broadcast %cst_117 : f32 to vector<8x1xf32>
    %406 = arith.cmpf ogt, %404, %405 : vector<8x1xf32>
    %407 = vector.extract_strided_slice %390 {offsets = [0, 0], sizes = [8, 32], strides = [1, 1]} : vector<8x128xf32> to vector<8x32xf32>
    %408 = arith.negf %407 : vector<8x32xf32>
    %409 = math.exp %408 : vector<8x32xf32>
    %cst_118 = arith.constant 1.000000e+00 : f32
    %410 = vector.broadcast %cst_118 : f32 to vector<8x32xf32>
    %411 = arith.addf %410, %409 : vector<8x32xf32>
    %412 = arith.divf %410, %411 : vector<8x32xf32>
    %413 = vector.extract_strided_slice %390 {offsets = [0, 32], sizes = [8, 32], strides = [1, 1]} : vector<8x128xf32> to vector<8x32xf32>
    %414 = arith.negf %413 : vector<8x32xf32>
    %415 = math.exp %414 : vector<8x32xf32>
    %cst_119 = arith.constant 1.000000e+00 : f32
    %416 = vector.broadcast %cst_119 : f32 to vector<8x32xf32>
    %417 = arith.addf %416, %415 : vector<8x32xf32>
    %418 = arith.divf %416, %417 : vector<8x32xf32>
    %419 = vector.extract_strided_slice %390 {offsets = [0, 64], sizes = [8, 32], strides = [1, 1]} : vector<8x128xf32> to vector<8x32xf32>
    %420 = math.tanh %419 : vector<8x32xf32>
    %421 = vector.extract_strided_slice %390 {offsets = [0, 96], sizes = [8, 32], strides = [1, 1]} : vector<8x128xf32> to vector<8x32xf32>
    %422 = arith.negf %421 : vector<8x32xf32>
    %423 = math.exp %422 : vector<8x32xf32>
    %cst_120 = arith.constant 1.000000e+00 : f32
    %424 = vector.broadcast %cst_120 : f32 to vector<8x32xf32>
    %425 = arith.addf %424, %423 : vector<8x32xf32>
    %426 = arith.divf %424, %425 : vector<8x32xf32>
    %427 = arith.mulf %418, %344 : vector<8x32xf32>
    %428 = arith.mulf %412, %420 : vector<8x32xf32>
    %429 = arith.addf %427, %428 : vector<8x32xf32>
    %430 = math.tanh %429 : vector<8x32xf32>
    %431 = arith.mulf %426, %430 : vector<8x32xf32>
    %432 = vector.shape_cast %401 : vector<8x1xi1> to vector<8x1xi1>
    %433 = vector.broadcast %432 : vector<8x1xi1> to vector<8x32xi1>
    %434 = arith.select %433, %431, %341 : vector<8x32xi1>, vector<8x32xf32>
    %435 = vector.shape_cast %401 : vector<8x1xi1> to vector<8x1xi1>
    %436 = vector.broadcast %435 : vector<8x1xi1> to vector<8x32xi1>
    %437 = arith.select %436, %429, %344 : vector<8x32xi1>, vector<8x32xf32>
    %438 = vector.extract_strided_slice %396 {offsets = [0, 0], sizes = [8, 32], strides = [1, 1]} : vector<8x128xf32> to vector<8x32xf32>
    %439 = arith.negf %438 : vector<8x32xf32>
    %440 = math.exp %439 : vector<8x32xf32>
    %cst_121 = arith.constant 1.000000e+00 : f32
    %441 = vector.broadcast %cst_121 : f32 to vector<8x32xf32>
    %442 = arith.addf %441, %440 : vector<8x32xf32>
    %443 = arith.divf %441, %442 : vector<8x32xf32>
    %444 = vector.extract_strided_slice %396 {offsets = [0, 32], sizes = [8, 32], strides = [1, 1]} : vector<8x128xf32> to vector<8x32xf32>
    %445 = arith.negf %444 : vector<8x32xf32>
    %446 = math.exp %445 : vector<8x32xf32>
    %cst_122 = arith.constant 1.000000e+00 : f32
    %447 = vector.broadcast %cst_122 : f32 to vector<8x32xf32>
    %448 = arith.addf %447, %446 : vector<8x32xf32>
    %449 = arith.divf %447, %448 : vector<8x32xf32>
    %450 = vector.extract_strided_slice %396 {offsets = [0, 64], sizes = [8, 32], strides = [1, 1]} : vector<8x128xf32> to vector<8x32xf32>
    %451 = math.tanh %450 : vector<8x32xf32>
    %452 = vector.extract_strided_slice %396 {offsets = [0, 96], sizes = [8, 32], strides = [1, 1]} : vector<8x128xf32> to vector<8x32xf32>
    %453 = arith.negf %452 : vector<8x32xf32>
    %454 = math.exp %453 : vector<8x32xf32>
    %cst_123 = arith.constant 1.000000e+00 : f32
    %455 = vector.broadcast %cst_123 : f32 to vector<8x32xf32>
    %456 = arith.addf %455, %454 : vector<8x32xf32>
    %457 = arith.divf %455, %456 : vector<8x32xf32>
    %458 = arith.mulf %449, %375 : vector<8x32xf32>
    %459 = arith.mulf %443, %451 : vector<8x32xf32>
    %460 = arith.addf %458, %459 : vector<8x32xf32>
    %461 = math.tanh %460 : vector<8x32xf32>
    %462 = arith.mulf %457, %461 : vector<8x32xf32>
    %463 = vector.shape_cast %406 : vector<8x1xi1> to vector<8x1xi1>
    %464 = vector.broadcast %463 : vector<8x1xi1> to vector<8x32xi1>
    %465 = arith.select %464, %462, %372 : vector<8x32xi1>, vector<8x32xf32>
    %466 = vector.shape_cast %406 : vector<8x1xi1> to vector<8x1xi1>
    %467 = vector.broadcast %466 : vector<8x1xi1> to vector<8x32xi1>
    %468 = arith.select %467, %460, %375 : vector<8x32xi1>, vector<8x32xf32>
    %469 = arith.index_cast %c4_i32 : i32 to index
    %c0_124 = arith.constant 0 : index
    %c0_125 = arith.constant 0 : index
    %470 = vector.load %arg16[%469, %c0_124, %c0_125] : memref<8x8x32xf32, #tpu.memory_space<vmem>>, vector<1x8x32xf32>
    %471 = vector.shape_cast %470 : vector<1x8x32xf32> to vector<8x32xf32>
    %472 = vector.shape_cast %434 : vector<8x32xf32> to vector<1x8x32xf32>
    tpu.vector_store %arg16[%469, %c0_124, %c0_125], %472 {strides = array<i32>} : memref<8x8x32xf32, #tpu.memory_space<vmem>>, vector<1x8x32xf32>,
    %473 = arith.index_cast %384 : i32 to index
    %c0_126 = arith.constant 0 : index
    %c0_127 = arith.constant 0 : index
    %474 = vector.load %arg17[%473, %c0_126, %c0_127] : memref<8x8x32xf32, #tpu.memory_space<vmem>>, vector<1x8x32xf32>
    %475 = vector.shape_cast %474 : vector<1x8x32xf32> to vector<8x32xf32>
    %476 = vector.shape_cast %465 : vector<8x32xf32> to vector<1x8x32xf32>
    tpu.vector_store %arg17[%473, %c0_126, %c0_127], %476 {strides = array<i32>} : memref<8x8x32xf32, #tpu.memory_space<vmem>>, vector<1x8x32xf32>,
    %c5_i32 = arith.constant 5 : i32
    %c7_i32_128 = arith.constant 7 : i32
    %477 = arith.subi %c7_i32_128, %c5_i32 : i32
    %478 = arith.index_cast %c5_i32 : i32 to index
    %c0_129 = arith.constant 0 : index
    %c0_130 = arith.constant 0 : index
    %479 = vector.load %arg15[%478, %c0_129, %c0_130] : memref<8x8x256xf32, #tpu.memory_space<vmem>>, vector<1x8x256xf32>
    %480 = vector.shape_cast %479 : vector<1x8x256xf32> to vector<8x256xf32>
    %481 = vector.extract_strided_slice %480 {offsets = [0, 0], sizes = [8, 128], strides = [1, 1]} : vector<8x256xf32> to vector<8x128xf32>
    %cst_131 = arith.constant dense<0.000000e+00> : vector<8x128xf32>
    %482 = tpu.matmul %434, %9, %cst_131 {dimension_numbers = #tpu.dot_dimension_numbers<[1], [0], [0], [1], [0, 0, 1, 1], [], []>} : vector<8x32xf32>, vector<32x128xf32>, vector<8x128xf32> -> vector<8x128xf32>
    %483 = arith.addf %481, %482 : vector<8x128xf32>
    %484 = arith.index_cast %477 : i32 to index
    %c0_132 = arith.constant 0 : index
    %c0_133 = arith.constant 0 : index
    %485 = vector.load %arg15[%484, %c0_132, %c0_133] : memref<8x8x256xf32, #tpu.memory_space<vmem>>, vector<1x8x256xf32>
    %486 = vector.shape_cast %485 : vector<1x8x256xf32> to vector<8x256xf32>
    %487 = vector.extract_strided_slice %486 {offsets = [0, 128], sizes = [8, 128], strides = [1, 1]} : vector<8x256xf32> to vector<8x128xf32>
    %cst_134 = arith.constant dense<0.000000e+00> : vector<8x128xf32>
    %488 = tpu.matmul %465, %10, %cst_134 {dimension_numbers = #tpu.dot_dimension_numbers<[1], [0], [0], [1], [0, 0, 1, 1], [], []>} : vector<8x32xf32>, vector<32x128xf32>, vector<8x128xf32> -> vector<8x128xf32>
    %489 = arith.addf %487, %488 : vector<8x128xf32>
    %490 = arith.index_cast %c5_i32 : i32 to index
    %c0_135 = arith.constant 0 : index
    %c0_136 = arith.constant 0 : index
    %491 = vector.load %arg2[%490, %c0_135, %c0_136] : memref<8x8x1xf32, #tpu.memory_space<vmem>>, vector<1x8x1xf32>
    %492 = vector.shape_cast %491 : vector<1x8x1xf32> to vector<8x1xf32>
    %cst_137 = arith.constant 0.000000e+00 : f32
    %493 = vector.broadcast %cst_137 : f32 to vector<8x1xf32>
    %494 = arith.cmpf ogt, %492, %493 : vector<8x1xf32>
    %495 = arith.index_cast %477 : i32 to index
    %c0_138 = arith.constant 0 : index
    %c0_139 = arith.constant 0 : index
    %496 = vector.load %arg2[%495, %c0_138, %c0_139] : memref<8x8x1xf32, #tpu.memory_space<vmem>>, vector<1x8x1xf32>
    %497 = vector.shape_cast %496 : vector<1x8x1xf32> to vector<8x1xf32>
    %cst_140 = arith.constant 0.000000e+00 : f32
    %498 = vector.broadcast %cst_140 : f32 to vector<8x1xf32>
    %499 = arith.cmpf ogt, %497, %498 : vector<8x1xf32>
    %500 = vector.extract_strided_slice %483 {offsets = [0, 0], sizes = [8, 32], strides = [1, 1]} : vector<8x128xf32> to vector<8x32xf32>
    %501 = arith.negf %500 : vector<8x32xf32>
    %502 = math.exp %501 : vector<8x32xf32>
    %cst_141 = arith.constant 1.000000e+00 : f32
    %503 = vector.broadcast %cst_141 : f32 to vector<8x32xf32>
    %504 = arith.addf %503, %502 : vector<8x32xf32>
    %505 = arith.divf %503, %504 : vector<8x32xf32>
    %506 = vector.extract_strided_slice %483 {offsets = [0, 32], sizes = [8, 32], strides = [1, 1]} : vector<8x128xf32> to vector<8x32xf32>
    %507 = arith.negf %506 : vector<8x32xf32>
    %508 = math.exp %507 : vector<8x32xf32>
    %cst_142 = arith.constant 1.000000e+00 : f32
    %509 = vector.broadcast %cst_142 : f32 to vector<8x32xf32>
    %510 = arith.addf %509, %508 : vector<8x32xf32>
    %511 = arith.divf %509, %510 : vector<8x32xf32>
    %512 = vector.extract_strided_slice %483 {offsets = [0, 64], sizes = [8, 32], strides = [1, 1]} : vector<8x128xf32> to vector<8x32xf32>
    %513 = math.tanh %512 : vector<8x32xf32>
    %514 = vector.extract_strided_slice %483 {offsets = [0, 96], sizes = [8, 32], strides = [1, 1]} : vector<8x128xf32> to vector<8x32xf32>
    %515 = arith.negf %514 : vector<8x32xf32>
    %516 = math.exp %515 : vector<8x32xf32>
    %cst_143 = arith.constant 1.000000e+00 : f32
    %517 = vector.broadcast %cst_143 : f32 to vector<8x32xf32>
    %518 = arith.addf %517, %516 : vector<8x32xf32>
    %519 = arith.divf %517, %518 : vector<8x32xf32>
    %520 = arith.mulf %511, %437 : vector<8x32xf32>
    %521 = arith.mulf %505, %513 : vector<8x32xf32>
    %522 = arith.addf %520, %521 : vector<8x32xf32>
    %523 = math.tanh %522 : vector<8x32xf32>
    %524 = arith.mulf %519, %523 : vector<8x32xf32>
    %525 = vector.shape_cast %494 : vector<8x1xi1> to vector<8x1xi1>
    %526 = vector.broadcast %525 : vector<8x1xi1> to vector<8x32xi1>
    %527 = arith.select %526, %524, %434 : vector<8x32xi1>, vector<8x32xf32>
    %528 = vector.shape_cast %494 : vector<8x1xi1> to vector<8x1xi1>
    %529 = vector.broadcast %528 : vector<8x1xi1> to vector<8x32xi1>
    %530 = arith.select %529, %522, %437 : vector<8x32xi1>, vector<8x32xf32>
    %531 = vector.extract_strided_slice %489 {offsets = [0, 0], sizes = [8, 32], strides = [1, 1]} : vector<8x128xf32> to vector<8x32xf32>
    %532 = arith.negf %531 : vector<8x32xf32>
    %533 = math.exp %532 : vector<8x32xf32>
    %cst_144 = arith.constant 1.000000e+00 : f32
    %534 = vector.broadcast %cst_144 : f32 to vector<8x32xf32>
    %535 = arith.addf %534, %533 : vector<8x32xf32>
    %536 = arith.divf %534, %535 : vector<8x32xf32>
    %537 = vector.extract_strided_slice %489 {offsets = [0, 32], sizes = [8, 32], strides = [1, 1]} : vector<8x128xf32> to vector<8x32xf32>
    %538 = arith.negf %537 : vector<8x32xf32>
    %539 = math.exp %538 : vector<8x32xf32>
    %cst_145 = arith.constant 1.000000e+00 : f32
    %540 = vector.broadcast %cst_145 : f32 to vector<8x32xf32>
    %541 = arith.addf %540, %539 : vector<8x32xf32>
    %542 = arith.divf %540, %541 : vector<8x32xf32>
    %543 = vector.extract_strided_slice %489 {offsets = [0, 64], sizes = [8, 32], strides = [1, 1]} : vector<8x128xf32> to vector<8x32xf32>
    %544 = math.tanh %543 : vector<8x32xf32>
    %545 = vector.extract_strided_slice %489 {offsets = [0, 96], sizes = [8, 32], strides = [1, 1]} : vector<8x128xf32> to vector<8x32xf32>
    %546 = arith.negf %545 : vector<8x32xf32>
    %547 = math.exp %546 : vector<8x32xf32>
    %cst_146 = arith.constant 1.000000e+00 : f32
    %548 = vector.broadcast %cst_146 : f32 to vector<8x32xf32>
    %549 = arith.addf %548, %547 : vector<8x32xf32>
    %550 = arith.divf %548, %549 : vector<8x32xf32>
    %551 = arith.mulf %542, %468 : vector<8x32xf32>
    %552 = arith.mulf %536, %544 : vector<8x32xf32>
    %553 = arith.addf %551, %552 : vector<8x32xf32>
    %554 = math.tanh %553 : vector<8x32xf32>
    %555 = arith.mulf %550, %554 : vector<8x32xf32>
    %556 = vector.shape_cast %499 : vector<8x1xi1> to vector<8x1xi1>
    %557 = vector.broadcast %556 : vector<8x1xi1> to vector<8x32xi1>
    %558 = arith.select %557, %555, %465 : vector<8x32xi1>, vector<8x32xf32>
    %559 = vector.shape_cast %499 : vector<8x1xi1> to vector<8x1xi1>
    %560 = vector.broadcast %559 : vector<8x1xi1> to vector<8x32xi1>
    %561 = arith.select %560, %553, %468 : vector<8x32xi1>, vector<8x32xf32>
    %562 = arith.index_cast %c5_i32 : i32 to index
    %c0_147 = arith.constant 0 : index
    %c0_148 = arith.constant 0 : index
    %563 = vector.load %arg16[%562, %c0_147, %c0_148] : memref<8x8x32xf32, #tpu.memory_space<vmem>>, vector<1x8x32xf32>
    %564 = vector.shape_cast %563 : vector<1x8x32xf32> to vector<8x32xf32>
    %565 = vector.shape_cast %527 : vector<8x32xf32> to vector<1x8x32xf32>
    tpu.vector_store %arg16[%562, %c0_147, %c0_148], %565 {strides = array<i32>} : memref<8x8x32xf32, #tpu.memory_space<vmem>>, vector<1x8x32xf32>,
    %566 = arith.index_cast %477 : i32 to index
    %c0_149 = arith.constant 0 : index
    %c0_150 = arith.constant 0 : index
    %567 = vector.load %arg17[%566, %c0_149, %c0_150] : memref<8x8x32xf32, #tpu.memory_space<vmem>>, vector<1x8x32xf32>
    %568 = vector.shape_cast %567 : vector<1x8x32xf32> to vector<8x32xf32>
    %569 = vector.shape_cast %558 : vector<8x32xf32> to vector<1x8x32xf32>
    tpu.vector_store %arg17[%566, %c0_149, %c0_150], %569 {strides = array<i32>} : memref<8x8x32xf32, #tpu.memory_space<vmem>>, vector<1x8x32xf32>,
    %c6_i32 = arith.constant 6 : i32
    %c7_i32_151 = arith.constant 7 : i32
    %570 = arith.subi %c7_i32_151, %c6_i32 : i32
    %571 = arith.index_cast %c6_i32 : i32 to index
    %c0_152 = arith.constant 0 : index
    %c0_153 = arith.constant 0 : index
    %572 = vector.load %arg15[%571, %c0_152, %c0_153] : memref<8x8x256xf32, #tpu.memory_space<vmem>>, vector<1x8x256xf32>
    %573 = vector.shape_cast %572 : vector<1x8x256xf32> to vector<8x256xf32>
    %574 = vector.extract_strided_slice %573 {offsets = [0, 0], sizes = [8, 128], strides = [1, 1]} : vector<8x256xf32> to vector<8x128xf32>
    %cst_154 = arith.constant dense<0.000000e+00> : vector<8x128xf32>
    %575 = tpu.matmul %527, %9, %cst_154 {dimension_numbers = #tpu.dot_dimension_numbers<[1], [0], [0], [1], [0, 0, 1, 1], [], []>} : vector<8x32xf32>, vector<32x128xf32>, vector<8x128xf32> -> vector<8x128xf32>
    %576 = arith.addf %574, %575 : vector<8x128xf32>
    %577 = arith.index_cast %570 : i32 to index
    %c0_155 = arith.constant 0 : index
    %c0_156 = arith.constant 0 : index
    %578 = vector.load %arg15[%577, %c0_155, %c0_156] : memref<8x8x256xf32, #tpu.memory_space<vmem>>, vector<1x8x256xf32>
    %579 = vector.shape_cast %578 : vector<1x8x256xf32> to vector<8x256xf32>
    %580 = vector.extract_strided_slice %579 {offsets = [0, 128], sizes = [8, 128], strides = [1, 1]} : vector<8x256xf32> to vector<8x128xf32>
    %cst_157 = arith.constant dense<0.000000e+00> : vector<8x128xf32>
    %581 = tpu.matmul %558, %10, %cst_157 {dimension_numbers = #tpu.dot_dimension_numbers<[1], [0], [0], [1], [0, 0, 1, 1], [], []>} : vector<8x32xf32>, vector<32x128xf32>, vector<8x128xf32> -> vector<8x128xf32>
    %582 = arith.addf %580, %581 : vector<8x128xf32>
    %583 = arith.index_cast %c6_i32 : i32 to index
    %c0_158 = arith.constant 0 : index
    %c0_159 = arith.constant 0 : index
    %584 = vector.load %arg2[%583, %c0_158, %c0_159] : memref<8x8x1xf32, #tpu.memory_space<vmem>>, vector<1x8x1xf32>
    %585 = vector.shape_cast %584 : vector<1x8x1xf32> to vector<8x1xf32>
    %cst_160 = arith.constant 0.000000e+00 : f32
    %586 = vector.broadcast %cst_160 : f32 to vector<8x1xf32>
    %587 = arith.cmpf ogt, %585, %586 : vector<8x1xf32>
    %588 = arith.index_cast %570 : i32 to index
    %c0_161 = arith.constant 0 : index
    %c0_162 = arith.constant 0 : index
    %589 = vector.load %arg2[%588, %c0_161, %c0_162] : memref<8x8x1xf32, #tpu.memory_space<vmem>>, vector<1x8x1xf32>
    %590 = vector.shape_cast %589 : vector<1x8x1xf32> to vector<8x1xf32>
    %cst_163 = arith.constant 0.000000e+00 : f32
    %591 = vector.broadcast %cst_163 : f32 to vector<8x1xf32>
    %592 = arith.cmpf ogt, %590, %591 : vector<8x1xf32>
    %593 = vector.extract_strided_slice %576 {offsets = [0, 0], sizes = [8, 32], strides = [1, 1]} : vector<8x128xf32> to vector<8x32xf32>
    %594 = arith.negf %593 : vector<8x32xf32>
    %595 = math.exp %594 : vector<8x32xf32>
    %cst_164 = arith.constant 1.000000e+00 : f32
    %596 = vector.broadcast %cst_164 : f32 to vector<8x32xf32>
    %597 = arith.addf %596, %595 : vector<8x32xf32>
    %598 = arith.divf %596, %597 : vector<8x32xf32>
    %599 = vector.extract_strided_slice %576 {offsets = [0, 32], sizes = [8, 32], strides = [1, 1]} : vector<8x128xf32> to vector<8x32xf32>
    %600 = arith.negf %599 : vector<8x32xf32>
    %601 = math.exp %600 : vector<8x32xf32>
    %cst_165 = arith.constant 1.000000e+00 : f32
    %602 = vector.broadcast %cst_165 : f32 to vector<8x32xf32>
    %603 = arith.addf %602, %601 : vector<8x32xf32>
    %604 = arith.divf %602, %603 : vector<8x32xf32>
    %605 = vector.extract_strided_slice %576 {offsets = [0, 64], sizes = [8, 32], strides = [1, 1]} : vector<8x128xf32> to vector<8x32xf32>
    %606 = math.tanh %605 : vector<8x32xf32>
    %607 = vector.extract_strided_slice %576 {offsets = [0, 96], sizes = [8, 32], strides = [1, 1]} : vector<8x128xf32> to vector<8x32xf32>
    %608 = arith.negf %607 : vector<8x32xf32>
    %609 = math.exp %608 : vector<8x32xf32>
    %cst_166 = arith.constant 1.000000e+00 : f32
    %610 = vector.broadcast %cst_166 : f32 to vector<8x32xf32>
    %611 = arith.addf %610, %609 : vector<8x32xf32>
    %612 = arith.divf %610, %611 : vector<8x32xf32>
    %613 = arith.mulf %604, %530 : vector<8x32xf32>
    %614 = arith.mulf %598, %606 : vector<8x32xf32>
    %615 = arith.addf %613, %614 : vector<8x32xf32>
    %616 = math.tanh %615 : vector<8x32xf32>
    %617 = arith.mulf %612, %616 : vector<8x32xf32>
    %618 = vector.shape_cast %587 : vector<8x1xi1> to vector<8x1xi1>
    %619 = vector.broadcast %618 : vector<8x1xi1> to vector<8x32xi1>
    %620 = arith.select %619, %617, %527 : vector<8x32xi1>, vector<8x32xf32>
    %621 = vector.shape_cast %587 : vector<8x1xi1> to vector<8x1xi1>
    %622 = vector.broadcast %621 : vector<8x1xi1> to vector<8x32xi1>
    %623 = arith.select %622, %615, %530 : vector<8x32xi1>, vector<8x32xf32>
    %624 = vector.extract_strided_slice %582 {offsets = [0, 0], sizes = [8, 32], strides = [1, 1]} : vector<8x128xf32> to vector<8x32xf32>
    %625 = arith.negf %624 : vector<8x32xf32>
    %626 = math.exp %625 : vector<8x32xf32>
    %cst_167 = arith.constant 1.000000e+00 : f32
    %627 = vector.broadcast %cst_167 : f32 to vector<8x32xf32>
    %628 = arith.addf %627, %626 : vector<8x32xf32>
    %629 = arith.divf %627, %628 : vector<8x32xf32>
    %630 = vector.extract_strided_slice %582 {offsets = [0, 32], sizes = [8, 32], strides = [1, 1]} : vector<8x128xf32> to vector<8x32xf32>
    %631 = arith.negf %630 : vector<8x32xf32>
    %632 = math.exp %631 : vector<8x32xf32>
    %cst_168 = arith.constant 1.000000e+00 : f32
    %633 = vector.broadcast %cst_168 : f32 to vector<8x32xf32>
    %634 = arith.addf %633, %632 : vector<8x32xf32>
    %635 = arith.divf %633, %634 : vector<8x32xf32>
    %636 = vector.extract_strided_slice %582 {offsets = [0, 64], sizes = [8, 32], strides = [1, 1]} : vector<8x128xf32> to vector<8x32xf32>
    %637 = math.tanh %636 : vector<8x32xf32>
    %638 = vector.extract_strided_slice %582 {offsets = [0, 96], sizes = [8, 32], strides = [1, 1]} : vector<8x128xf32> to vector<8x32xf32>
    %639 = arith.negf %638 : vector<8x32xf32>
    %640 = math.exp %639 : vector<8x32xf32>
    %cst_169 = arith.constant 1.000000e+00 : f32
    %641 = vector.broadcast %cst_169 : f32 to vector<8x32xf32>
    %642 = arith.addf %641, %640 : vector<8x32xf32>
    %643 = arith.divf %641, %642 : vector<8x32xf32>
    %644 = arith.mulf %635, %561 : vector<8x32xf32>
    %645 = arith.mulf %629, %637 : vector<8x32xf32>
    %646 = arith.addf %644, %645 : vector<8x32xf32>
    %647 = math.tanh %646 : vector<8x32xf32>
    %648 = arith.mulf %643, %647 : vector<8x32xf32>
    %649 = vector.shape_cast %592 : vector<8x1xi1> to vector<8x1xi1>
    %650 = vector.broadcast %649 : vector<8x1xi1> to vector<8x32xi1>
    %651 = arith.select %650, %648, %558 : vector<8x32xi1>, vector<8x32xf32>
    %652 = vector.shape_cast %592 : vector<8x1xi1> to vector<8x1xi1>
    %653 = vector.broadcast %652 : vector<8x1xi1> to vector<8x32xi1>
    %654 = arith.select %653, %646, %561 : vector<8x32xi1>, vector<8x32xf32>
    %655 = arith.index_cast %c6_i32 : i32 to index
    %c0_170 = arith.constant 0 : index
    %c0_171 = arith.constant 0 : index
    %656 = vector.load %arg16[%655, %c0_170, %c0_171] : memref<8x8x32xf32, #tpu.memory_space<vmem>>, vector<1x8x32xf32>
    %657 = vector.shape_cast %656 : vector<1x8x32xf32> to vector<8x32xf32>
    %658 = vector.shape_cast %620 : vector<8x32xf32> to vector<1x8x32xf32>
    tpu.vector_store %arg16[%655, %c0_170, %c0_171], %658 {strides = array<i32>} : memref<8x8x32xf32, #tpu.memory_space<vmem>>, vector<1x8x32xf32>,
    %659 = arith.index_cast %570 : i32 to index
    %c0_172 = arith.constant 0 : index
    %c0_173 = arith.constant 0 : index
    %660 = vector.load %arg17[%659, %c0_172, %c0_173] : memref<8x8x32xf32, #tpu.memory_space<vmem>>, vector<1x8x32xf32>
    %661 = vector.shape_cast %660 : vector<1x8x32xf32> to vector<8x32xf32>
    %662 = vector.shape_cast %651 : vector<8x32xf32> to vector<1x8x32xf32>
    tpu.vector_store %arg17[%659, %c0_172, %c0_173], %662 {strides = array<i32>} : memref<8x8x32xf32, #tpu.memory_space<vmem>>, vector<1x8x32xf32>,
    %c7_i32_174 = arith.constant 7 : i32
    %c7_i32_175 = arith.constant 7 : i32
    %663 = arith.subi %c7_i32_175, %c7_i32_174 : i32
    %664 = arith.index_cast %c7_i32_174 : i32 to index
    %c0_176 = arith.constant 0 : index
    %c0_177 = arith.constant 0 : index
    %665 = vector.load %arg15[%664, %c0_176, %c0_177] : memref<8x8x256xf32, #tpu.memory_space<vmem>>, vector<1x8x256xf32>
    %666 = vector.shape_cast %665 : vector<1x8x256xf32> to vector<8x256xf32>
    %667 = vector.extract_strided_slice %666 {offsets = [0, 0], sizes = [8, 128], strides = [1, 1]} : vector<8x256xf32> to vector<8x128xf32>
    %cst_178 = arith.constant dense<0.000000e+00> : vector<8x128xf32>
    %668 = tpu.matmul %620, %9, %cst_178 {dimension_numbers = #tpu.dot_dimension_numbers<[1], [0], [0], [1], [0, 0, 1, 1], [], []>} : vector<8x32xf32>, vector<32x128xf32>, vector<8x128xf32> -> vector<8x128xf32>
    %669 = arith.addf %667, %668 : vector<8x128xf32>
    %670 = arith.index_cast %663 : i32 to index
    %c0_179 = arith.constant 0 : index
    %c0_180 = arith.constant 0 : index
    %671 = vector.load %arg15[%670, %c0_179, %c0_180] : memref<8x8x256xf32, #tpu.memory_space<vmem>>, vector<1x8x256xf32>
    %672 = vector.shape_cast %671 : vector<1x8x256xf32> to vector<8x256xf32>
    %673 = vector.extract_strided_slice %672 {offsets = [0, 128], sizes = [8, 128], strides = [1, 1]} : vector<8x256xf32> to vector<8x128xf32>
    %cst_181 = arith.constant dense<0.000000e+00> : vector<8x128xf32>
    %674 = tpu.matmul %651, %10, %cst_181 {dimension_numbers = #tpu.dot_dimension_numbers<[1], [0], [0], [1], [0, 0, 1, 1], [], []>} : vector<8x32xf32>, vector<32x128xf32>, vector<8x128xf32> -> vector<8x128xf32>
    %675 = arith.addf %673, %674 : vector<8x128xf32>
    %676 = arith.index_cast %c7_i32_174 : i32 to index
    %c0_182 = arith.constant 0 : index
    %c0_183 = arith.constant 0 : index
    %677 = vector.load %arg2[%676, %c0_182, %c0_183] : memref<8x8x1xf32, #tpu.memory_space<vmem>>, vector<1x8x1xf32>
    %678 = vector.shape_cast %677 : vector<1x8x1xf32> to vector<8x1xf32>
    %cst_184 = arith.constant 0.000000e+00 : f32
    %679 = vector.broadcast %cst_184 : f32 to vector<8x1xf32>
    %680 = arith.cmpf ogt, %678, %679 : vector<8x1xf32>
    %681 = arith.index_cast %663 : i32 to index
    %c0_185 = arith.constant 0 : index
    %c0_186 = arith.constant 0 : index
    %682 = vector.load %arg2[%681, %c0_185, %c0_186] : memref<8x8x1xf32, #tpu.memory_space<vmem>>, vector<1x8x1xf32>
    %683 = vector.shape_cast %682 : vector<1x8x1xf32> to vector<8x1xf32>
    %cst_187 = arith.constant 0.000000e+00 : f32
    %684 = vector.broadcast %cst_187 : f32 to vector<8x1xf32>
    %685 = arith.cmpf ogt, %683, %684 : vector<8x1xf32>
    %686 = vector.extract_strided_slice %669 {offsets = [0, 0], sizes = [8, 32], strides = [1, 1]} : vector<8x128xf32> to vector<8x32xf32>
    %687 = arith.negf %686 : vector<8x32xf32>
    %688 = math.exp %687 : vector<8x32xf32>
    %cst_188 = arith.constant 1.000000e+00 : f32
    %689 = vector.broadcast %cst_188 : f32 to vector<8x32xf32>
    %690 = arith.addf %689, %688 : vector<8x32xf32>
    %691 = arith.divf %689, %690 : vector<8x32xf32>
    %692 = vector.extract_strided_slice %669 {offsets = [0, 32], sizes = [8, 32], strides = [1, 1]} : vector<8x128xf32> to vector<8x32xf32>
    %693 = arith.negf %692 : vector<8x32xf32>
    %694 = math.exp %693 : vector<8x32xf32>
    %cst_189 = arith.constant 1.000000e+00 : f32
    %695 = vector.broadcast %cst_189 : f32 to vector<8x32xf32>
    %696 = arith.addf %695, %694 : vector<8x32xf32>
    %697 = arith.divf %695, %696 : vector<8x32xf32>
    %698 = vector.extract_strided_slice %669 {offsets = [0, 64], sizes = [8, 32], strides = [1, 1]} : vector<8x128xf32> to vector<8x32xf32>
    %699 = math.tanh %698 : vector<8x32xf32>
    %700 = vector.extract_strided_slice %669 {offsets = [0, 96], sizes = [8, 32], strides = [1, 1]} : vector<8x128xf32> to vector<8x32xf32>
    %701 = arith.negf %700 : vector<8x32xf32>
    %702 = math.exp %701 : vector<8x32xf32>
    %cst_190 = arith.constant 1.000000e+00 : f32
    %703 = vector.broadcast %cst_190 : f32 to vector<8x32xf32>
    %704 = arith.addf %703, %702 : vector<8x32xf32>
    %705 = arith.divf %703, %704 : vector<8x32xf32>
    %706 = arith.mulf %697, %623 : vector<8x32xf32>
    %707 = arith.mulf %691, %699 : vector<8x32xf32>
    %708 = arith.addf %706, %707 : vector<8x32xf32>
    %709 = math.tanh %708 : vector<8x32xf32>
    %710 = arith.mulf %705, %709 : vector<8x32xf32>
    %711 = vector.shape_cast %680 : vector<8x1xi1> to vector<8x1xi1>
    %712 = vector.broadcast %711 : vector<8x1xi1> to vector<8x32xi1>
    %713 = arith.select %712, %710, %620 : vector<8x32xi1>, vector<8x32xf32>
    %714 = vector.shape_cast %680 : vector<8x1xi1> to vector<8x1xi1>
    %715 = vector.broadcast %714 : vector<8x1xi1> to vector<8x32xi1>
    %716 = arith.select %715, %708, %623 : vector<8x32xi1>, vector<8x32xf32>
    %717 = vector.extract_strided_slice %675 {offsets = [0, 0], sizes = [8, 32], strides = [1, 1]} : vector<8x128xf32> to vector<8x32xf32>
    %718 = arith.negf %717 : vector<8x32xf32>
    %719 = math.exp %718 : vector<8x32xf32>
    %cst_191 = arith.constant 1.000000e+00 : f32
    %720 = vector.broadcast %cst_191 : f32 to vector<8x32xf32>
    %721 = arith.addf %720, %719 : vector<8x32xf32>
    %722 = arith.divf %720, %721 : vector<8x32xf32>
    %723 = vector.extract_strided_slice %675 {offsets = [0, 32], sizes = [8, 32], strides = [1, 1]} : vector<8x128xf32> to vector<8x32xf32>
    %724 = arith.negf %723 : vector<8x32xf32>
    %725 = math.exp %724 : vector<8x32xf32>
    %cst_192 = arith.constant 1.000000e+00 : f32
    %726 = vector.broadcast %cst_192 : f32 to vector<8x32xf32>
    %727 = arith.addf %726, %725 : vector<8x32xf32>
    %728 = arith.divf %726, %727 : vector<8x32xf32>
    %729 = vector.extract_strided_slice %675 {offsets = [0, 64], sizes = [8, 32], strides = [1, 1]} : vector<8x128xf32> to vector<8x32xf32>
    %730 = math.tanh %729 : vector<8x32xf32>
    %731 = vector.extract_strided_slice %675 {offsets = [0, 96], sizes = [8, 32], strides = [1, 1]} : vector<8x128xf32> to vector<8x32xf32>
    %732 = arith.negf %731 : vector<8x32xf32>
    %733 = math.exp %732 : vector<8x32xf32>
    %cst_193 = arith.constant 1.000000e+00 : f32
    %734 = vector.broadcast %cst_193 : f32 to vector<8x32xf32>
    %735 = arith.addf %734, %733 : vector<8x32xf32>
    %736 = arith.divf %734, %735 : vector<8x32xf32>
    %737 = arith.mulf %728, %654 : vector<8x32xf32>
    %738 = arith.mulf %722, %730 : vector<8x32xf32>
    %739 = arith.addf %737, %738 : vector<8x32xf32>
    %740 = math.tanh %739 : vector<8x32xf32>
    %741 = arith.mulf %736, %740 : vector<8x32xf32>
    %742 = vector.shape_cast %685 : vector<8x1xi1> to vector<8x1xi1>
    %743 = vector.broadcast %742 : vector<8x1xi1> to vector<8x32xi1>
    %744 = arith.select %743, %741, %651 : vector<8x32xi1>, vector<8x32xf32>
    %745 = vector.shape_cast %685 : vector<8x1xi1> to vector<8x1xi1>
    %746 = vector.broadcast %745 : vector<8x1xi1> to vector<8x32xi1>
    %747 = arith.select %746, %739, %654 : vector<8x32xi1>, vector<8x32xf32>
    %748 = arith.index_cast %c7_i32_174 : i32 to index
    %c0_194 = arith.constant 0 : index
    %c0_195 = arith.constant 0 : index
    %749 = vector.load %arg16[%748, %c0_194, %c0_195] : memref<8x8x32xf32, #tpu.memory_space<vmem>>, vector<1x8x32xf32>
    %750 = vector.shape_cast %749 : vector<1x8x32xf32> to vector<8x32xf32>
    %751 = vector.shape_cast %713 : vector<8x32xf32> to vector<1x8x32xf32>
    tpu.vector_store %arg16[%748, %c0_194, %c0_195], %751 {strides = array<i32>} : memref<8x8x32xf32, #tpu.memory_space<vmem>>, vector<1x8x32xf32>,
    %752 = arith.index_cast %663 : i32 to index
    %c0_196 = arith.constant 0 : index
    %c0_197 = arith.constant 0 : index
    %753 = vector.load %arg17[%752, %c0_196, %c0_197] : memref<8x8x32xf32, #tpu.memory_space<vmem>>, vector<1x8x32xf32>
    %754 = vector.shape_cast %753 : vector<1x8x32xf32> to vector<8x32xf32>
    %755 = vector.shape_cast %744 : vector<8x32xf32> to vector<1x8x32xf32>
    tpu.vector_store %arg17[%752, %c0_196, %c0_197], %755 {strides = array<i32>} : memref<8x8x32xf32, #tpu.memory_space<vmem>>, vector<1x8x32xf32>,
    %c8_i32 = arith.constant 8 : i32
    %c0_198 = arith.constant 0 : index
    %c0_199 = arith.constant 0 : index
    %c0_200 = arith.constant 0 : index
    %756 = vector.load %arg16[%c0_198, %c0_199, %c0_200] : memref<8x8x32xf32, #tpu.memory_space<vmem>>, vector<8x8x32xf32>
    %757 = vector.shape_cast %756 : vector<8x8x32xf32> to vector<64x32xf32>
    %c0_201 = arith.constant 0 : index
    %c0_202 = arith.constant 0 : index
    %c0_203 = arith.constant 0 : index
    %758 = vector.load %arg17[%c0_201, %c0_202, %c0_203] : memref<8x8x32xf32, #tpu.memory_space<vmem>>, vector<8x8x32xf32>
    %759 = vector.shape_cast %758 : vector<8x8x32xf32> to vector<64x32xf32>
    %c0_204 = arith.constant 0 : index
    %c0_205 = arith.constant 0 : index
    %760 = vector.load %arg7[%c0_204, %c0_205] : memref<32x256xf32, #tpu.memory_space<vmem>>, vector<32x256xf32>
    %cst_206 = arith.constant dense<0.000000e+00> : vector<64x256xf32>
    %761 = tpu.matmul %757, %760, %cst_206 {dimension_numbers = #tpu.dot_dimension_numbers<[1], [0], [0], [1], [0, 0, 1, 1], [], []>} : vector<64x32xf32>, vector<32x256xf32>, vector<64x256xf32> -> vector<64x256xf32>
    %c0_207 = arith.constant 0 : index
    %c0_208 = arith.constant 0 : index
    %762 = vector.load %arg8[%c0_207, %c0_208] : memref<32x256xf32, #tpu.memory_space<vmem>>, vector<32x256xf32>
    %cst_209 = arith.constant dense<0.000000e+00> : vector<64x256xf32>
    %763 = tpu.matmul %759, %762, %cst_209 {dimension_numbers = #tpu.dot_dimension_numbers<[1], [0], [0], [1], [0, 0, 1, 1], [], []>} : vector<64x32xf32>, vector<32x256xf32>, vector<64x256xf32> -> vector<64x256xf32>
    %764 = arith.addf %761, %763 : vector<64x256xf32>
    %c0_210 = arith.constant 0 : index
    %c0_211 = arith.constant 0 : index
    %765 = vector.load %arg9[%c0_210, %c0_211] : memref<1x256xf32, #tpu.memory_space<vmem>>, vector<1x256xf32>
    %766 = vector.broadcast %765 : vector<1x256xf32> to vector<64x256xf32>
    %767 = arith.addf %764, %766 : vector<64x256xf32>
    %768 = vector.shape_cast %767 : vector<64x256xf32> to vector<8x8x256xf32>
    %c0_212 = arith.constant 0 : index
    %c0_213 = arith.constant 0 : index
    %c0_214 = arith.constant 0 : index
    %769 = vector.load %arg15[%c0_212, %c0_213, %c0_214] : memref<8x8x256xf32, #tpu.memory_space<vmem>>, vector<8x8x256xf32>
    tpu.vector_store %arg15[%c0_212, %c0_213, %c0_214], %768 {strides = array<i32>} : memref<8x8x256xf32, #tpu.memory_space<vmem>>, vector<8x8x256xf32>,
    %c0_215 = arith.constant 0 : index
    %c0_216 = arith.constant 0 : index
    %770 = vector.load %arg10[%c0_215, %c0_216] : memref<32x128xf32, #tpu.memory_space<vmem>>, vector<32x128xf32>
    %c0_217 = arith.constant 0 : index
    %c0_218 = arith.constant 0 : index
    %771 = vector.load %arg11[%c0_217, %c0_218] : memref<32x128xf32, #tpu.memory_space<vmem>>, vector<32x128xf32>
    %cst_219 = arith.constant 0.000000e+00 : f32
    %772 = vector.broadcast %cst_219 : f32 to vector<8x32xf32>
    %c0_i32_220 = arith.constant 0 : i32
    %c7_i32_221 = arith.constant 7 : i32
    %773 = arith.subi %c7_i32_221, %c0_i32_220 : i32
    %774 = arith.index_cast %c0_i32_220 : i32 to index
    %c0_222 = arith.constant 0 : index
    %c0_223 = arith.constant 0 : index
    %775 = vector.load %arg15[%774, %c0_222, %c0_223] : memref<8x8x256xf32, #tpu.memory_space<vmem>>, vector<1x8x256xf32>
    %776 = vector.shape_cast %775 : vector<1x8x256xf32> to vector<8x256xf32>
    %777 = vector.extract_strided_slice %776 {offsets = [0, 0], sizes = [8, 128], strides = [1, 1]} : vector<8x256xf32> to vector<8x128xf32>
    %cst_224 = arith.constant dense<0.000000e+00> : vector<8x128xf32>
    %778 = tpu.matmul %772, %770, %cst_224 {dimension_numbers = #tpu.dot_dimension_numbers<[1], [0], [0], [1], [0, 0, 1, 1], [], []>} : vector<8x32xf32>, vector<32x128xf32>, vector<8x128xf32> -> vector<8x128xf32>
    %779 = arith.addf %777, %778 : vector<8x128xf32>
    %780 = arith.index_cast %773 : i32 to index
    %c0_225 = arith.constant 0 : index
    %c0_226 = arith.constant 0 : index
    %781 = vector.load %arg15[%780, %c0_225, %c0_226] : memref<8x8x256xf32, #tpu.memory_space<vmem>>, vector<1x8x256xf32>
    %782 = vector.shape_cast %781 : vector<1x8x256xf32> to vector<8x256xf32>
    %783 = vector.extract_strided_slice %782 {offsets = [0, 128], sizes = [8, 128], strides = [1, 1]} : vector<8x256xf32> to vector<8x128xf32>
    %cst_227 = arith.constant dense<0.000000e+00> : vector<8x128xf32>
    %784 = tpu.matmul %772, %771, %cst_227 {dimension_numbers = #tpu.dot_dimension_numbers<[1], [0], [0], [1], [0, 0, 1, 1], [], []>} : vector<8x32xf32>, vector<32x128xf32>, vector<8x128xf32> -> vector<8x128xf32>
    %785 = arith.addf %783, %784 : vector<8x128xf32>
    %786 = arith.index_cast %c0_i32_220 : i32 to index
    %c0_228 = arith.constant 0 : index
    %c0_229 = arith.constant 0 : index
    %787 = vector.load %arg2[%786, %c0_228, %c0_229] : memref<8x8x1xf32, #tpu.memory_space<vmem>>, vector<1x8x1xf32>
    %788 = vector.shape_cast %787 : vector<1x8x1xf32> to vector<8x1xf32>
    %cst_230 = arith.constant 0.000000e+00 : f32
    %789 = vector.broadcast %cst_230 : f32 to vector<8x1xf32>
    %790 = arith.cmpf ogt, %788, %789 : vector<8x1xf32>
    %791 = arith.index_cast %773 : i32 to index
    %c0_231 = arith.constant 0 : index
    %c0_232 = arith.constant 0 : index
    %792 = vector.load %arg2[%791, %c0_231, %c0_232] : memref<8x8x1xf32, #tpu.memory_space<vmem>>, vector<1x8x1xf32>
    %793 = vector.shape_cast %792 : vector<1x8x1xf32> to vector<8x1xf32>
    %cst_233 = arith.constant 0.000000e+00 : f32
    %794 = vector.broadcast %cst_233 : f32 to vector<8x1xf32>
    %795 = arith.cmpf ogt, %793, %794 : vector<8x1xf32>
    %796 = vector.extract_strided_slice %779 {offsets = [0, 0], sizes = [8, 32], strides = [1, 1]} : vector<8x128xf32> to vector<8x32xf32>
    %797 = arith.negf %796 : vector<8x32xf32>
    %798 = math.exp %797 : vector<8x32xf32>
    %cst_234 = arith.constant 1.000000e+00 : f32
    %799 = vector.broadcast %cst_234 : f32 to vector<8x32xf32>
    %800 = arith.addf %799, %798 : vector<8x32xf32>
    %801 = arith.divf %799, %800 : vector<8x32xf32>
    %802 = vector.extract_strided_slice %779 {offsets = [0, 32], sizes = [8, 32], strides = [1, 1]} : vector<8x128xf32> to vector<8x32xf32>
    %803 = arith.negf %802 : vector<8x32xf32>
    %804 = math.exp %803 : vector<8x32xf32>
    %cst_235 = arith.constant 1.000000e+00 : f32
    %805 = vector.broadcast %cst_235 : f32 to vector<8x32xf32>
    %806 = arith.addf %805, %804 : vector<8x32xf32>
    %807 = arith.divf %805, %806 : vector<8x32xf32>
    %808 = vector.extract_strided_slice %779 {offsets = [0, 64], sizes = [8, 32], strides = [1, 1]} : vector<8x128xf32> to vector<8x32xf32>
    %809 = math.tanh %808 : vector<8x32xf32>
    %810 = vector.extract_strided_slice %779 {offsets = [0, 96], sizes = [8, 32], strides = [1, 1]} : vector<8x128xf32> to vector<8x32xf32>
    %811 = arith.negf %810 : vector<8x32xf32>
    %812 = math.exp %811 : vector<8x32xf32>
    %cst_236 = arith.constant 1.000000e+00 : f32
    %813 = vector.broadcast %cst_236 : f32 to vector<8x32xf32>
    %814 = arith.addf %813, %812 : vector<8x32xf32>
    %815 = arith.divf %813, %814 : vector<8x32xf32>
    %816 = arith.mulf %807, %772 : vector<8x32xf32>
    %817 = arith.mulf %801, %809 : vector<8x32xf32>
    %818 = arith.addf %816, %817 : vector<8x32xf32>
    %819 = math.tanh %818 : vector<8x32xf32>
    %820 = arith.mulf %815, %819 : vector<8x32xf32>
    %821 = vector.shape_cast %790 : vector<8x1xi1> to vector<8x1xi1>
    %822 = vector.broadcast %821 : vector<8x1xi1> to vector<8x32xi1>
    %823 = arith.select %822, %820, %772 : vector<8x32xi1>, vector<8x32xf32>
    %824 = vector.shape_cast %790 : vector<8x1xi1> to vector<8x1xi1>
    %825 = vector.broadcast %824 : vector<8x1xi1> to vector<8x32xi1>
    %826 = arith.select %825, %818, %772 : vector<8x32xi1>, vector<8x32xf32>
    %827 = vector.extract_strided_slice %785 {offsets = [0, 0], sizes = [8, 32], strides = [1, 1]} : vector<8x128xf32> to vector<8x32xf32>
    %828 = arith.negf %827 : vector<8x32xf32>
    %829 = math.exp %828 : vector<8x32xf32>
    %cst_237 = arith.constant 1.000000e+00 : f32
    %830 = vector.broadcast %cst_237 : f32 to vector<8x32xf32>
    %831 = arith.addf %830, %829 : vector<8x32xf32>
    %832 = arith.divf %830, %831 : vector<8x32xf32>
    %833 = vector.extract_strided_slice %785 {offsets = [0, 32], sizes = [8, 32], strides = [1, 1]} : vector<8x128xf32> to vector<8x32xf32>
    %834 = arith.negf %833 : vector<8x32xf32>
    %835 = math.exp %834 : vector<8x32xf32>
    %cst_238 = arith.constant 1.000000e+00 : f32
    %836 = vector.broadcast %cst_238 : f32 to vector<8x32xf32>
    %837 = arith.addf %836, %835 : vector<8x32xf32>
    %838 = arith.divf %836, %837 : vector<8x32xf32>
    %839 = vector.extract_strided_slice %785 {offsets = [0, 64], sizes = [8, 32], strides = [1, 1]} : vector<8x128xf32> to vector<8x32xf32>
    %840 = math.tanh %839 : vector<8x32xf32>
    %841 = vector.extract_strided_slice %785 {offsets = [0, 96], sizes = [8, 32], strides = [1, 1]} : vector<8x128xf32> to vector<8x32xf32>
    %842 = arith.negf %841 : vector<8x32xf32>
    %843 = math.exp %842 : vector<8x32xf32>
    %cst_239 = arith.constant 1.000000e+00 : f32
    %844 = vector.broadcast %cst_239 : f32 to vector<8x32xf32>
    %845 = arith.addf %844, %843 : vector<8x32xf32>
    %846 = arith.divf %844, %845 : vector<8x32xf32>
    %847 = arith.mulf %838, %772 : vector<8x32xf32>
    %848 = arith.mulf %832, %840 : vector<8x32xf32>
    %849 = arith.addf %847, %848 : vector<8x32xf32>
    %850 = math.tanh %849 : vector<8x32xf32>
    %851 = arith.mulf %846, %850 : vector<8x32xf32>
    %852 = vector.shape_cast %795 : vector<8x1xi1> to vector<8x1xi1>
    %853 = vector.broadcast %852 : vector<8x1xi1> to vector<8x32xi1>
    %854 = arith.select %853, %851, %772 : vector<8x32xi1>, vector<8x32xf32>
    %855 = vector.shape_cast %795 : vector<8x1xi1> to vector<8x1xi1>
    %856 = vector.broadcast %855 : vector<8x1xi1> to vector<8x32xi1>
    %857 = arith.select %856, %849, %772 : vector<8x32xi1>, vector<8x32xf32>
    %c1_i32_240 = arith.constant 1 : i32
    %c7_i32_241 = arith.constant 7 : i32
    %858 = arith.subi %c7_i32_241, %c1_i32_240 : i32
    %859 = arith.index_cast %c1_i32_240 : i32 to index
    %c0_242 = arith.constant 0 : index
    %c0_243 = arith.constant 0 : index
    %860 = vector.load %arg15[%859, %c0_242, %c0_243] : memref<8x8x256xf32, #tpu.memory_space<vmem>>, vector<1x8x256xf32>
    %861 = vector.shape_cast %860 : vector<1x8x256xf32> to vector<8x256xf32>
    %862 = vector.extract_strided_slice %861 {offsets = [0, 0], sizes = [8, 128], strides = [1, 1]} : vector<8x256xf32> to vector<8x128xf32>
    %cst_244 = arith.constant dense<0.000000e+00> : vector<8x128xf32>
    %863 = tpu.matmul %823, %770, %cst_244 {dimension_numbers = #tpu.dot_dimension_numbers<[1], [0], [0], [1], [0, 0, 1, 1], [], []>} : vector<8x32xf32>, vector<32x128xf32>, vector<8x128xf32> -> vector<8x128xf32>
    %864 = arith.addf %862, %863 : vector<8x128xf32>
    %865 = arith.index_cast %858 : i32 to index
    %c0_245 = arith.constant 0 : index
    %c0_246 = arith.constant 0 : index
    %866 = vector.load %arg15[%865, %c0_245, %c0_246] : memref<8x8x256xf32, #tpu.memory_space<vmem>>, vector<1x8x256xf32>
    %867 = vector.shape_cast %866 : vector<1x8x256xf32> to vector<8x256xf32>
    %868 = vector.extract_strided_slice %867 {offsets = [0, 128], sizes = [8, 128], strides = [1, 1]} : vector<8x256xf32> to vector<8x128xf32>
    %cst_247 = arith.constant dense<0.000000e+00> : vector<8x128xf32>
    %869 = tpu.matmul %854, %771, %cst_247 {dimension_numbers = #tpu.dot_dimension_numbers<[1], [0], [0], [1], [0, 0, 1, 1], [], []>} : vector<8x32xf32>, vector<32x128xf32>, vector<8x128xf32> -> vector<8x128xf32>
    %870 = arith.addf %868, %869 : vector<8x128xf32>
    %871 = arith.index_cast %c1_i32_240 : i32 to index
    %c0_248 = arith.constant 0 : index
    %c0_249 = arith.constant 0 : index
    %872 = vector.load %arg2[%871, %c0_248, %c0_249] : memref<8x8x1xf32, #tpu.memory_space<vmem>>, vector<1x8x1xf32>
    %873 = vector.shape_cast %872 : vector<1x8x1xf32> to vector<8x1xf32>
    %cst_250 = arith.constant 0.000000e+00 : f32
    %874 = vector.broadcast %cst_250 : f32 to vector<8x1xf32>
    %875 = arith.cmpf ogt, %873, %874 : vector<8x1xf32>
    %876 = arith.index_cast %858 : i32 to index
    %c0_251 = arith.constant 0 : index
    %c0_252 = arith.constant 0 : index
    %877 = vector.load %arg2[%876, %c0_251, %c0_252] : memref<8x8x1xf32, #tpu.memory_space<vmem>>, vector<1x8x1xf32>
    %878 = vector.shape_cast %877 : vector<1x8x1xf32> to vector<8x1xf32>
    %cst_253 = arith.constant 0.000000e+00 : f32
    %879 = vector.broadcast %cst_253 : f32 to vector<8x1xf32>
    %880 = arith.cmpf ogt, %878, %879 : vector<8x1xf32>
    %881 = vector.extract_strided_slice %864 {offsets = [0, 0], sizes = [8, 32], strides = [1, 1]} : vector<8x128xf32> to vector<8x32xf32>
    %882 = arith.negf %881 : vector<8x32xf32>
    %883 = math.exp %882 : vector<8x32xf32>
    %cst_254 = arith.constant 1.000000e+00 : f32
    %884 = vector.broadcast %cst_254 : f32 to vector<8x32xf32>
    %885 = arith.addf %884, %883 : vector<8x32xf32>
    %886 = arith.divf %884, %885 : vector<8x32xf32>
    %887 = vector.extract_strided_slice %864 {offsets = [0, 32], sizes = [8, 32], strides = [1, 1]} : vector<8x128xf32> to vector<8x32xf32>
    %888 = arith.negf %887 : vector<8x32xf32>
    %889 = math.exp %888 : vector<8x32xf32>
    %cst_255 = arith.constant 1.000000e+00 : f32
    %890 = vector.broadcast %cst_255 : f32 to vector<8x32xf32>
    %891 = arith.addf %890, %889 : vector<8x32xf32>
    %892 = arith.divf %890, %891 : vector<8x32xf32>
    %893 = vector.extract_strided_slice %864 {offsets = [0, 64], sizes = [8, 32], strides = [1, 1]} : vector<8x128xf32> to vector<8x32xf32>
    %894 = math.tanh %893 : vector<8x32xf32>
    %895 = vector.extract_strided_slice %864 {offsets = [0, 96], sizes = [8, 32], strides = [1, 1]} : vector<8x128xf32> to vector<8x32xf32>
    %896 = arith.negf %895 : vector<8x32xf32>
    %897 = math.exp %896 : vector<8x32xf32>
    %cst_256 = arith.constant 1.000000e+00 : f32
    %898 = vector.broadcast %cst_256 : f32 to vector<8x32xf32>
    %899 = arith.addf %898, %897 : vector<8x32xf32>
    %900 = arith.divf %898, %899 : vector<8x32xf32>
    %901 = arith.mulf %892, %826 : vector<8x32xf32>
    %902 = arith.mulf %886, %894 : vector<8x32xf32>
    %903 = arith.addf %901, %902 : vector<8x32xf32>
    %904 = math.tanh %903 : vector<8x32xf32>
    %905 = arith.mulf %900, %904 : vector<8x32xf32>
    %906 = vector.shape_cast %875 : vector<8x1xi1> to vector<8x1xi1>
    %907 = vector.broadcast %906 : vector<8x1xi1> to vector<8x32xi1>
    %908 = arith.select %907, %905, %823 : vector<8x32xi1>, vector<8x32xf32>
    %909 = vector.shape_cast %875 : vector<8x1xi1> to vector<8x1xi1>
    %910 = vector.broadcast %909 : vector<8x1xi1> to vector<8x32xi1>
    %911 = arith.select %910, %903, %826 : vector<8x32xi1>, vector<8x32xf32>
    %912 = vector.extract_strided_slice %870 {offsets = [0, 0], sizes = [8, 32], strides = [1, 1]} : vector<8x128xf32> to vector<8x32xf32>
    %913 = arith.negf %912 : vector<8x32xf32>
    %914 = math.exp %913 : vector<8x32xf32>
    %cst_257 = arith.constant 1.000000e+00 : f32
    %915 = vector.broadcast %cst_257 : f32 to vector<8x32xf32>
    %916 = arith.addf %915, %914 : vector<8x32xf32>
    %917 = arith.divf %915, %916 : vector<8x32xf32>
    %918 = vector.extract_strided_slice %870 {offsets = [0, 32], sizes = [8, 32], strides = [1, 1]} : vector<8x128xf32> to vector<8x32xf32>
    %919 = arith.negf %918 : vector<8x32xf32>
    %920 = math.exp %919 : vector<8x32xf32>
    %cst_258 = arith.constant 1.000000e+00 : f32
    %921 = vector.broadcast %cst_258 : f32 to vector<8x32xf32>
    %922 = arith.addf %921, %920 : vector<8x32xf32>
    %923 = arith.divf %921, %922 : vector<8x32xf32>
    %924 = vector.extract_strided_slice %870 {offsets = [0, 64], sizes = [8, 32], strides = [1, 1]} : vector<8x128xf32> to vector<8x32xf32>
    %925 = math.tanh %924 : vector<8x32xf32>
    %926 = vector.extract_strided_slice %870 {offsets = [0, 96], sizes = [8, 32], strides = [1, 1]} : vector<8x128xf32> to vector<8x32xf32>
    %927 = arith.negf %926 : vector<8x32xf32>
    %928 = math.exp %927 : vector<8x32xf32>
    %cst_259 = arith.constant 1.000000e+00 : f32
    %929 = vector.broadcast %cst_259 : f32 to vector<8x32xf32>
    %930 = arith.addf %929, %928 : vector<8x32xf32>
    %931 = arith.divf %929, %930 : vector<8x32xf32>
    %932 = arith.mulf %923, %857 : vector<8x32xf32>
    %933 = arith.mulf %917, %925 : vector<8x32xf32>
    %934 = arith.addf %932, %933 : vector<8x32xf32>
    %935 = math.tanh %934 : vector<8x32xf32>
    %936 = arith.mulf %931, %935 : vector<8x32xf32>
    %937 = vector.shape_cast %880 : vector<8x1xi1> to vector<8x1xi1>
    %938 = vector.broadcast %937 : vector<8x1xi1> to vector<8x32xi1>
    %939 = arith.select %938, %936, %854 : vector<8x32xi1>, vector<8x32xf32>
    %940 = vector.shape_cast %880 : vector<8x1xi1> to vector<8x1xi1>
    %941 = vector.broadcast %940 : vector<8x1xi1> to vector<8x32xi1>
    %942 = arith.select %941, %934, %857 : vector<8x32xi1>, vector<8x32xf32>
    %c2_i32_260 = arith.constant 2 : i32
    %c7_i32_261 = arith.constant 7 : i32
    %943 = arith.subi %c7_i32_261, %c2_i32_260 : i32
    %944 = arith.index_cast %c2_i32_260 : i32 to index
    %c0_262 = arith.constant 0 : index
    %c0_263 = arith.constant 0 : index
    %945 = vector.load %arg15[%944, %c0_262, %c0_263] : memref<8x8x256xf32, #tpu.memory_space<vmem>>, vector<1x8x256xf32>
    %946 = vector.shape_cast %945 : vector<1x8x256xf32> to vector<8x256xf32>
    %947 = vector.extract_strided_slice %946 {offsets = [0, 0], sizes = [8, 128], strides = [1, 1]} : vector<8x256xf32> to vector<8x128xf32>
    %cst_264 = arith.constant dense<0.000000e+00> : vector<8x128xf32>
    %948 = tpu.matmul %908, %770, %cst_264 {dimension_numbers = #tpu.dot_dimension_numbers<[1], [0], [0], [1], [0, 0, 1, 1], [], []>} : vector<8x32xf32>, vector<32x128xf32>, vector<8x128xf32> -> vector<8x128xf32>
    %949 = arith.addf %947, %948 : vector<8x128xf32>
    %950 = arith.index_cast %943 : i32 to index
    %c0_265 = arith.constant 0 : index
    %c0_266 = arith.constant 0 : index
    %951 = vector.load %arg15[%950, %c0_265, %c0_266] : memref<8x8x256xf32, #tpu.memory_space<vmem>>, vector<1x8x256xf32>
    %952 = vector.shape_cast %951 : vector<1x8x256xf32> to vector<8x256xf32>
    %953 = vector.extract_strided_slice %952 {offsets = [0, 128], sizes = [8, 128], strides = [1, 1]} : vector<8x256xf32> to vector<8x128xf32>
    %cst_267 = arith.constant dense<0.000000e+00> : vector<8x128xf32>
    %954 = tpu.matmul %939, %771, %cst_267 {dimension_numbers = #tpu.dot_dimension_numbers<[1], [0], [0], [1], [0, 0, 1, 1], [], []>} : vector<8x32xf32>, vector<32x128xf32>, vector<8x128xf32> -> vector<8x128xf32>
    %955 = arith.addf %953, %954 : vector<8x128xf32>
    %956 = arith.index_cast %c2_i32_260 : i32 to index
    %c0_268 = arith.constant 0 : index
    %c0_269 = arith.constant 0 : index
    %957 = vector.load %arg2[%956, %c0_268, %c0_269] : memref<8x8x1xf32, #tpu.memory_space<vmem>>, vector<1x8x1xf32>
    %958 = vector.shape_cast %957 : vector<1x8x1xf32> to vector<8x1xf32>
    %cst_270 = arith.constant 0.000000e+00 : f32
    %959 = vector.broadcast %cst_270 : f32 to vector<8x1xf32>
    %960 = arith.cmpf ogt, %958, %959 : vector<8x1xf32>
    %961 = arith.index_cast %943 : i32 to index
    %c0_271 = arith.constant 0 : index
    %c0_272 = arith.constant 0 : index
    %962 = vector.load %arg2[%961, %c0_271, %c0_272] : memref<8x8x1xf32, #tpu.memory_space<vmem>>, vector<1x8x1xf32>
    %963 = vector.shape_cast %962 : vector<1x8x1xf32> to vector<8x1xf32>
    %cst_273 = arith.constant 0.000000e+00 : f32
    %964 = vector.broadcast %cst_273 : f32 to vector<8x1xf32>
    %965 = arith.cmpf ogt, %963, %964 : vector<8x1xf32>
    %966 = vector.extract_strided_slice %949 {offsets = [0, 0], sizes = [8, 32], strides = [1, 1]} : vector<8x128xf32> to vector<8x32xf32>
    %967 = arith.negf %966 : vector<8x32xf32>
    %968 = math.exp %967 : vector<8x32xf32>
    %cst_274 = arith.constant 1.000000e+00 : f32
    %969 = vector.broadcast %cst_274 : f32 to vector<8x32xf32>
    %970 = arith.addf %969, %968 : vector<8x32xf32>
    %971 = arith.divf %969, %970 : vector<8x32xf32>
    %972 = vector.extract_strided_slice %949 {offsets = [0, 32], sizes = [8, 32], strides = [1, 1]} : vector<8x128xf32> to vector<8x32xf32>
    %973 = arith.negf %972 : vector<8x32xf32>
    %974 = math.exp %973 : vector<8x32xf32>
    %cst_275 = arith.constant 1.000000e+00 : f32
    %975 = vector.broadcast %cst_275 : f32 to vector<8x32xf32>
    %976 = arith.addf %975, %974 : vector<8x32xf32>
    %977 = arith.divf %975, %976 : vector<8x32xf32>
    %978 = vector.extract_strided_slice %949 {offsets = [0, 64], sizes = [8, 32], strides = [1, 1]} : vector<8x128xf32> to vector<8x32xf32>
    %979 = math.tanh %978 : vector<8x32xf32>
    %980 = vector.extract_strided_slice %949 {offsets = [0, 96], sizes = [8, 32], strides = [1, 1]} : vector<8x128xf32> to vector<8x32xf32>
    %981 = arith.negf %980 : vector<8x32xf32>
    %982 = math.exp %981 : vector<8x32xf32>
    %cst_276 = arith.constant 1.000000e+00 : f32
    %983 = vector.broadcast %cst_276 : f32 to vector<8x32xf32>
    %984 = arith.addf %983, %982 : vector<8x32xf32>
    %985 = arith.divf %983, %984 : vector<8x32xf32>
    %986 = arith.mulf %977, %911 : vector<8x32xf32>
    %987 = arith.mulf %971, %979 : vector<8x32xf32>
    %988 = arith.addf %986, %987 : vector<8x32xf32>
    %989 = math.tanh %988 : vector<8x32xf32>
    %990 = arith.mulf %985, %989 : vector<8x32xf32>
    %991 = vector.shape_cast %960 : vector<8x1xi1> to vector<8x1xi1>
    %992 = vector.broadcast %991 : vector<8x1xi1> to vector<8x32xi1>
    %993 = arith.select %992, %990, %908 : vector<8x32xi1>, vector<8x32xf32>
    %994 = vector.shape_cast %960 : vector<8x1xi1> to vector<8x1xi1>
    %995 = vector.broadcast %994 : vector<8x1xi1> to vector<8x32xi1>
    %996 = arith.select %995, %988, %911 : vector<8x32xi1>, vector<8x32xf32>
    %997 = vector.extract_strided_slice %955 {offsets = [0, 0], sizes = [8, 32], strides = [1, 1]} : vector<8x128xf32> to vector<8x32xf32>
    %998 = arith.negf %997 : vector<8x32xf32>
    %999 = math.exp %998 : vector<8x32xf32>
    %cst_277 = arith.constant 1.000000e+00 : f32
    %1000 = vector.broadcast %cst_277 : f32 to vector<8x32xf32>
    %1001 = arith.addf %1000, %999 : vector<8x32xf32>
    %1002 = arith.divf %1000, %1001 : vector<8x32xf32>
    %1003 = vector.extract_strided_slice %955 {offsets = [0, 32], sizes = [8, 32], strides = [1, 1]} : vector<8x128xf32> to vector<8x32xf32>
    %1004 = arith.negf %1003 : vector<8x32xf32>
    %1005 = math.exp %1004 : vector<8x32xf32>
    %cst_278 = arith.constant 1.000000e+00 : f32
    %1006 = vector.broadcast %cst_278 : f32 to vector<8x32xf32>
    %1007 = arith.addf %1006, %1005 : vector<8x32xf32>
    %1008 = arith.divf %1006, %1007 : vector<8x32xf32>
    %1009 = vector.extract_strided_slice %955 {offsets = [0, 64], sizes = [8, 32], strides = [1, 1]} : vector<8x128xf32> to vector<8x32xf32>
    %1010 = math.tanh %1009 : vector<8x32xf32>
    %1011 = vector.extract_strided_slice %955 {offsets = [0, 96], sizes = [8, 32], strides = [1, 1]} : vector<8x128xf32> to vector<8x32xf32>
    %1012 = arith.negf %1011 : vector<8x32xf32>
    %1013 = math.exp %1012 : vector<8x32xf32>
    %cst_279 = arith.constant 1.000000e+00 : f32
    %1014 = vector.broadcast %cst_279 : f32 to vector<8x32xf32>
    %1015 = arith.addf %1014, %1013 : vector<8x32xf32>
    %1016 = arith.divf %1014, %1015 : vector<8x32xf32>
    %1017 = arith.mulf %1008, %942 : vector<8x32xf32>
    %1018 = arith.mulf %1002, %1010 : vector<8x32xf32>
    %1019 = arith.addf %1017, %1018 : vector<8x32xf32>
    %1020 = math.tanh %1019 : vector<8x32xf32>
    %1021 = arith.mulf %1016, %1020 : vector<8x32xf32>
    %1022 = vector.shape_cast %965 : vector<8x1xi1> to vector<8x1xi1>
    %1023 = vector.broadcast %1022 : vector<8x1xi1> to vector<8x32xi1>
    %1024 = arith.select %1023, %1021, %939 : vector<8x32xi1>, vector<8x32xf32>
    %1025 = vector.shape_cast %965 : vector<8x1xi1> to vector<8x1xi1>
    %1026 = vector.broadcast %1025 : vector<8x1xi1> to vector<8x32xi1>
    %1027 = arith.select %1026, %1019, %942 : vector<8x32xi1>, vector<8x32xf32>
    %c3_i32_280 = arith.constant 3 : i32
    %c7_i32_281 = arith.constant 7 : i32
    %1028 = arith.subi %c7_i32_281, %c3_i32_280 : i32
    %1029 = arith.index_cast %c3_i32_280 : i32 to index
    %c0_282 = arith.constant 0 : index
    %c0_283 = arith.constant 0 : index
    %1030 = vector.load %arg15[%1029, %c0_282, %c0_283] : memref<8x8x256xf32, #tpu.memory_space<vmem>>, vector<1x8x256xf32>
    %1031 = vector.shape_cast %1030 : vector<1x8x256xf32> to vector<8x256xf32>
    %1032 = vector.extract_strided_slice %1031 {offsets = [0, 0], sizes = [8, 128], strides = [1, 1]} : vector<8x256xf32> to vector<8x128xf32>
    %cst_284 = arith.constant dense<0.000000e+00> : vector<8x128xf32>
    %1033 = tpu.matmul %993, %770, %cst_284 {dimension_numbers = #tpu.dot_dimension_numbers<[1], [0], [0], [1], [0, 0, 1, 1], [], []>} : vector<8x32xf32>, vector<32x128xf32>, vector<8x128xf32> -> vector<8x128xf32>
    %1034 = arith.addf %1032, %1033 : vector<8x128xf32>
    %1035 = arith.index_cast %1028 : i32 to index
    %c0_285 = arith.constant 0 : index
    %c0_286 = arith.constant 0 : index
    %1036 = vector.load %arg15[%1035, %c0_285, %c0_286] : memref<8x8x256xf32, #tpu.memory_space<vmem>>, vector<1x8x256xf32>
    %1037 = vector.shape_cast %1036 : vector<1x8x256xf32> to vector<8x256xf32>
    %1038 = vector.extract_strided_slice %1037 {offsets = [0, 128], sizes = [8, 128], strides = [1, 1]} : vector<8x256xf32> to vector<8x128xf32>
    %cst_287 = arith.constant dense<0.000000e+00> : vector<8x128xf32>
    %1039 = tpu.matmul %1024, %771, %cst_287 {dimension_numbers = #tpu.dot_dimension_numbers<[1], [0], [0], [1], [0, 0, 1, 1], [], []>} : vector<8x32xf32>, vector<32x128xf32>, vector<8x128xf32> -> vector<8x128xf32>
    %1040 = arith.addf %1038, %1039 : vector<8x128xf32>
    %1041 = arith.index_cast %c3_i32_280 : i32 to index
    %c0_288 = arith.constant 0 : index
    %c0_289 = arith.constant 0 : index
    %1042 = vector.load %arg2[%1041, %c0_288, %c0_289] : memref<8x8x1xf32, #tpu.memory_space<vmem>>, vector<1x8x1xf32>
    %1043 = vector.shape_cast %1042 : vector<1x8x1xf32> to vector<8x1xf32>
    %cst_290 = arith.constant 0.000000e+00 : f32
    %1044 = vector.broadcast %cst_290 : f32 to vector<8x1xf32>
    %1045 = arith.cmpf ogt, %1043, %1044 : vector<8x1xf32>
    %1046 = arith.index_cast %1028 : i32 to index
    %c0_291 = arith.constant 0 : index
    %c0_292 = arith.constant 0 : index
    %1047 = vector.load %arg2[%1046, %c0_291, %c0_292] : memref<8x8x1xf32, #tpu.memory_space<vmem>>, vector<1x8x1xf32>
    %1048 = vector.shape_cast %1047 : vector<1x8x1xf32> to vector<8x1xf32>
    %cst_293 = arith.constant 0.000000e+00 : f32
    %1049 = vector.broadcast %cst_293 : f32 to vector<8x1xf32>
    %1050 = arith.cmpf ogt, %1048, %1049 : vector<8x1xf32>
    %1051 = vector.extract_strided_slice %1034 {offsets = [0, 0], sizes = [8, 32], strides = [1, 1]} : vector<8x128xf32> to vector<8x32xf32>
    %1052 = arith.negf %1051 : vector<8x32xf32>
    %1053 = math.exp %1052 : vector<8x32xf32>
    %cst_294 = arith.constant 1.000000e+00 : f32
    %1054 = vector.broadcast %cst_294 : f32 to vector<8x32xf32>
    %1055 = arith.addf %1054, %1053 : vector<8x32xf32>
    %1056 = arith.divf %1054, %1055 : vector<8x32xf32>
    %1057 = vector.extract_strided_slice %1034 {offsets = [0, 32], sizes = [8, 32], strides = [1, 1]} : vector<8x128xf32> to vector<8x32xf32>
    %1058 = arith.negf %1057 : vector<8x32xf32>
    %1059 = math.exp %1058 : vector<8x32xf32>
    %cst_295 = arith.constant 1.000000e+00 : f32
    %1060 = vector.broadcast %cst_295 : f32 to vector<8x32xf32>
    %1061 = arith.addf %1060, %1059 : vector<8x32xf32>
    %1062 = arith.divf %1060, %1061 : vector<8x32xf32>
    %1063 = vector.extract_strided_slice %1034 {offsets = [0, 64], sizes = [8, 32], strides = [1, 1]} : vector<8x128xf32> to vector<8x32xf32>
    %1064 = math.tanh %1063 : vector<8x32xf32>
    %1065 = vector.extract_strided_slice %1034 {offsets = [0, 96], sizes = [8, 32], strides = [1, 1]} : vector<8x128xf32> to vector<8x32xf32>
    %1066 = arith.negf %1065 : vector<8x32xf32>
    %1067 = math.exp %1066 : vector<8x32xf32>
    %cst_296 = arith.constant 1.000000e+00 : f32
    %1068 = vector.broadcast %cst_296 : f32 to vector<8x32xf32>
    %1069 = arith.addf %1068, %1067 : vector<8x32xf32>
    %1070 = arith.divf %1068, %1069 : vector<8x32xf32>
    %1071 = arith.mulf %1062, %996 : vector<8x32xf32>
    %1072 = arith.mulf %1056, %1064 : vector<8x32xf32>
    %1073 = arith.addf %1071, %1072 : vector<8x32xf32>
    %1074 = math.tanh %1073 : vector<8x32xf32>
    %1075 = arith.mulf %1070, %1074 : vector<8x32xf32>
    %1076 = vector.shape_cast %1045 : vector<8x1xi1> to vector<8x1xi1>
    %1077 = vector.broadcast %1076 : vector<8x1xi1> to vector<8x32xi1>
    %1078 = arith.select %1077, %1075, %993 : vector<8x32xi1>, vector<8x32xf32>
    %1079 = vector.shape_cast %1045 : vector<8x1xi1> to vector<8x1xi1>
    %1080 = vector.broadcast %1079 : vector<8x1xi1> to vector<8x32xi1>
    %1081 = arith.select %1080, %1073, %996 : vector<8x32xi1>, vector<8x32xf32>
    %1082 = vector.extract_strided_slice %1040 {offsets = [0, 0], sizes = [8, 32], strides = [1, 1]} : vector<8x128xf32> to vector<8x32xf32>
    %1083 = arith.negf %1082 : vector<8x32xf32>
    %1084 = math.exp %1083 : vector<8x32xf32>
    %cst_297 = arith.constant 1.000000e+00 : f32
    %1085 = vector.broadcast %cst_297 : f32 to vector<8x32xf32>
    %1086 = arith.addf %1085, %1084 : vector<8x32xf32>
    %1087 = arith.divf %1085, %1086 : vector<8x32xf32>
    %1088 = vector.extract_strided_slice %1040 {offsets = [0, 32], sizes = [8, 32], strides = [1, 1]} : vector<8x128xf32> to vector<8x32xf32>
    %1089 = arith.negf %1088 : vector<8x32xf32>
    %1090 = math.exp %1089 : vector<8x32xf32>
    %cst_298 = arith.constant 1.000000e+00 : f32
    %1091 = vector.broadcast %cst_298 : f32 to vector<8x32xf32>
    %1092 = arith.addf %1091, %1090 : vector<8x32xf32>
    %1093 = arith.divf %1091, %1092 : vector<8x32xf32>
    %1094 = vector.extract_strided_slice %1040 {offsets = [0, 64], sizes = [8, 32], strides = [1, 1]} : vector<8x128xf32> to vector<8x32xf32>
    %1095 = math.tanh %1094 : vector<8x32xf32>
    %1096 = vector.extract_strided_slice %1040 {offsets = [0, 96], sizes = [8, 32], strides = [1, 1]} : vector<8x128xf32> to vector<8x32xf32>
    %1097 = arith.negf %1096 : vector<8x32xf32>
    %1098 = math.exp %1097 : vector<8x32xf32>
    %cst_299 = arith.constant 1.000000e+00 : f32
    %1099 = vector.broadcast %cst_299 : f32 to vector<8x32xf32>
    %1100 = arith.addf %1099, %1098 : vector<8x32xf32>
    %1101 = arith.divf %1099, %1100 : vector<8x32xf32>
    %1102 = arith.mulf %1093, %1027 : vector<8x32xf32>
    %1103 = arith.mulf %1087, %1095 : vector<8x32xf32>
    %1104 = arith.addf %1102, %1103 : vector<8x32xf32>
    %1105 = math.tanh %1104 : vector<8x32xf32>
    %1106 = arith.mulf %1101, %1105 : vector<8x32xf32>
    %1107 = vector.shape_cast %1050 : vector<8x1xi1> to vector<8x1xi1>
    %1108 = vector.broadcast %1107 : vector<8x1xi1> to vector<8x32xi1>
    %1109 = arith.select %1108, %1106, %1024 : vector<8x32xi1>, vector<8x32xf32>
    %1110 = vector.shape_cast %1050 : vector<8x1xi1> to vector<8x1xi1>
    %1111 = vector.broadcast %1110 : vector<8x1xi1> to vector<8x32xi1>
    %1112 = arith.select %1111, %1104, %1027 : vector<8x32xi1>, vector<8x32xf32>
    %c4_i32_300 = arith.constant 4 : i32
    %c7_i32_301 = arith.constant 7 : i32
    %1113 = arith.subi %c7_i32_301, %c4_i32_300 : i32
    %1114 = arith.index_cast %c4_i32_300 : i32 to index
    %c0_302 = arith.constant 0 : index
    %c0_303 = arith.constant 0 : index
    %1115 = vector.load %arg15[%1114, %c0_302, %c0_303] : memref<8x8x256xf32, #tpu.memory_space<vmem>>, vector<1x8x256xf32>
    %1116 = vector.shape_cast %1115 : vector<1x8x256xf32> to vector<8x256xf32>
    %1117 = vector.extract_strided_slice %1116 {offsets = [0, 0], sizes = [8, 128], strides = [1, 1]} : vector<8x256xf32> to vector<8x128xf32>
    %cst_304 = arith.constant dense<0.000000e+00> : vector<8x128xf32>
    %1118 = tpu.matmul %1078, %770, %cst_304 {dimension_numbers = #tpu.dot_dimension_numbers<[1], [0], [0], [1], [0, 0, 1, 1], [], []>} : vector<8x32xf32>, vector<32x128xf32>, vector<8x128xf32> -> vector<8x128xf32>
    %1119 = arith.addf %1117, %1118 : vector<8x128xf32>
    %1120 = arith.index_cast %1113 : i32 to index
    %c0_305 = arith.constant 0 : index
    %c0_306 = arith.constant 0 : index
    %1121 = vector.load %arg15[%1120, %c0_305, %c0_306] : memref<8x8x256xf32, #tpu.memory_space<vmem>>, vector<1x8x256xf32>
    %1122 = vector.shape_cast %1121 : vector<1x8x256xf32> to vector<8x256xf32>
    %1123 = vector.extract_strided_slice %1122 {offsets = [0, 128], sizes = [8, 128], strides = [1, 1]} : vector<8x256xf32> to vector<8x128xf32>
    %cst_307 = arith.constant dense<0.000000e+00> : vector<8x128xf32>
    %1124 = tpu.matmul %1109, %771, %cst_307 {dimension_numbers = #tpu.dot_dimension_numbers<[1], [0], [0], [1], [0, 0, 1, 1], [], []>} : vector<8x32xf32>, vector<32x128xf32>, vector<8x128xf32> -> vector<8x128xf32>
    %1125 = arith.addf %1123, %1124 : vector<8x128xf32>
    %1126 = arith.index_cast %c4_i32_300 : i32 to index
    %c0_308 = arith.constant 0 : index
    %c0_309 = arith.constant 0 : index
    %1127 = vector.load %arg2[%1126, %c0_308, %c0_309] : memref<8x8x1xf32, #tpu.memory_space<vmem>>, vector<1x8x1xf32>
    %1128 = vector.shape_cast %1127 : vector<1x8x1xf32> to vector<8x1xf32>
    %cst_310 = arith.constant 0.000000e+00 : f32
    %1129 = vector.broadcast %cst_310 : f32 to vector<8x1xf32>
    %1130 = arith.cmpf ogt, %1128, %1129 : vector<8x1xf32>
    %1131 = arith.index_cast %1113 : i32 to index
    %c0_311 = arith.constant 0 : index
    %c0_312 = arith.constant 0 : index
    %1132 = vector.load %arg2[%1131, %c0_311, %c0_312] : memref<8x8x1xf32, #tpu.memory_space<vmem>>, vector<1x8x1xf32>
    %1133 = vector.shape_cast %1132 : vector<1x8x1xf32> to vector<8x1xf32>
    %cst_313 = arith.constant 0.000000e+00 : f32
    %1134 = vector.broadcast %cst_313 : f32 to vector<8x1xf32>
    %1135 = arith.cmpf ogt, %1133, %1134 : vector<8x1xf32>
    %1136 = vector.extract_strided_slice %1119 {offsets = [0, 0], sizes = [8, 32], strides = [1, 1]} : vector<8x128xf32> to vector<8x32xf32>
    %1137 = arith.negf %1136 : vector<8x32xf32>
    %1138 = math.exp %1137 : vector<8x32xf32>
    %cst_314 = arith.constant 1.000000e+00 : f32
    %1139 = vector.broadcast %cst_314 : f32 to vector<8x32xf32>
    %1140 = arith.addf %1139, %1138 : vector<8x32xf32>
    %1141 = arith.divf %1139, %1140 : vector<8x32xf32>
    %1142 = vector.extract_strided_slice %1119 {offsets = [0, 32], sizes = [8, 32], strides = [1, 1]} : vector<8x128xf32> to vector<8x32xf32>
    %1143 = arith.negf %1142 : vector<8x32xf32>
    %1144 = math.exp %1143 : vector<8x32xf32>
    %cst_315 = arith.constant 1.000000e+00 : f32
    %1145 = vector.broadcast %cst_315 : f32 to vector<8x32xf32>
    %1146 = arith.addf %1145, %1144 : vector<8x32xf32>
    %1147 = arith.divf %1145, %1146 : vector<8x32xf32>
    %1148 = vector.extract_strided_slice %1119 {offsets = [0, 64], sizes = [8, 32], strides = [1, 1]} : vector<8x128xf32> to vector<8x32xf32>
    %1149 = math.tanh %1148 : vector<8x32xf32>
    %1150 = vector.extract_strided_slice %1119 {offsets = [0, 96], sizes = [8, 32], strides = [1, 1]} : vector<8x128xf32> to vector<8x32xf32>
    %1151 = arith.negf %1150 : vector<8x32xf32>
    %1152 = math.exp %1151 : vector<8x32xf32>
    %cst_316 = arith.constant 1.000000e+00 : f32
    %1153 = vector.broadcast %cst_316 : f32 to vector<8x32xf32>
    %1154 = arith.addf %1153, %1152 : vector<8x32xf32>
    %1155 = arith.divf %1153, %1154 : vector<8x32xf32>
    %1156 = arith.mulf %1147, %1081 : vector<8x32xf32>
    %1157 = arith.mulf %1141, %1149 : vector<8x32xf32>
    %1158 = arith.addf %1156, %1157 : vector<8x32xf32>
    %1159 = math.tanh %1158 : vector<8x32xf32>
    %1160 = arith.mulf %1155, %1159 : vector<8x32xf32>
    %1161 = vector.shape_cast %1130 : vector<8x1xi1> to vector<8x1xi1>
    %1162 = vector.broadcast %1161 : vector<8x1xi1> to vector<8x32xi1>
    %1163 = arith.select %1162, %1160, %1078 : vector<8x32xi1>, vector<8x32xf32>
    %1164 = vector.shape_cast %1130 : vector<8x1xi1> to vector<8x1xi1>
    %1165 = vector.broadcast %1164 : vector<8x1xi1> to vector<8x32xi1>
    %1166 = arith.select %1165, %1158, %1081 : vector<8x32xi1>, vector<8x32xf32>
    %1167 = vector.extract_strided_slice %1125 {offsets = [0, 0], sizes = [8, 32], strides = [1, 1]} : vector<8x128xf32> to vector<8x32xf32>
    %1168 = arith.negf %1167 : vector<8x32xf32>
    %1169 = math.exp %1168 : vector<8x32xf32>
    %cst_317 = arith.constant 1.000000e+00 : f32
    %1170 = vector.broadcast %cst_317 : f32 to vector<8x32xf32>
    %1171 = arith.addf %1170, %1169 : vector<8x32xf32>
    %1172 = arith.divf %1170, %1171 : vector<8x32xf32>
    %1173 = vector.extract_strided_slice %1125 {offsets = [0, 32], sizes = [8, 32], strides = [1, 1]} : vector<8x128xf32> to vector<8x32xf32>
    %1174 = arith.negf %1173 : vector<8x32xf32>
    %1175 = math.exp %1174 : vector<8x32xf32>
    %cst_318 = arith.constant 1.000000e+00 : f32
    %1176 = vector.broadcast %cst_318 : f32 to vector<8x32xf32>
    %1177 = arith.addf %1176, %1175 : vector<8x32xf32>
    %1178 = arith.divf %1176, %1177 : vector<8x32xf32>
    %1179 = vector.extract_strided_slice %1125 {offsets = [0, 64], sizes = [8, 32], strides = [1, 1]} : vector<8x128xf32> to vector<8x32xf32>
    %1180 = math.tanh %1179 : vector<8x32xf32>
    %1181 = vector.extract_strided_slice %1125 {offsets = [0, 96], sizes = [8, 32], strides = [1, 1]} : vector<8x128xf32> to vector<8x32xf32>
    %1182 = arith.negf %1181 : vector<8x32xf32>
    %1183 = math.exp %1182 : vector<8x32xf32>
    %cst_319 = arith.constant 1.000000e+00 : f32
    %1184 = vector.broadcast %cst_319 : f32 to vector<8x32xf32>
    %1185 = arith.addf %1184, %1183 : vector<8x32xf32>
    %1186 = arith.divf %1184, %1185 : vector<8x32xf32>
    %1187 = arith.mulf %1178, %1112 : vector<8x32xf32>
    %1188 = arith.mulf %1172, %1180 : vector<8x32xf32>
    %1189 = arith.addf %1187, %1188 : vector<8x32xf32>
    %1190 = math.tanh %1189 : vector<8x32xf32>
    %1191 = arith.mulf %1186, %1190 : vector<8x32xf32>
    %1192 = vector.shape_cast %1135 : vector<8x1xi1> to vector<8x1xi1>
    %1193 = vector.broadcast %1192 : vector<8x1xi1> to vector<8x32xi1>
    %1194 = arith.select %1193, %1191, %1109 : vector<8x32xi1>, vector<8x32xf32>
    %1195 = vector.shape_cast %1135 : vector<8x1xi1> to vector<8x1xi1>
    %1196 = vector.broadcast %1195 : vector<8x1xi1> to vector<8x32xi1>
    %1197 = arith.select %1196, %1189, %1112 : vector<8x32xi1>, vector<8x32xf32>
    %c5_i32_320 = arith.constant 5 : i32
    %c7_i32_321 = arith.constant 7 : i32
    %1198 = arith.subi %c7_i32_321, %c5_i32_320 : i32
    %1199 = arith.index_cast %c5_i32_320 : i32 to index
    %c0_322 = arith.constant 0 : index
    %c0_323 = arith.constant 0 : index
    %1200 = vector.load %arg15[%1199, %c0_322, %c0_323] : memref<8x8x256xf32, #tpu.memory_space<vmem>>, vector<1x8x256xf32>
    %1201 = vector.shape_cast %1200 : vector<1x8x256xf32> to vector<8x256xf32>
    %1202 = vector.extract_strided_slice %1201 {offsets = [0, 0], sizes = [8, 128], strides = [1, 1]} : vector<8x256xf32> to vector<8x128xf32>
    %cst_324 = arith.constant dense<0.000000e+00> : vector<8x128xf32>
    %1203 = tpu.matmul %1163, %770, %cst_324 {dimension_numbers = #tpu.dot_dimension_numbers<[1], [0], [0], [1], [0, 0, 1, 1], [], []>} : vector<8x32xf32>, vector<32x128xf32>, vector<8x128xf32> -> vector<8x128xf32>
    %1204 = arith.addf %1202, %1203 : vector<8x128xf32>
    %1205 = arith.index_cast %1198 : i32 to index
    %c0_325 = arith.constant 0 : index
    %c0_326 = arith.constant 0 : index
    %1206 = vector.load %arg15[%1205, %c0_325, %c0_326] : memref<8x8x256xf32, #tpu.memory_space<vmem>>, vector<1x8x256xf32>
    %1207 = vector.shape_cast %1206 : vector<1x8x256xf32> to vector<8x256xf32>
    %1208 = vector.extract_strided_slice %1207 {offsets = [0, 128], sizes = [8, 128], strides = [1, 1]} : vector<8x256xf32> to vector<8x128xf32>
    %cst_327 = arith.constant dense<0.000000e+00> : vector<8x128xf32>
    %1209 = tpu.matmul %1194, %771, %cst_327 {dimension_numbers = #tpu.dot_dimension_numbers<[1], [0], [0], [1], [0, 0, 1, 1], [], []>} : vector<8x32xf32>, vector<32x128xf32>, vector<8x128xf32> -> vector<8x128xf32>
    %1210 = arith.addf %1208, %1209 : vector<8x128xf32>
    %1211 = arith.index_cast %c5_i32_320 : i32 to index
    %c0_328 = arith.constant 0 : index
    %c0_329 = arith.constant 0 : index
    %1212 = vector.load %arg2[%1211, %c0_328, %c0_329] : memref<8x8x1xf32, #tpu.memory_space<vmem>>, vector<1x8x1xf32>
    %1213 = vector.shape_cast %1212 : vector<1x8x1xf32> to vector<8x1xf32>
    %cst_330 = arith.constant 0.000000e+00 : f32
    %1214 = vector.broadcast %cst_330 : f32 to vector<8x1xf32>
    %1215 = arith.cmpf ogt, %1213, %1214 : vector<8x1xf32>
    %1216 = arith.index_cast %1198 : i32 to index
    %c0_331 = arith.constant 0 : index
    %c0_332 = arith.constant 0 : index
    %1217 = vector.load %arg2[%1216, %c0_331, %c0_332] : memref<8x8x1xf32, #tpu.memory_space<vmem>>, vector<1x8x1xf32>
    %1218 = vector.shape_cast %1217 : vector<1x8x1xf32> to vector<8x1xf32>
    %cst_333 = arith.constant 0.000000e+00 : f32
    %1219 = vector.broadcast %cst_333 : f32 to vector<8x1xf32>
    %1220 = arith.cmpf ogt, %1218, %1219 : vector<8x1xf32>
    %1221 = vector.extract_strided_slice %1204 {offsets = [0, 0], sizes = [8, 32], strides = [1, 1]} : vector<8x128xf32> to vector<8x32xf32>
    %1222 = arith.negf %1221 : vector<8x32xf32>
    %1223 = math.exp %1222 : vector<8x32xf32>
    %cst_334 = arith.constant 1.000000e+00 : f32
    %1224 = vector.broadcast %cst_334 : f32 to vector<8x32xf32>
    %1225 = arith.addf %1224, %1223 : vector<8x32xf32>
    %1226 = arith.divf %1224, %1225 : vector<8x32xf32>
    %1227 = vector.extract_strided_slice %1204 {offsets = [0, 32], sizes = [8, 32], strides = [1, 1]} : vector<8x128xf32> to vector<8x32xf32>
    %1228 = arith.negf %1227 : vector<8x32xf32>
    %1229 = math.exp %1228 : vector<8x32xf32>
    %cst_335 = arith.constant 1.000000e+00 : f32
    %1230 = vector.broadcast %cst_335 : f32 to vector<8x32xf32>
    %1231 = arith.addf %1230, %1229 : vector<8x32xf32>
    %1232 = arith.divf %1230, %1231 : vector<8x32xf32>
    %1233 = vector.extract_strided_slice %1204 {offsets = [0, 64], sizes = [8, 32], strides = [1, 1]} : vector<8x128xf32> to vector<8x32xf32>
    %1234 = math.tanh %1233 : vector<8x32xf32>
    %1235 = vector.extract_strided_slice %1204 {offsets = [0, 96], sizes = [8, 32], strides = [1, 1]} : vector<8x128xf32> to vector<8x32xf32>
    %1236 = arith.negf %1235 : vector<8x32xf32>
    %1237 = math.exp %1236 : vector<8x32xf32>
    %cst_336 = arith.constant 1.000000e+00 : f32
    %1238 = vector.broadcast %cst_336 : f32 to vector<8x32xf32>
    %1239 = arith.addf %1238, %1237 : vector<8x32xf32>
    %1240 = arith.divf %1238, %1239 : vector<8x32xf32>
    %1241 = arith.mulf %1232, %1166 : vector<8x32xf32>
    %1242 = arith.mulf %1226, %1234 : vector<8x32xf32>
    %1243 = arith.addf %1241, %1242 : vector<8x32xf32>
    %1244 = math.tanh %1243 : vector<8x32xf32>
    %1245 = arith.mulf %1240, %1244 : vector<8x32xf32>
    %1246 = vector.shape_cast %1215 : vector<8x1xi1> to vector<8x1xi1>
    %1247 = vector.broadcast %1246 : vector<8x1xi1> to vector<8x32xi1>
    %1248 = arith.select %1247, %1245, %1163 : vector<8x32xi1>, vector<8x32xf32>
    %1249 = vector.shape_cast %1215 : vector<8x1xi1> to vector<8x1xi1>
    %1250 = vector.broadcast %1249 : vector<8x1xi1> to vector<8x32xi1>
    %1251 = arith.select %1250, %1243, %1166 : vector<8x32xi1>, vector<8x32xf32>
    %1252 = vector.extract_strided_slice %1210 {offsets = [0, 0], sizes = [8, 32], strides = [1, 1]} : vector<8x128xf32> to vector<8x32xf32>
    %1253 = arith.negf %1252 : vector<8x32xf32>
    %1254 = math.exp %1253 : vector<8x32xf32>
    %cst_337 = arith.constant 1.000000e+00 : f32
    %1255 = vector.broadcast %cst_337 : f32 to vector<8x32xf32>
    %1256 = arith.addf %1255, %1254 : vector<8x32xf32>
    %1257 = arith.divf %1255, %1256 : vector<8x32xf32>
    %1258 = vector.extract_strided_slice %1210 {offsets = [0, 32], sizes = [8, 32], strides = [1, 1]} : vector<8x128xf32> to vector<8x32xf32>
    %1259 = arith.negf %1258 : vector<8x32xf32>
    %1260 = math.exp %1259 : vector<8x32xf32>
    %cst_338 = arith.constant 1.000000e+00 : f32
    %1261 = vector.broadcast %cst_338 : f32 to vector<8x32xf32>
    %1262 = arith.addf %1261, %1260 : vector<8x32xf32>
    %1263 = arith.divf %1261, %1262 : vector<8x32xf32>
    %1264 = vector.extract_strided_slice %1210 {offsets = [0, 64], sizes = [8, 32], strides = [1, 1]} : vector<8x128xf32> to vector<8x32xf32>
    %1265 = math.tanh %1264 : vector<8x32xf32>
    %1266 = vector.extract_strided_slice %1210 {offsets = [0, 96], sizes = [8, 32], strides = [1, 1]} : vector<8x128xf32> to vector<8x32xf32>
    %1267 = arith.negf %1266 : vector<8x32xf32>
    %1268 = math.exp %1267 : vector<8x32xf32>
    %cst_339 = arith.constant 1.000000e+00 : f32
    %1269 = vector.broadcast %cst_339 : f32 to vector<8x32xf32>
    %1270 = arith.addf %1269, %1268 : vector<8x32xf32>
    %1271 = arith.divf %1269, %1270 : vector<8x32xf32>
    %1272 = arith.mulf %1263, %1197 : vector<8x32xf32>
    %1273 = arith.mulf %1257, %1265 : vector<8x32xf32>
    %1274 = arith.addf %1272, %1273 : vector<8x32xf32>
    %1275 = math.tanh %1274 : vector<8x32xf32>
    %1276 = arith.mulf %1271, %1275 : vector<8x32xf32>
    %1277 = vector.shape_cast %1220 : vector<8x1xi1> to vector<8x1xi1>
    %1278 = vector.broadcast %1277 : vector<8x1xi1> to vector<8x32xi1>
    %1279 = arith.select %1278, %1276, %1194 : vector<8x32xi1>, vector<8x32xf32>
    %1280 = vector.shape_cast %1220 : vector<8x1xi1> to vector<8x1xi1>
    %1281 = vector.broadcast %1280 : vector<8x1xi1> to vector<8x32xi1>
    %1282 = arith.select %1281, %1274, %1197 : vector<8x32xi1>, vector<8x32xf32>
    %c6_i32_340 = arith.constant 6 : i32
    %c7_i32_341 = arith.constant 7 : i32
    %1283 = arith.subi %c7_i32_341, %c6_i32_340 : i32
    %1284 = arith.index_cast %c6_i32_340 : i32 to index
    %c0_342 = arith.constant 0 : index
    %c0_343 = arith.constant 0 : index
    %1285 = vector.load %arg15[%1284, %c0_342, %c0_343] : memref<8x8x256xf32, #tpu.memory_space<vmem>>, vector<1x8x256xf32>
    %1286 = vector.shape_cast %1285 : vector<1x8x256xf32> to vector<8x256xf32>
    %1287 = vector.extract_strided_slice %1286 {offsets = [0, 0], sizes = [8, 128], strides = [1, 1]} : vector<8x256xf32> to vector<8x128xf32>
    %cst_344 = arith.constant dense<0.000000e+00> : vector<8x128xf32>
    %1288 = tpu.matmul %1248, %770, %cst_344 {dimension_numbers = #tpu.dot_dimension_numbers<[1], [0], [0], [1], [0, 0, 1, 1], [], []>} : vector<8x32xf32>, vector<32x128xf32>, vector<8x128xf32> -> vector<8x128xf32>
    %1289 = arith.addf %1287, %1288 : vector<8x128xf32>
    %1290 = arith.index_cast %1283 : i32 to index
    %c0_345 = arith.constant 0 : index
    %c0_346 = arith.constant 0 : index
    %1291 = vector.load %arg15[%1290, %c0_345, %c0_346] : memref<8x8x256xf32, #tpu.memory_space<vmem>>, vector<1x8x256xf32>
    %1292 = vector.shape_cast %1291 : vector<1x8x256xf32> to vector<8x256xf32>
    %1293 = vector.extract_strided_slice %1292 {offsets = [0, 128], sizes = [8, 128], strides = [1, 1]} : vector<8x256xf32> to vector<8x128xf32>
    %cst_347 = arith.constant dense<0.000000e+00> : vector<8x128xf32>
    %1294 = tpu.matmul %1279, %771, %cst_347 {dimension_numbers = #tpu.dot_dimension_numbers<[1], [0], [0], [1], [0, 0, 1, 1], [], []>} : vector<8x32xf32>, vector<32x128xf32>, vector<8x128xf32> -> vector<8x128xf32>
    %1295 = arith.addf %1293, %1294 : vector<8x128xf32>
    %1296 = arith.index_cast %c6_i32_340 : i32 to index
    %c0_348 = arith.constant 0 : index
    %c0_349 = arith.constant 0 : index
    %1297 = vector.load %arg2[%1296, %c0_348, %c0_349] : memref<8x8x1xf32, #tpu.memory_space<vmem>>, vector<1x8x1xf32>
    %1298 = vector.shape_cast %1297 : vector<1x8x1xf32> to vector<8x1xf32>
    %cst_350 = arith.constant 0.000000e+00 : f32
    %1299 = vector.broadcast %cst_350 : f32 to vector<8x1xf32>
    %1300 = arith.cmpf ogt, %1298, %1299 : vector<8x1xf32>
    %1301 = arith.index_cast %1283 : i32 to index
    %c0_351 = arith.constant 0 : index
    %c0_352 = arith.constant 0 : index
    %1302 = vector.load %arg2[%1301, %c0_351, %c0_352] : memref<8x8x1xf32, #tpu.memory_space<vmem>>, vector<1x8x1xf32>
    %1303 = vector.shape_cast %1302 : vector<1x8x1xf32> to vector<8x1xf32>
    %cst_353 = arith.constant 0.000000e+00 : f32
    %1304 = vector.broadcast %cst_353 : f32 to vector<8x1xf32>
    %1305 = arith.cmpf ogt, %1303, %1304 : vector<8x1xf32>
    %1306 = vector.extract_strided_slice %1289 {offsets = [0, 0], sizes = [8, 32], strides = [1, 1]} : vector<8x128xf32> to vector<8x32xf32>
    %1307 = arith.negf %1306 : vector<8x32xf32>
    %1308 = math.exp %1307 : vector<8x32xf32>
    %cst_354 = arith.constant 1.000000e+00 : f32
    %1309 = vector.broadcast %cst_354 : f32 to vector<8x32xf32>
    %1310 = arith.addf %1309, %1308 : vector<8x32xf32>
    %1311 = arith.divf %1309, %1310 : vector<8x32xf32>
    %1312 = vector.extract_strided_slice %1289 {offsets = [0, 32], sizes = [8, 32], strides = [1, 1]} : vector<8x128xf32> to vector<8x32xf32>
    %1313 = arith.negf %1312 : vector<8x32xf32>
    %1314 = math.exp %1313 : vector<8x32xf32>
    %cst_355 = arith.constant 1.000000e+00 : f32
    %1315 = vector.broadcast %cst_355 : f32 to vector<8x32xf32>
    %1316 = arith.addf %1315, %1314 : vector<8x32xf32>
    %1317 = arith.divf %1315, %1316 : vector<8x32xf32>
    %1318 = vector.extract_strided_slice %1289 {offsets = [0, 64], sizes = [8, 32], strides = [1, 1]} : vector<8x128xf32> to vector<8x32xf32>
    %1319 = math.tanh %1318 : vector<8x32xf32>
    %1320 = vector.extract_strided_slice %1289 {offsets = [0, 96], sizes = [8, 32], strides = [1, 1]} : vector<8x128xf32> to vector<8x32xf32>
    %1321 = arith.negf %1320 : vector<8x32xf32>
    %1322 = math.exp %1321 : vector<8x32xf32>
    %cst_356 = arith.constant 1.000000e+00 : f32
    %1323 = vector.broadcast %cst_356 : f32 to vector<8x32xf32>
    %1324 = arith.addf %1323, %1322 : vector<8x32xf32>
    %1325 = arith.divf %1323, %1324 : vector<8x32xf32>
    %1326 = arith.mulf %1317, %1251 : vector<8x32xf32>
    %1327 = arith.mulf %1311, %1319 : vector<8x32xf32>
    %1328 = arith.addf %1326, %1327 : vector<8x32xf32>
    %1329 = math.tanh %1328 : vector<8x32xf32>
    %1330 = arith.mulf %1325, %1329 : vector<8x32xf32>
    %1331 = vector.shape_cast %1300 : vector<8x1xi1> to vector<8x1xi1>
    %1332 = vector.broadcast %1331 : vector<8x1xi1> to vector<8x32xi1>
    %1333 = arith.select %1332, %1330, %1248 : vector<8x32xi1>, vector<8x32xf32>
    %1334 = vector.shape_cast %1300 : vector<8x1xi1> to vector<8x1xi1>
    %1335 = vector.broadcast %1334 : vector<8x1xi1> to vector<8x32xi1>
    %1336 = arith.select %1335, %1328, %1251 : vector<8x32xi1>, vector<8x32xf32>
    %1337 = vector.extract_strided_slice %1295 {offsets = [0, 0], sizes = [8, 32], strides = [1, 1]} : vector<8x128xf32> to vector<8x32xf32>
    %1338 = arith.negf %1337 : vector<8x32xf32>
    %1339 = math.exp %1338 : vector<8x32xf32>
    %cst_357 = arith.constant 1.000000e+00 : f32
    %1340 = vector.broadcast %cst_357 : f32 to vector<8x32xf32>
    %1341 = arith.addf %1340, %1339 : vector<8x32xf32>
    %1342 = arith.divf %1340, %1341 : vector<8x32xf32>
    %1343 = vector.extract_strided_slice %1295 {offsets = [0, 32], sizes = [8, 32], strides = [1, 1]} : vector<8x128xf32> to vector<8x32xf32>
    %1344 = arith.negf %1343 : vector<8x32xf32>
    %1345 = math.exp %1344 : vector<8x32xf32>
    %cst_358 = arith.constant 1.000000e+00 : f32
    %1346 = vector.broadcast %cst_358 : f32 to vector<8x32xf32>
    %1347 = arith.addf %1346, %1345 : vector<8x32xf32>
    %1348 = arith.divf %1346, %1347 : vector<8x32xf32>
    %1349 = vector.extract_strided_slice %1295 {offsets = [0, 64], sizes = [8, 32], strides = [1, 1]} : vector<8x128xf32> to vector<8x32xf32>
    %1350 = math.tanh %1349 : vector<8x32xf32>
    %1351 = vector.extract_strided_slice %1295 {offsets = [0, 96], sizes = [8, 32], strides = [1, 1]} : vector<8x128xf32> to vector<8x32xf32>
    %1352 = arith.negf %1351 : vector<8x32xf32>
    %1353 = math.exp %1352 : vector<8x32xf32>
    %cst_359 = arith.constant 1.000000e+00 : f32
    %1354 = vector.broadcast %cst_359 : f32 to vector<8x32xf32>
    %1355 = arith.addf %1354, %1353 : vector<8x32xf32>
    %1356 = arith.divf %1354, %1355 : vector<8x32xf32>
    %1357 = arith.mulf %1348, %1282 : vector<8x32xf32>
    %1358 = arith.mulf %1342, %1350 : vector<8x32xf32>
    %1359 = arith.addf %1357, %1358 : vector<8x32xf32>
    %1360 = math.tanh %1359 : vector<8x32xf32>
    %1361 = arith.mulf %1356, %1360 : vector<8x32xf32>
    %1362 = vector.shape_cast %1305 : vector<8x1xi1> to vector<8x1xi1>
    %1363 = vector.broadcast %1362 : vector<8x1xi1> to vector<8x32xi1>
    %1364 = arith.select %1363, %1361, %1279 : vector<8x32xi1>, vector<8x32xf32>
    %1365 = vector.shape_cast %1305 : vector<8x1xi1> to vector<8x1xi1>
    %1366 = vector.broadcast %1365 : vector<8x1xi1> to vector<8x32xi1>
    %1367 = arith.select %1366, %1359, %1282 : vector<8x32xi1>, vector<8x32xf32>
    %c7_i32_360 = arith.constant 7 : i32
    %c7_i32_361 = arith.constant 7 : i32
    %1368 = arith.subi %c7_i32_361, %c7_i32_360 : i32
    %1369 = arith.index_cast %c7_i32_360 : i32 to index
    %c0_362 = arith.constant 0 : index
    %c0_363 = arith.constant 0 : index
    %1370 = vector.load %arg15[%1369, %c0_362, %c0_363] : memref<8x8x256xf32, #tpu.memory_space<vmem>>, vector<1x8x256xf32>
    %1371 = vector.shape_cast %1370 : vector<1x8x256xf32> to vector<8x256xf32>
    %1372 = vector.extract_strided_slice %1371 {offsets = [0, 0], sizes = [8, 128], strides = [1, 1]} : vector<8x256xf32> to vector<8x128xf32>
    %cst_364 = arith.constant dense<0.000000e+00> : vector<8x128xf32>
    %1373 = tpu.matmul %1333, %770, %cst_364 {dimension_numbers = #tpu.dot_dimension_numbers<[1], [0], [0], [1], [0, 0, 1, 1], [], []>} : vector<8x32xf32>, vector<32x128xf32>, vector<8x128xf32> -> vector<8x128xf32>
    %1374 = arith.addf %1372, %1373 : vector<8x128xf32>
    %1375 = arith.index_cast %1368 : i32 to index
    %c0_365 = arith.constant 0 : index
    %c0_366 = arith.constant 0 : index
    %1376 = vector.load %arg15[%1375, %c0_365, %c0_366] : memref<8x8x256xf32, #tpu.memory_space<vmem>>, vector<1x8x256xf32>
    %1377 = vector.shape_cast %1376 : vector<1x8x256xf32> to vector<8x256xf32>
    %1378 = vector.extract_strided_slice %1377 {offsets = [0, 128], sizes = [8, 128], strides = [1, 1]} : vector<8x256xf32> to vector<8x128xf32>
    %cst_367 = arith.constant dense<0.000000e+00> : vector<8x128xf32>
    %1379 = tpu.matmul %1364, %771, %cst_367 {dimension_numbers = #tpu.dot_dimension_numbers<[1], [0], [0], [1], [0, 0, 1, 1], [], []>} : vector<8x32xf32>, vector<32x128xf32>, vector<8x128xf32> -> vector<8x128xf32>
    %1380 = arith.addf %1378, %1379 : vector<8x128xf32>
    %1381 = arith.index_cast %c7_i32_360 : i32 to index
    %c0_368 = arith.constant 0 : index
    %c0_369 = arith.constant 0 : index
    %1382 = vector.load %arg2[%1381, %c0_368, %c0_369] : memref<8x8x1xf32, #tpu.memory_space<vmem>>, vector<1x8x1xf32>
    %1383 = vector.shape_cast %1382 : vector<1x8x1xf32> to vector<8x1xf32>
    %cst_370 = arith.constant 0.000000e+00 : f32
    %1384 = vector.broadcast %cst_370 : f32 to vector<8x1xf32>
    %1385 = arith.cmpf ogt, %1383, %1384 : vector<8x1xf32>
    %1386 = arith.index_cast %1368 : i32 to index
    %c0_371 = arith.constant 0 : index
    %c0_372 = arith.constant 0 : index
    %1387 = vector.load %arg2[%1386, %c0_371, %c0_372] : memref<8x8x1xf32, #tpu.memory_space<vmem>>, vector<1x8x1xf32>
    %1388 = vector.shape_cast %1387 : vector<1x8x1xf32> to vector<8x1xf32>
    %cst_373 = arith.constant 0.000000e+00 : f32
    %1389 = vector.broadcast %cst_373 : f32 to vector<8x1xf32>
    %1390 = arith.cmpf ogt, %1388, %1389 : vector<8x1xf32>
    %1391 = vector.extract_strided_slice %1374 {offsets = [0, 0], sizes = [8, 32], strides = [1, 1]} : vector<8x128xf32> to vector<8x32xf32>
    %1392 = arith.negf %1391 : vector<8x32xf32>
    %1393 = math.exp %1392 : vector<8x32xf32>
    %cst_374 = arith.constant 1.000000e+00 : f32
    %1394 = vector.broadcast %cst_374 : f32 to vector<8x32xf32>
    %1395 = arith.addf %1394, %1393 : vector<8x32xf32>
    %1396 = arith.divf %1394, %1395 : vector<8x32xf32>
    %1397 = vector.extract_strided_slice %1374 {offsets = [0, 32], sizes = [8, 32], strides = [1, 1]} : vector<8x128xf32> to vector<8x32xf32>
    %1398 = arith.negf %1397 : vector<8x32xf32>
    %1399 = math.exp %1398 : vector<8x32xf32>
    %cst_375 = arith.constant 1.000000e+00 : f32
    %1400 = vector.broadcast %cst_375 : f32 to vector<8x32xf32>
    %1401 = arith.addf %1400, %1399 : vector<8x32xf32>
    %1402 = arith.divf %1400, %1401 : vector<8x32xf32>
    %1403 = vector.extract_strided_slice %1374 {offsets = [0, 64], sizes = [8, 32], strides = [1, 1]} : vector<8x128xf32> to vector<8x32xf32>
    %1404 = math.tanh %1403 : vector<8x32xf32>
    %1405 = vector.extract_strided_slice %1374 {offsets = [0, 96], sizes = [8, 32], strides = [1, 1]} : vector<8x128xf32> to vector<8x32xf32>
    %1406 = arith.negf %1405 : vector<8x32xf32>
    %1407 = math.exp %1406 : vector<8x32xf32>
    %cst_376 = arith.constant 1.000000e+00 : f32
    %1408 = vector.broadcast %cst_376 : f32 to vector<8x32xf32>
    %1409 = arith.addf %1408, %1407 : vector<8x32xf32>
    %1410 = arith.divf %1408, %1409 : vector<8x32xf32>
    %1411 = arith.mulf %1402, %1336 : vector<8x32xf32>
    %1412 = arith.mulf %1396, %1404 : vector<8x32xf32>
    %1413 = arith.addf %1411, %1412 : vector<8x32xf32>
    %1414 = math.tanh %1413 : vector<8x32xf32>
    %1415 = arith.mulf %1410, %1414 : vector<8x32xf32>
    %1416 = vector.shape_cast %1385 : vector<8x1xi1> to vector<8x1xi1>
    %1417 = vector.broadcast %1416 : vector<8x1xi1> to vector<8x32xi1>
    %1418 = arith.select %1417, %1415, %1333 : vector<8x32xi1>, vector<8x32xf32>
    %1419 = vector.shape_cast %1385 : vector<8x1xi1> to vector<8x1xi1>
    %1420 = vector.broadcast %1419 : vector<8x1xi1> to vector<8x32xi1>
    %1421 = arith.select %1420, %1413, %1336 : vector<8x32xi1>, vector<8x32xf32>
    %1422 = vector.extract_strided_slice %1380 {offsets = [0, 0], sizes = [8, 32], strides = [1, 1]} : vector<8x128xf32> to vector<8x32xf32>
    %1423 = arith.negf %1422 : vector<8x32xf32>
    %1424 = math.exp %1423 : vector<8x32xf32>
    %cst_377 = arith.constant 1.000000e+00 : f32
    %1425 = vector.broadcast %cst_377 : f32 to vector<8x32xf32>
    %1426 = arith.addf %1425, %1424 : vector<8x32xf32>
    %1427 = arith.divf %1425, %1426 : vector<8x32xf32>
    %1428 = vector.extract_strided_slice %1380 {offsets = [0, 32], sizes = [8, 32], strides = [1, 1]} : vector<8x128xf32> to vector<8x32xf32>
    %1429 = arith.negf %1428 : vector<8x32xf32>
    %1430 = math.exp %1429 : vector<8x32xf32>
    %cst_378 = arith.constant 1.000000e+00 : f32
    %1431 = vector.broadcast %cst_378 : f32 to vector<8x32xf32>
    %1432 = arith.addf %1431, %1430 : vector<8x32xf32>
    %1433 = arith.divf %1431, %1432 : vector<8x32xf32>
    %1434 = vector.extract_strided_slice %1380 {offsets = [0, 64], sizes = [8, 32], strides = [1, 1]} : vector<8x128xf32> to vector<8x32xf32>
    %1435 = math.tanh %1434 : vector<8x32xf32>
    %1436 = vector.extract_strided_slice %1380 {offsets = [0, 96], sizes = [8, 32], strides = [1, 1]} : vector<8x128xf32> to vector<8x32xf32>
    %1437 = arith.negf %1436 : vector<8x32xf32>
    %1438 = math.exp %1437 : vector<8x32xf32>
    %cst_379 = arith.constant 1.000000e+00 : f32
    %1439 = vector.broadcast %cst_379 : f32 to vector<8x32xf32>
    %1440 = arith.addf %1439, %1438 : vector<8x32xf32>
    %1441 = arith.divf %1439, %1440 : vector<8x32xf32>
    %1442 = arith.mulf %1433, %1367 : vector<8x32xf32>
    %1443 = arith.mulf %1427, %1435 : vector<8x32xf32>
    %1444 = arith.addf %1442, %1443 : vector<8x32xf32>
    %1445 = math.tanh %1444 : vector<8x32xf32>
    %1446 = arith.mulf %1441, %1445 : vector<8x32xf32>
    %1447 = vector.shape_cast %1390 : vector<8x1xi1> to vector<8x1xi1>
    %1448 = vector.broadcast %1447 : vector<8x1xi1> to vector<8x32xi1>
    %1449 = arith.select %1448, %1446, %1364 : vector<8x32xi1>, vector<8x32xf32>
    %1450 = vector.shape_cast %1390 : vector<8x1xi1> to vector<8x1xi1>
    %1451 = vector.broadcast %1450 : vector<8x1xi1> to vector<8x32xi1>
    %1452 = arith.select %1451, %1444, %1367 : vector<8x32xi1>, vector<8x32xf32>
    %c8_i32_380 = arith.constant 8 : i32
    %c0_381 = arith.constant 0 : index
    %c0_382 = arith.constant 0 : index
    %1453 = vector.load %arg12[%c0_381, %c0_382] : memref<64x128xf32, #tpu.memory_space<vmem>>, vector<64x128xf32>
    %1454 = vector.extract_strided_slice %1453 {offsets = [0, 0], sizes = [32, 128], strides = [1, 1]} : vector<64x128xf32> to vector<32x128xf32>
    %cst_383 = arith.constant dense<0.000000e+00> : vector<8x128xf32>
    %1455 = tpu.matmul %1418, %1454, %cst_383 {dimension_numbers = #tpu.dot_dimension_numbers<[1], [0], [0], [1], [0, 0, 1, 1], [], []>} : vector<8x32xf32>, vector<32x128xf32>, vector<8x128xf32> -> vector<8x128xf32>
    %1456 = vector.extract_strided_slice %1453 {offsets = [32, 0], sizes = [32, 128], strides = [1, 1]} : vector<64x128xf32> to vector<32x128xf32>
    %cst_384 = arith.constant dense<0.000000e+00> : vector<8x128xf32>
    %1457 = tpu.matmul %1449, %1456, %cst_384 {dimension_numbers = #tpu.dot_dimension_numbers<[1], [0], [0], [1], [0, 0, 1, 1], [], []>} : vector<8x32xf32>, vector<32x128xf32>, vector<8x128xf32> -> vector<8x128xf32>
    %1458 = arith.addf %1455, %1457 : vector<8x128xf32>
    %c0_385 = arith.constant 0 : index
    %c0_386 = arith.constant 0 : index
    %1459 = vector.load %arg13[%c0_385, %c0_386] : memref<1x128xf32, #tpu.memory_space<vmem>>, vector<1x128xf32>
    %1460 = vector.broadcast %1459 : vector<1x128xf32> to vector<8x128xf32>
    %1461 = arith.addf %1458, %1460 : vector<8x128xf32>
    %c0_387 = arith.constant 0 : index
    %c0_388 = arith.constant 0 : index
    %1462 = vector.load %arg14[%c0_387, %c0_388] : memref<8x128xf32, #tpu.memory_space<vmem>>, vector<8x128xf32>
    tpu.vector_store %arg14[%c0_387, %c0_388], %1461 {strides = array<i32>} : memref<8x128xf32, #tpu.memory_space<vmem>>, vector<8x128xf32>,
    return
  }
  func.func @transform_0(%arg0: i32) -> (i32, i32, i32) {
    %c0_i32 = arith.constant 0 : i32
    %c0_i32_0 = arith.constant 0 : i32
    %c0_i32_1 = arith.constant 0 : i32
    return %c0_i32, %arg0, %c0_i32_0 : i32, i32, i32
  }
  func.func @transform_1(%arg0: i32) -> (i32, i32, i32) {
    %c0_i32 = arith.constant 0 : i32
    %c0_i32_0 = arith.constant 0 : i32
    %c0_i32_1 = arith.constant 0 : i32
    return %c0_i32, %arg0, %c0_i32_0 : i32, i32, i32
  }
  func.func @transform_2(%arg0: i32) -> (i32, i32) {
    %c0_i32 = arith.constant 0 : i32
    %c0_i32_0 = arith.constant 0 : i32
    %c0_i32_1 = arith.constant 0 : i32
    return %c0_i32, %c0_i32_0 : i32, i32
  }
  func.func @transform_3(%arg0: i32) -> (i32, i32) {
    %c0_i32 = arith.constant 0 : i32
    %c0_i32_0 = arith.constant 0 : i32
    %c0_i32_1 = arith.constant 0 : i32
    return %c0_i32, %c0_i32_0 : i32, i32
  }
  func.func @transform_4(%arg0: i32) -> (i32, i32) {
    %c0_i32 = arith.constant 0 : i32
    %c0_i32_0 = arith.constant 0 : i32
    %c0_i32_1 = arith.constant 0 : i32
    return %c0_i32, %c0_i32_0 : i32, i32
  }
  func.func @transform_5(%arg0: i32) -> (i32, i32) {
    %c0_i32 = arith.constant 0 : i32
    %c0_i32_0 = arith.constant 0 : i32
    %c0_i32_1 = arith.constant 0 : i32
    return %c0_i32, %c0_i32_0 : i32, i32
  }
  func.func @transform_6(%arg0: i32) -> (i32, i32) {
    %c0_i32 = arith.constant 0 : i32
    %c0_i32_0 = arith.constant 0 : i32
    %c0_i32_1 = arith.constant 0 : i32
    return %c0_i32, %c0_i32_0 : i32, i32
  }
  func.func @transform_7(%arg0: i32) -> (i32, i32) {
    %c0_i32 = arith.constant 0 : i32
    %c0_i32_0 = arith.constant 0 : i32
    %c0_i32_1 = arith.constant 0 : i32
    return %c0_i32, %c0_i32_0 : i32, i32
  }
  func.func @transform_8(%arg0: i32) -> (i32, i32) {
    %c0_i32 = arith.constant 0 : i32
    %c0_i32_0 = arith.constant 0 : i32
    %c0_i32_1 = arith.constant 0 : i32
    return %c0_i32, %c0_i32_0 : i32, i32
  }
  func.func @transform_9(%arg0: i32) -> (i32, i32) {
    %c0_i32 = arith.constant 0 : i32
    %c0_i32_0 = arith.constant 0 : i32
    %c0_i32_1 = arith.constant 0 : i32
    return %c0_i32, %c0_i32_0 : i32, i32
  }
  func.func @transform_10(%arg0: i32) -> (i32, i32) {
    %c0_i32 = arith.constant 0 : i32
    %c0_i32_0 = arith.constant 0 : i32
    %c0_i32_1 = arith.constant 0 : i32
    return %c0_i32, %c0_i32_0 : i32, i32
  }
  func.func @transform_11(%arg0: i32) -> (i32, i32) {
    %c0_i32 = arith.constant 0 : i32
    %c0_i32_0 = arith.constant 0 : i32
    %c0_i32_1 = arith.constant 0 : i32
    return %c0_i32, %c0_i32_0 : i32, i32
  }
  func.func @transform_12(%arg0: i32) -> (i32, i32) {
    %c0_i32 = arith.constant 0 : i32
    %c0_i32_0 = arith.constant 0 : i32
    %c0_i32_1 = arith.constant 0 : i32
    return %c0_i32, %c0_i32_0 : i32, i32
  }
  func.func @transform_13(%arg0: i32) -> (i32, i32) {
    %c0_i32 = arith.constant 0 : i32
    %c0_i32_0 = arith.constant 0 : i32
    return %arg0, %c0_i32 : i32, i32
  }
}

</mosaic_0001>

<bundles_post_ra>
// kernel: rnn_forward.1
= control target key start
LH: loop header
LB: loop body
LE: loop exit
PB: predicated region body
PF: predicated region fallthrough
CT: control target
= control target key end

     0   :  { %v5203_v3 = vmov 0.0   ;;  %vm5204_vm0 = vmmov 0   ;;  %vm72_vm1 = vcmask 261120   ;;  %v5205_v25 = vmov 0   ;;  %s5207_s23 = smov 32   ;;  %s6805_s2 = inlined_call_operand.vmem [shape: f32[32,256], index: 2, kind: input, shape index: {}]   ;;  %s6806_s4 = inlined_call_operand.vmem [shape: f32[32,128], index: 4, kind: input, shape index: {}]   ;;  %s6807_s0 = inlined_call_operand.vmem [shape: f32[8,8,32], index: 0, kind: input, shape index: {}]   ;;  %s6808_s5 = inlined_call_operand.vmem [shape: f32[32,128], index: 5, kind: input, shape index: {}]   ;;  %s6809_s3 = inlined_call_operand.vmem [shape: f32[1,256], index: 3, kind: input, shape index: {}]   ;;  %s6810_s1 = inlined_call_operand.vmem [shape: f32[8,8,1], index: 1, kind: input, shape index: {}]   ;;  %s6811_s6 = inlined_call_operand.vmem [shape: f32[32,256], index: 6, kind: input, shape index: {}]   ;;  %s6812_s7 = inlined_call_operand.vmem [shape: f32[32,256], index: 7, kind: input, shape index: {}]   ;;  %s6813_s10 = inlined_call_operand.vmem [shape: f32[32,128], index: 10, kind: input, shape index: {}]   ;;  %s6814_s9 = inlined_call_operand.vmem [shape: f32[32,128], index: 9, kind: input, shape index: {}]   ;;  %s6815_s8 = inlined_call_operand.vmem [shape: f32[1,256], index: 8, kind: input, shape index: {}]   ;;  %s6816_s11 = inlined_call_operand.vmem [shape: f32[64,128], index: 11, kind: input, shape index: {}]   ;;  %s6817_s12 = inlined_call_operand.vmem [shape: f32[1,128], index: 12, kind: input, shape index: {}]   ;;  %s6818_s13 = inlined_call_operand.vmem [shape: f32[8,128], index: 13, kind: output, shape index: {}]  }
   0x1   :  { %v59_v0 = vld [vmem:[%s6805_s2 + $0x38] sm:$0xff]  ;;  %v58_v1 = vld [vmem:[%s6805_s2 + $0x30] sm:$0xff]  ;;  %v57_v2 = vld [vmem:[%s6805_s2 + $0x28] sm:$0xff]  ;;  %4550 = vmatprep.subr.mxu1 %v5203_v3  ;;  %161 = vmatprep.mubr.f32.mxu0 %v5203_v3  ;;  %v62_v26 = vlaneseq }
   0x2   :  { %121 = vmatprep.subr.mxu0 %v59_v0  ;;  %v56_v4 = vld [vmem:[%s6805_s2 + $0x20] sm:$0xff]  ;;  %v5295_v5 = vld [vmem:[%s6806_s4 + $0x18] sm:$0xff]  ;;  %4558 = vmatprep.mubr.msk.f32.mxu1 %vm5204_vm0, %v5203_v3  ;;  %v5306_v7 = vld [vmem:[%s6806_s4 + $0x10] sm:$0xff] }
   0x3   :  { %122 = vmatpush1.msra.mxu0 %v58_v1  ;;  %4551 = vmatpush3.msra.mxu1 %v5295_v5  ;;  %v55_v6 = vld [vmem:[%s6805_s2 + $0x18] sm:$0xff]  ;;  %v54_v8 = vld [vmem:[%s6805_s2 + $0x10] sm:$0xff]  ;;  %v5315_v9 = vld [vmem:[%s6806_s4 + $0x8] sm:$0xff]  ;;  %v5428_v27 = vshrl.u32 %v62_v26, 7 }
   0x4   :  { %123 = vmatprep.subr.mxu0 %v57_v2  ;;  %4552 = vmatprep.subr.mxu1 %v5203_v3  ;;  %v53_v10 = vld [vmem:[%s6805_s2 + $0x8] sm:$0xff]  ;;  %v52_v11 = vld [vmem:[%s6805_s2] sm:$0xff]  ;;  %v5339_v14 = vld [vmem:[%s6808_s5 + $0x18] sm:$0xff] }
   0x5   :  { %124 = vmatpush1.msra.mxu0 %v56_v4  ;;  %4553 = vmatpush3.msra.mxu1 %v5306_v7  ;;  %v5328_v12 = vld [vmem:[%s6806_s4] sm:$0xff]  ;;  %v45_v15 = vld [vmem:[%s6807_s0 + $0x8] sm:$0xff]  ;;  %v5351_v16 = vld [vmem:[%s6808_s5 + $0x10] sm:$0xff]  ;;  %v64_v28 = vsub.s32 0, %v5428_v27  ;;  %v68_v30 = vsub.s32 1, %v5428_v27 }
   0x6   :  { %125 = vmatprep.subr.mxu0 %v55_v6  ;;  %4554 = vmatprep.subr.mxu1 %v5203_v3  ;;  %v44_v13 = vld [vmem:[%s6807_s0] sm:$0xff]  ;;  %v5360_v17 = vld [vmem:[%s6808_s5 + $0x8] sm:$0xff]  ;;  %v46_v18 = vld [vmem:[%s6807_s0 + $0x10] sm:$0xff] }
   0x7   :  { %126 = vmatpush1.msra.mxu0 %v54_v8  ;;  %4555 = vmatpush3.msra.mxu1 %v5315_v9  ;;  %v5373_v19 = vld [vmem:[%s6808_s5] sm:$0xff]  ;;  %v47_v20 = vld [vmem:[%s6807_s0 + $0x18] sm:$0xff]  ;;  %v49_v22 = vld [vmem:[%s6807_s0 + $0x28] sm:$0xff] }
   0x8   :  { %127 = vmatprep.subr.mxu0 %v53_v10  ;;  %4556 = vmatprep.subr.mxu1 %v5203_v3  ;;  %v48_v21 = vld [vmem:[%s6807_s0 + $0x20] sm:$0xff]  ;;  %v50_v23 = vld [vmem:[%s6807_s0 + $0x30] sm:$0xff]  ;;  %v51_v24 = vld [vmem:[%s6807_s0 + $0x38] sm:$0xff]  ;;  %s5206_s0 = smov 64  }
   0x9   :  { %128 = vmatpush1.msra.mxu0 %v52_v11  ;;  %4557 = vmatpush3.msra.mxu1 %v5328_v12  ;;  %v60_v29 = vld [vmem:[%s6809_s3] sm:$0x3] }
   0xa   :  { %4272 = vmatmul.mubr.msk.f32.vlgmr.msra.gmra.mxu0 %vm72_vm1, %v44_v13  ;;  %4559 = vmatmul.mubr.f32.vlgmr.msra.gmra.mxu1 %v5203_v3  ;;  %v65_v31 = vrot.slane %v60_v29, %v64_v28  ;;  %v69_v32 = vrot.slane %v60_v29, %v68_v30  ;;  %v382_v13 = vld [vmem:[%s6810_s1] sm:$0xff] }
   0xb   :  { %167 = vmatprep.mubr.f32.mxu0 %v5203_v3  ;;  %4561 = vmatprep.subr.mxu1 %v5203_v3  ;;  %vm383_vm2 = vcmp.gt.f32.partialorder %v382_v13, 0.0 }
   0xc   :  { %4562 = vmatpush3.msra.mxu1 %v5339_v14  ;;  %4569 = vmatprep.mubr.msk.f32.mxu1 %vm5204_vm0, %v5203_v3 }
   0xd   :  { %4563 = vmatprep.subr.mxu1 %v5203_v3  ;;  %4594 = vmatprep.subr.mxu0 %v5203_v3 }
   0xe   :  { %4273 = vmatmul.mubr.msk.f32.gmra.mxu0 %vm72_vm1, %v45_v15  ;;  %4564 = vmatpush3.msra.mxu1 %v5351_v16 }
   0xf   :  { %173 = vmatprep.mubr.f32.mxu0 %v5203_v3  ;;  %4565 = vmatprep.subr.mxu1 %v5203_v3 }
  0x10   :  { %4566 = vmatpush3.msra.mxu1 %v5360_v17  ;;  %4595 = vmatpush3.msra.mxu0 %v5295_v5 }
  0x11   :  { %4567 = vmatprep.subr.mxu1 %v5203_v3  ;;  %4596 = vmatprep.subr.mxu0 %v5203_v3 }
  0x12   :  { %4274 = vmatmul.mubr.msk.f32.gmra.mxu0 %vm72_vm1, %v46_v18  ;;  %4568 = vmatpush3.msra.mxu1 %v5373_v19  ;;  %v411_v18 = vsel %vm383_vm2, 1, %v5205_v25 }
  0x13   :  { %179 = vmatprep.mubr.f32.mxu0 %v5203_v3  ;;  %4570 = vmatmul.mubr.f32.vlgmr.msra.gmra.mxu1 %v5203_v3 }
  0x14   :  { %4572 = vmatprep.subr.mxu1 %v5203_v3  ;;  %4580 = vmatprep.mubr.msk.f32.mxu1 %vm5204_vm0, %v5203_v3 }
  0x15   :  { %4573 = vmatpush3.msra.mxu1 %v5295_v5  ;;  %4597 = vmatpush3.msra.mxu0 %v5306_v7 }
  0x16   :  { %4275 = vmatmul.mubr.msk.f32.gmra.mxu0 %vm72_vm1, %v47_v20  ;;  %4574 = vmatprep.subr.mxu1 %v5203_v3 }
  0x17   :  { %185 = vmatprep.mubr.f32.mxu0 %v5203_v3  ;;  %4575 = vmatpush3.msra.mxu1 %v5306_v7 }
  0x18   :  { %4576 = vmatprep.subr.mxu1 %v5203_v3  ;;  %4598 = vmatprep.subr.mxu0 %v5203_v3 }
  0x19   :  { %4577 = vmatpush3.msra.mxu1 %v5315_v9  ;;  %4599 = vmatpush3.msra.mxu0 %v5315_v9 }
  0x1a   :  { %4276 = vmatmul.mubr.msk.f32.gmra.mxu0 %vm72_vm1, %v48_v21  ;;  %4578 = vmatprep.subr.mxu1 %v5203_v3 }
  0x1b   :  { %191 = vmatprep.mubr.f32.mxu0 %v5203_v3  ;;  %4579 = vmatpush3.msra.mxu1 %v5328_v12 }
  0x1c   :  { %4583 = vmatprep.subr.mxu1 %v5203_v3  ;;  %4600 = vmatprep.subr.mxu0 %v5203_v3 }
  0x1d   :  { %4601 = vmatpush3.msra.mxu0 %v5328_v12  ;;  %4929 = vset.pattern.permute.xlu0 %v5205_v25 }
  0x1e   :  { %4277 = vmatmul.mubr.msk.f32.gmra.mxu0 %vm72_vm1, %v49_v22  ;;  %4616 = vmatprep.subr.mxu0 %v5203_v3 }
  0x1f   :  { %197 = vmatprep.mubr.f32.mxu0 %v5203_v3  ;;  %4930 = vset.pattern.permute.xlu1 %v5205_v25 }
  0x22   :  { %4278 = vmatmul.mubr.msk.f32.gmra.mxu0 %vm72_vm1, %v50_v23 }
  0x23   :  { %203 = vmatprep.mubr.f32.mxu0 %v5203_v3 }
  0x26   :  { %4279 = vmatmul.mubr.msk.f32.gmra.mxu0 %vm72_vm1, %v51_v24 }
  0x27   :  { %4602 = vmatprep.mubr.msk.f32.mxu0 %vm5204_vm0, %v5203_v3 }
  0xca   :  { %v163_v33 = vpop.f32.mrf.mxu0  ;;  %v304_v34 = vpop.f32.mrf.mxu1 }
  0xcb   :  { %v164_v35 = vadd.f32 %v163_v33, %v65_v31 }
  0xcc   :  { %v165_v36 = vpop.f32.mrf.mxu0  ;;  %v4560_v37 = vpop.f32.mrf.mxu1 }
  0xcd   :  { %v5439_v38 = vadd.f32 %v165_v36, %v69_v32  ;;  %v308_v39 = vadd.f32 %v304_v34, %v164_v35 }
  0xce   :  { %v169_v40 = vpop.f32.mrf.mxu0 }
  0xcf   :  { %4931 = vtanh.f32 %v308_v39  ;;  %v5441_v41 = vadd.f32 %v169_v40, %v65_v31  ;;  %v4281_v20 = vmul.f32 -1.442695, %v308_v39  ;;  %v4280_v40 = vld [vmem:[%s6810_s1 + $0x38] sm:$0xff] }
  0xd0   :  { %v171_v42 = vpop.f32.mrf.mxu0  ;;  %vm386_vm3 = vcmp.gt.f32.partialorder %v4280_v40, 0.0  ;;  %v4285_v40 = vld [vmem:[%s6810_s1 + $0x8] sm:$0xff] }
  0xd1   :  { %v5443_v43 = vadd.f32 %v171_v42, %v69_v32  ;;  %vm612_vm7 = vcmp.gt.f32.partialorder %v4285_v40, 0.0  ;;  %v4291_v40 = vld [vmem:[%s6810_s1 + $0x10] sm:$0xff] }
  0xd2   :  { %v175_v44 = vpop.f32.mrf.mxu0  ;;  %vm842_vm11 = vcmp.gt.f32.partialorder %v4291_v40, 0.0 }
  0xd3   :  { %v5445_v45 = vadd.f32 %v175_v44, %v65_v31  ;;  %v377_v46 = vpop.f32.mrf.mxu1  ;;  %v442_v44 = vsel %vm386_vm3, 1, %v5205_v25 }
  0xd4   :  { %v177_v47 = vpop.f32.mrf.mxu0 }
  0xd5   :  { %v5447_v48 = vadd.f32 %v177_v47, %v69_v32  ;;  %v4571_v49 = vpop.f32.mrf.mxu1 }
  0xd6   :  { %v181_v50 = vpop.f32.mrf.mxu0 }
  0xd7   :  { %v5449_v51 = vadd.f32 %v181_v50, %v65_v31 }
  0xd8   :  { %v183_v52 = vpop.f32.mrf.mxu0 }
  0xd9   :  { %v5451_v53 = vadd.f32 %v183_v52, %v69_v32 }
  0xda   :  { %v187_v54 = vpop.f32.mrf.mxu0 }
  0xdb   :  { %v5453_v55 = vadd.f32 %v187_v54, %v65_v31 }
  0xdc   :  { %v4932_v56 = vpop.eup %4931  ;;  %v189_v57 = vpop.f32.mrf.mxu0 }
  0xdd   :  { %v5455_v58 = vadd.f32 %v189_v57, %v69_v32  ;;  %396 = vrot.lane.b32.xlu0 %v4932_v56, %s5206_s0 }
  0xde   :  { %v193_v59 = vpop.f32.mrf.mxu0 }
  0xdf   :  { %v5458_v60 = vadd.f32 %v193_v59, %v65_v31 }
  0xe0   :  { %v195_v61 = vpop.f32.mrf.mxu0 }
  0xe1   :  { %v5460_v62 = vadd.f32 %v195_v61, %v69_v32 }
  0xe2   :  { %v199_v63 = vpop.f32.mrf.mxu0 }
  0xe3   :  { %v5462_v0 = vadd.f32 %v199_v63, %v65_v31 }
  0xe4   :  { %v201_v1 = vpop.f32.mrf.mxu0 }
  0xe5   :  { %v5464_v2 = vadd.f32 %v201_v1, %v69_v32 }
  0xe6   :  { %v205_v4 = vpop.f32.mrf.mxu0 }
  0xe7   :  { %v5466_v6 = vadd.f32 %v205_v4, %v65_v31 }
  0xe8   :  { %v207_v8 = vpop.f32.mrf.mxu0 }
  0xe9   :  { %v208_v10 = vadd.f32 %v207_v8, %v69_v32 }
  0xeb   :  { %v381_v11 = vadd.f32 %v377_v46, %v208_v10 }
  0xed   :  { %4933 = vtanh.f32 %v381_v11  ;;  %v4282_v23 = vmul.f32 -1.442695, %v381_v11 }
  0xee   :  { %4935 = vpow2.f32 %v4281_v20 }
  0xfa   :  { %v4934_v15 = vpop.eup %4933 }
  0xfb   :  { %427 = vrot.lane.b32.xlu0 %v4934_v15, %s5206_s0  ;;  %v4936_v21 = vpop.eup %4935 }
  0xfc   :  { %v390_v22 = vadd.f32 1.0, %v4936_v21 }
  0xfe   :  { %4937 = vrcp.f32 %v390_v22 }
  0xff   :  { %413 = vperm.xlu0 %4929, %v411_v18   ;;  %4939 = vpow2.f32 %v4282_v23 }
 0x10b   :  { %v4938_v24 = vpop.eup %4937 }
 0x10c   :  { %v4940_v31 = vpop.eup %4939  ;;  %v394_v36 = vmul.f32 0.0, %v4938_v24 }
 0x10d   :  { %v421_v32 = vadd.f32 1.0, %v4940_v31 }
 0x10f   :  { %4941 = vrcp.f32 %v421_v32 }
 0x11c   :  { %v4942_v33 = vpop.eup %4941 }
 0x11d   :  { %v425_v46 = vmul.f32 0.0, %v4942_v33 }
 0x14f   :  { %v397_v26 = vpop.permute.xlu0 %396 }
 0x150   :  { %v399_v29 = vmul.f32 %v4938_v24, %v397_v26 }
 0x152   :  { %401 = vrot.lane.b32.xlu1 %v399_v29, %s5207_s23 }
 0x16d   :  { %v428_v34 = vpop.permute.xlu0 %427 }
 0x16e   :  { %v430_v35 = vmul.f32 %v4942_v33, %v428_v34 }
 0x170   :  { %432 = vrot.lane.b32.xlu1 %v430_v35, %s5207_s23 }
 0x17a   :  { %v5487_v52 = vpop.permute.xlu0 %413 }
 0x17b   :  { %vm415_vm4 = vcmp.eq.s32.totalorder %v5487_v52, 1 }
 0x1c4   :  { %v402_v37 = vpop.permute.xlu1 %401 }
 0x1c5   :  { %v5475_v39 = vadd.f32 %v402_v37, %v394_v36 }
 0x1c7   :  { %4943 = vtanh.f32 %v5475_v39 }
 0x1d4   :  { %v4944_v42 = vpop.eup %4943 }
 0x1d5   :  { %407 = vrot.lane.b32.xlu1 %v4944_v42, %s5206_s0 }
 0x1d9   :  { %444 = vperm.xlu1 %4930, %v442_v44   ;;  %v5546_v44 = vsel %vm612_vm7, 1, %v5205_v25 }
 0x1e2   :  { %v433_v47 = vpop.permute.xlu1 %432 }
 0x1e3   :  { %v5483_v49 = vadd.f32 %v433_v47, %v425_v46 }
 0x1e5   :  { %4945 = vtanh.f32 %v5483_v49 }
 0x1f2   :  { %v4946_v50 = vpop.eup %4945 }
 0x1f3   :  { %438 = vrot.lane.b32.xlu0 %v4946_v50, %s5206_s0  ;;  %v5558_v50 = vsel %vm415_vm4, %v5475_v39, 0.0 }
 0x247   :  { %v408_v54 = vpop.permute.xlu1 %407 }
 0x248   :  { %v410_v56 = vmul.f32 %v4938_v24, %v408_v54 }
 0x24a   :  { %v5492_v57 = vsel %vm415_vm4, %v410_v56, 0.0 }
 0x24b   :  { %450 = vrot.lane.b32.xlu1 %v5492_v57, %s5207_s23 }
 0x254   :  { %v5496_v59 = vpop.permute.xlu1 %444 }
 0x255   :  { %vm446_vm5 = vcmp.eq.s32.totalorder %v5496_v59, 1 }
 0x256   :  { %v5552_v46 = vsel %vm446_vm5, %v5483_v49, 0.0 }
 0x265   :  { %v439_v61 = vpop.permute.xlu0 %438 }
 0x266   :  { %v441_v63 = vmul.f32 %v4942_v33, %v439_v61 }
 0x268   :  { %v5501_v1 = vsel %vm446_vm5, %v441_v63, 0.0 }
 0x269   :  { %455 = vrot.lane.b32.xlu0 %v5501_v1, %s5207_s23 }
 0x2bd   :  { %v451_v4 = vpop.permute.xlu1 %450 }
 0x2be   :  { %453 = vst.msk [vmem:[#allocation3] sm:$0xff] %vm72_vm1, %v451_v4  ;;  %4581 = vmatmul.mubr.msk.f32.vlgmr.msra.gmra.mxu1 %vm72_vm1, %v451_v4 }
 0x2bf   :  { %4584 = vmatpush3.msra.mxu1 %v5339_v14  ;;  %4591 = vmatprep.mubr.msk.f32.mxu1 %vm5204_vm0, %v5203_v3 }
 0x2c0   :  { %4585 = vmatprep.subr.mxu1 %v5203_v3 }
 0x2c1   :  { %4586 = vmatpush3.msra.mxu1 %v5351_v16 }
 0x2c2   :  { %4587 = vmatprep.subr.mxu1 %v5203_v3 }
 0x2c3   :  { %4588 = vmatpush3.msra.mxu1 %v5360_v17 }
 0x2c4   :  { %4589 = vmatprep.subr.mxu1 %v5203_v3 }
 0x2c5   :  { %4590 = vmatpush3.msra.mxu1 %v5373_v19 }
 0x2c6   :  { %4605 = vmatprep.subr.mxu1 %v5203_v3 }
 0x2db   :  { %v456_v8 = vpop.permute.xlu0 %455 }
 0x2dc   :  { %459 = vst.msk [vmem:[#allocation4 + $0x38] sm:$0xff] %vm72_vm1, %v456_v8  ;;  %4592 = vmatmul.mubr.msk.f32.vlgmr.msra.gmra.mxu1 %vm72_vm1, %v456_v8 }
 0x2dd   :  { %4606 = vmatpush3.msra.mxu1 %v5339_v14  ;;  %4613 = vmatprep.mubr.msk.f32.mxu1 %vm5204_vm0, %v5203_v3 }
 0x2de   :  { %4607 = vmatprep.subr.mxu1 %v5203_v3 }
 0x2df   :  { %4608 = vmatpush3.msra.mxu1 %v5351_v16 }
 0x2e0   :  { %4609 = vmatprep.subr.mxu1 %v5203_v3 }
 0x2e1   :  { %4610 = vmatpush3.msra.mxu1 %v5360_v17 }
 0x2e2   :  { %4611 = vmatprep.subr.mxu1 %v5203_v3 }
 0x2e3   :  { %4612 = vmatpush3.msra.mxu1 %v5373_v19 }
 0x2e4   :  { %4627 = vmatprep.subr.mxu1 %v5203_v3 }
 0x37e   :  { %v530_v10 = vpop.f32.mrf.mxu1 }
 0x37f   :  { %v534_v11 = vadd.f32 %v530_v10, %v5441_v41 }
 0x380   :  { %v4582_v13 = vpop.f32.mrf.mxu1 }
 0x381   :  { %4947 = vtanh.f32 %v534_v11  ;;  %v4287_v23 = vmul.f32 -1.442695, %v534_v11 }
 0x38e   :  { %v4948_v15 = vpop.eup %4947 }
 0x38f   :  { %625 = vrot.lane.b32.xlu0 %v4948_v15, %s5206_s0 }
 0x39c   :  { %v605_v18 = vpop.f32.mrf.mxu1 }
 0x39d   :  { %v609_v20 = vadd.f32 %v605_v18, %v5464_v2  ;;  %v4286_v2 = vld [vmem:[%s6810_s1 + $0x30] sm:$0xff] }
 0x39e   :  { %v4593_v21 = vpop.f32.mrf.mxu1  ;;  %vm615_vm6 = vcmp.gt.f32.partialorder %v4286_v2, 0.0 }
 0x39f   :  { %4949 = vtanh.f32 %v609_v20  ;;  %v4288_v29 = vmul.f32 -1.442695, %v609_v20  ;;  %v5542_v42 = vsel %vm615_vm6, 1, %v5205_v25 }
 0x3a0   :  { %4951 = vpow2.f32 %v4287_v23 }
 0x3ac   :  { %v4950_v22 = vpop.eup %4949 }
 0x3ad   :  { %656 = vrot.lane.b32.xlu1 %v4950_v22, %s5206_s0  ;;  %v4952_v24 = vpop.eup %4951 }
 0x3ae   :  { %v619_v26 = vadd.f32 1.0, %v4952_v24 }
 0x3b0   :  { %4953 = vrcp.f32 %v619_v26 }
 0x3b1   :  { %4955 = vpow2.f32 %v4288_v29 }
 0x3bd   :  { %v4954_v41 = vpop.eup %4953 }
 0x3be   :  { %v4956_v33 = vpop.eup %4955  ;;  %v623_v61 = vmul.f32 %v4954_v41, %v5558_v50 }
 0x3bf   :  { %v650_v34 = vadd.f32 1.0, %v4956_v33 }
 0x3c1   :  { %4957 = vrcp.f32 %v650_v34 }
 0x3ce   :  { %v4958_v35 = vpop.eup %4957 }
 0x3cf   :  { %v654_v47 = vmul.f32 %v4958_v35, %v5552_v46 }
 0x401   :  { %v626_v31 = vpop.permute.xlu0 %625 }
 0x402   :  { %v628_v32 = vmul.f32 %v4954_v41, %v626_v31 }
 0x404   :  { %630 = vrot.lane.b32.xlu0 %v628_v32, %s5207_s23 }
 0x41f   :  { %v657_v36 = vpop.permute.xlu1 %656 }
 0x420   :  { %v659_v37 = vmul.f32 %v4958_v35, %v657_v36 }
 0x422   :  { %661 = vrot.lane.b32.xlu1 %v659_v37, %s5207_s23 }
 0x426   :  { %673 = vperm.xlu1 %4930, %v5542_v42  }
 0x42a   :  { %642 = vperm.xlu1 %4930, %v5546_v44  }
 0x476   :  { %v631_v54 = vpop.permute.xlu0 %630 }
 0x477   :  { %v5563_v4 = vadd.f32 %v631_v54, %v623_v61 }
 0x494   :  { %v662_v56 = vpop.permute.xlu1 %661 }
 0x495   :  { %v5561_v63 = vadd.f32 %v662_v56, %v654_v47 }
 0x497   :  { %4959 = vtanh.f32 %v5561_v63 }
 0x498   :  { %4961 = vtanh.f32 %v5563_v4 }
 0x4a1   :  { %v5569_v39 = vpop.permute.xlu1 %673 }
 0x4a2   :  { %vm675_vm8 = vcmp.eq.s32.totalorder %v5569_v39, 1 }
 0x4a4   :  { %v4960_v49 = vpop.eup %4959 }
 0x4a5   :  { %667 = vrot.lane.b32.xlu0 %v4960_v49, %s5206_s0  ;;  %v4962_v59 = vpop.eup %4961  ;;  %v5572_v10 = vpop.permute.xlu1 %642  ;;  %v5630_v49 = vsel %vm842_vm11, 1, %v5205_v25 }
 0x4a6   :  { %vm644_vm9 = vcmp.eq.s32.totalorder %v5572_v10, 1 }
 0x4a9   :  { %636 = vrot.lane.b32.xlu0 %v4962_v59, %s5206_s0  ;;  %v5637_v59 = vsel %vm675_vm8, %v5561_v63, %v5552_v46 }
 0x517   :  { %v668_v52 = vpop.permute.xlu0 %667 }
 0x518   :  { %v670_v8 = vmul.f32 %v4958_v35, %v668_v52 }
 0x51a   :  { %v5577_v11 = vsel %vm675_vm8, %v670_v8, %v5501_v1 }
 0x51b   :  { %685 = vrot.lane.b32.xlu1 %v5577_v11, %s5207_s23  ;;  %v637_v13 = vpop.permute.xlu0 %636 }
 0x51c   :  { %v639_v15 = vmul.f32 %v4954_v41, %v637_v13 }
 0x51e   :  { %v5585_v18 = vsel %vm644_vm9, %v639_v15, %v5492_v57  ;;  %v5646_v15 = vsel %vm644_vm9, %v5563_v4, %v5558_v50 }
 0x51f   :  { %679 = vrot.lane.b32.xlu0 %v5585_v18, %s5207_s23 }
 0x58d   :  { %v686_v20 = vpop.permute.xlu1 %685 }
 0x58e   :  { %689 = vst.msk [vmem:[#allocation4 + $0x30] sm:$0xff] %vm72_vm1, %v686_v20  ;;  %4614 = vmatmul.mubr.msk.f32.vlgmr.msra.gmra.mxu1 %vm72_vm1, %v686_v20 }
 0x58f   :  { %4628 = vmatpush3.msra.mxu1 %v5339_v14  ;;  %4635 = vmatprep.mubr.msk.f32.mxu1 %vm5204_vm0, %v5203_v3 }
 0x590   :  { %4629 = vmatprep.subr.mxu1 %v5203_v3 }
 0x591   :  { %v680_v1 = vpop.permute.xlu0 %679  ;;  %4630 = vmatpush3.msra.mxu1 %v5351_v16 }
 0x592   :  { %683 = vst.msk [vmem:[#allocation3 + $0x8] sm:$0xff] %vm72_vm1, %v680_v1  ;;  %4603 = vmatmul.mubr.msk.f32.vlgmr.msra.gmra.mxu0 %vm72_vm1, %v680_v1  ;;  %4631 = vmatprep.subr.mxu1 %v5203_v3 }
 0x593   :  { %4617 = vmatpush3.msra.mxu0 %v5295_v5  ;;  %4632 = vmatpush3.msra.mxu1 %v5360_v17 }
 0x594   :  { %4618 = vmatprep.subr.mxu0 %v5203_v3  ;;  %4633 = vmatprep.subr.mxu1 %v5203_v3 }
 0x595   :  { %4619 = vmatpush3.msra.mxu0 %v5306_v7  ;;  %4634 = vmatpush3.msra.mxu1 %v5373_v19 }
 0x596   :  { %4620 = vmatprep.subr.mxu0 %v5203_v3  ;;  %4624 = vmatprep.mubr.msk.f32.mxu0 %vm5204_vm0, %v5203_v3 }
 0x597   :  { %4621 = vmatpush3.msra.mxu0 %v5315_v9  ;;  %4649 = vmatprep.subr.mxu1 %v5203_v3 }
 0x598   :  { %4622 = vmatprep.subr.mxu0 %v5203_v3 }
 0x599   :  { %4623 = vmatpush3.msra.mxu0 %v5328_v12 }
 0x59a   :  { %4638 = vmatprep.subr.mxu0 %v5203_v3 }
 0x64e   :  { %v835_v57 = vpop.f32.mrf.mxu1 }
 0x64f   :  { %v839_v21 = vadd.f32 %v835_v57, %v5460_v62 }
 0x650   :  { %v4615_v22 = vpop.f32.mrf.mxu1 }
 0x651   :  { %4963 = vtanh.f32 %v839_v21  ;;  %v4294_v31 = vmul.f32 -1.442695, %v839_v21 }
 0x652   :  { %v760_v23 = vpop.f32.mrf.mxu0 }
 0x653   :  { %v764_v24 = vadd.f32 %v760_v23, %v5445_v45  ;;  %v4292_v45 = vld [vmem:[%s6810_s1 + $0x28] sm:$0xff] }
 0x654   :  { %v4604_v26 = vpop.f32.mrf.mxu0  ;;  %vm845_vm10 = vcmp.gt.f32.partialorder %v4292_v45, 0.0 }
 0x655   :  { %4965 = vtanh.f32 %v764_v24  ;;  %v4293_v32 = vmul.f32 -1.442695, %v764_v24  ;;  %v5625_v56 = vsel %vm845_vm10, 1, %v5205_v25 }
 0x656   :  { %4967 = vpow2.f32 %v4294_v31 }
 0x657   :  { %4969 = vpow2.f32 %v4293_v32 }
 0x65e   :  { %v4964_v29 = vpop.eup %4963 }
 0x65f   :  { %886 = vrot.lane.b32.xlu1 %v4964_v29, %s5206_s0 }
 0x662   :  { %v4966_v41 = vpop.eup %4965 }
 0x663   :  { %855 = vrot.lane.b32.xlu0 %v4966_v41, %s5206_s0  ;;  %v4968_v33 = vpop.eup %4967 }
 0x664   :  { %v880_v34 = vadd.f32 1.0, %v4968_v33  ;;  %v4970_v62 = vpop.eup %4969 }
 0x665   :  { %v849_v2 = vadd.f32 1.0, %v4970_v62 }
 0x666   :  { %4971 = vrcp.f32 %v880_v34 }
 0x667   :  { %4973 = vrcp.f32 %v849_v2 }
 0x673   :  { %v4972_v35 = vpop.eup %4971 }
 0x674   :  { %v4974_v47 = vpop.eup %4973  ;;  %v884_v52 = vmul.f32 %v4972_v35, %v5637_v59 }
 0x675   :  { %v853_v20 = vmul.f32 %v4974_v47, %v5646_v15 }
 0x6d1   :  { %v887_v36 = vpop.permute.xlu1 %886 }
 0x6d2   :  { %v889_v37 = vmul.f32 %v4972_v35, %v887_v36 }
 0x6d4   :  { %891 = vrot.lane.b32.xlu1 %v889_v37, %s5207_s23 }
 0x6d5   :  { %v856_v54 = vpop.permute.xlu0 %855 }
 0x6d6   :  { %v858_v61 = vmul.f32 %v4974_v47, %v856_v54 }
 0x6d8   :  { %860 = vrot.lane.b32.xlu0 %v858_v61, %s5207_s23  ;;  %903 = vperm.xlu1 %4930, %v5625_v56   ;;  %v4297_v61 = vld [vmem:[%s6810_s1 + $0x18] sm:$0xff] }
 0x6d9   :  { %vm1072_vm15 = vcmp.gt.f32.partialorder %v4297_v61, 0.0 }
 0x6dc   :  { %872 = vperm.xlu1 %4930, %v5630_v49  }
 0x746   :  { %v892_v8 = vpop.permute.xlu1 %891 }
 0x747   :  { %v5640_v13 = vadd.f32 %v892_v8, %v884_v52 }
 0x749   :  { %4975 = vtanh.f32 %v5640_v13 }
 0x74a   :  { %v861_v1 = vpop.permute.xlu0 %860 }
 0x74b   :  { %v5650_v57 = vadd.f32 %v861_v1, %v853_v20 }
 0x74d   :  { %4977 = vtanh.f32 %v5650_v57 }
 0x753   :  { %v5655_v39 = vpop.permute.xlu1 %903 }
 0x754   :  { %vm905_vm12 = vcmp.eq.s32.totalorder %v5655_v39, 1 }
 0x756   :  { %v4976_v46 = vpop.eup %4975 }
 0x757   :  { %897 = vrot.lane.b32.xlu0 %v4976_v46, %s5206_s0  ;;  %v5658_v4 = vpop.permute.xlu1 %872  ;;  %v5716_v46 = vsel %vm1072_vm15, 1, %v5205_v25 }
 0x758   :  { %vm874_vm13 = vcmp.eq.s32.totalorder %v5658_v4, 1 }
 0x75a   :  { %v4978_v63 = vpop.eup %4977 }
 0x75b   :  { %866 = vrot.lane.b32.xlu0 %v4978_v63, %s5206_s0  ;;  %v5723_v63 = vsel %vm905_vm12, %v5640_v13, %v5637_v59 }
 0x7c9   :  { %v898_v10 = vpop.permute.xlu0 %897 }
 0x7ca   :  { %v900_v50 = vmul.f32 %v4972_v35, %v898_v10 }
 0x7cc   :  { %v5663_v21 = vsel %vm905_vm12, %v900_v50, %v5577_v11 }
 0x7cd   :  { %915 = vrot.lane.b32.xlu1 %v5663_v21, %s5207_s23  ;;  %v867_v22 = vpop.permute.xlu0 %866 }
 0x7ce   :  { %v869_v23 = vmul.f32 %v4974_v47, %v867_v22 }
 0x7d0   :  { %v5671_v24 = vsel %vm874_vm13, %v869_v23, %v5585_v18  ;;  %v5732_v23 = vsel %vm874_vm13, %v5650_v57, %v5646_v15 }
 0x7d1   :  { %909 = vrot.lane.b32.xlu0 %v5671_v24, %s5207_s23 }
 0x83f   :  { %v916_v26 = vpop.permute.xlu1 %915 }
 0x840   :  { %919 = vst.msk [vmem:[#allocation4 + $0x28] sm:$0xff] %vm72_vm1, %v916_v26  ;;  %4636 = vmatmul.mubr.msk.f32.vlgmr.msra.gmra.mxu1 %vm72_vm1, %v916_v26 }
 0x841   :  { %4650 = vmatpush3.msra.mxu1 %v5339_v14  ;;  %4657 = vmatprep.mubr.msk.f32.mxu1 %vm5204_vm0, %v5203_v3 }
 0x842   :  { %4651 = vmatprep.subr.mxu1 %v5203_v3 }
 0x843   :  { %v910_v11 = vpop.permute.xlu0 %909  ;;  %4652 = vmatpush3.msra.mxu1 %v5351_v16 }
 0x844   :  { %913 = vst.msk [vmem:[#allocation3 + $0x10] sm:$0xff] %vm72_vm1, %v910_v11  ;;  %4625 = vmatmul.mubr.msk.f32.vlgmr.msra.gmra.mxu0 %vm72_vm1, %v910_v11  ;;  %4653 = vmatprep.subr.mxu1 %v5203_v3 }
 0x845   :  { %4639 = vmatpush3.msra.mxu0 %v5295_v5  ;;  %4654 = vmatpush3.msra.mxu1 %v5360_v17 }
 0x846   :  { %4640 = vmatprep.subr.mxu0 %v5203_v3  ;;  %4655 = vmatprep.subr.mxu1 %v5203_v3 }
 0x847   :  { %4641 = vmatpush3.msra.mxu0 %v5306_v7  ;;  %4656 = vmatpush3.msra.mxu1 %v5373_v19 }
 0x848   :  { %4642 = vmatprep.subr.mxu0 %v5203_v3  ;;  %4646 = vmatprep.mubr.msk.f32.mxu0 %vm5204_vm0, %v5203_v3 }
 0x849   :  { %4643 = vmatpush3.msra.mxu0 %v5315_v9  ;;  %4671 = vmatprep.subr.mxu1 %v5203_v3 }
 0x84a   :  { %4644 = vmatprep.subr.mxu0 %v5203_v3 }
 0x84b   :  { %4645 = vmatpush3.msra.mxu0 %v5328_v12 }
 0x84c   :  { %4660 = vmatprep.subr.mxu0 %v5203_v3 }
 0x900   :  { %v1065_v18 = vpop.f32.mrf.mxu1 }
 0x901   :  { %v1069_v29 = vadd.f32 %v1065_v18, %v5455_v58 }
 0x902   :  { %v4637_v41 = vpop.f32.mrf.mxu1 }
 0x903   :  { %4979 = vtanh.f32 %v1069_v29  ;;  %v4300_v2 = vmul.f32 -1.442695, %v1069_v29 }
 0x904   :  { %v990_v31 = vpop.f32.mrf.mxu0 }
 0x905   :  { %v994_v32 = vadd.f32 %v990_v31, %v5449_v51  ;;  %v4298_v51 = vld [vmem:[%s6810_s1 + $0x20] sm:$0xff] }
 0x906   :  { %v4626_v33 = vpop.f32.mrf.mxu0  ;;  %vm1075_vm14 = vcmp.gt.f32.partialorder %v4298_v51, 0.0 }
 0x907   :  { %4981 = vtanh.f32 %v994_v32  ;;  %v4299_v45 = vmul.f32 -1.442695, %v994_v32  ;;  %v5711_v20 = vsel %vm1075_vm14, 1, %v5205_v25 }
 0x908   :  { %4983 = vpow2.f32 %v4300_v2 }
 0x909   :  { %4985 = vpow2.f32 %v4299_v45 }
 0x910   :  { %v4980_v34 = vpop.eup %4979 }
 0x911   :  { %1116 = vrot.lane.b32.xlu1 %v4980_v34, %s5206_s0 }
 0x914   :  { %v4982_v62 = vpop.eup %4981 }
 0x915   :  { %1085 = vrot.lane.b32.xlu0 %v4982_v62, %s5206_s0  ;;  %v4984_v35 = vpop.eup %4983 }
 0x916   :  { %v1110_v36 = vadd.f32 1.0, %v4984_v35  ;;  %v4986_v58 = vpop.eup %4985 }
 0x917   :  { %v1079_v37 = vadd.f32 1.0, %v4986_v58 }
 0x918   :  { %4987 = vrcp.f32 %v1110_v36 }
 0x919   :  { %4989 = vrcp.f32 %v1079_v37 }
 0x925   :  { %v4988_v40 = vpop.eup %4987 }
 0x926   :  { %v4990_v52 = vpop.eup %4989  ;;  %v1114_v10 = vmul.f32 %v4988_v40, %v5723_v63 }
 0x927   :  { %v1083_v26 = vmul.f32 %v4990_v52, %v5732_v23 }
 0x983   :  { %v1117_v47 = vpop.permute.xlu1 %1116 }
 0x984   :  { %v1119_v54 = vmul.f32 %v4988_v40, %v1117_v47 }
 0x986   :  { %1121 = vrot.lane.b32.xlu1 %v1119_v54, %s5207_s23 }
 0x987   :  { %v1086_v8 = vpop.permute.xlu0 %1085 }
 0x988   :  { %v1088_v1 = vmul.f32 %v4990_v52, %v1086_v8 }
 0x98a   :  { %1090 = vrot.lane.b32.xlu0 %v1088_v1, %s5207_s23  ;;  %1133 = vperm.xlu1 %4930, %v5711_v20  }
 0x98e   :  { %1102 = vperm.xlu1 %4930, %v5716_v46  }
 0x9f8   :  { %v1122_v50 = vpop.permute.xlu1 %1121 }
 0x9f9   :  { %v5726_v22 = vadd.f32 %v1122_v50, %v1114_v10 }
 0x9fb   :  { %4991 = vtanh.f32 %v5726_v22 }
 0x9fc   :  { %v1091_v11 = vpop.permute.xlu0 %1090 }
 0x9fd   :  { %v5736_v18 = vadd.f32 %v1091_v11, %v1083_v26 }
 0x9ff   :  { %4993 = vtanh.f32 %v5736_v18 }
 0xa05   :  { %v5741_v39 = vpop.permute.xlu1 %1133 }
 0xa06   :  { %vm1135_vm2 = vcmp.eq.s32.totalorder %v5741_v39, 1 }
 0xa07   :  { %v5797_v47 = vsel %vm1135_vm2, %v5726_v22, %v5723_v63 }
 0xa08   :  { %v4992_v59 = vpop.eup %4991 }
 0xa09   :  { %1127 = vrot.lane.b32.xlu0 %v4992_v59, %s5206_s0  ;;  %v5744_v57 = vpop.permute.xlu1 %1102 }
 0xa0a   :  { %vm1104_vm3 = vcmp.eq.s32.totalorder %v5744_v57, 1  ;;  %v5849_v57 = vld [vmem:[%s6808_s5 + $0x10] sm:$0xff] }
 0xa0b   :  { %v5806_v8 = vsel %vm1104_vm3, %v5736_v18, %v5732_v23 }
 0xa0c   :  { %v4994_v13 = vpop.eup %4993 }
 0xa0d   :  { %1096 = vrot.lane.b32.xlu0 %v4994_v13, %s5206_s0 }
 0xa7b   :  { %v1128_v4 = vpop.permute.xlu0 %1127 }
 0xa7c   :  { %v1130_v15 = vmul.f32 %v4988_v40, %v1128_v4  ;;  %v5840_v4 = vld [vmem:[%s6808_s5 + $0x18] sm:$0xff] }
 0xa7e   :  { %v5749_v29 = vsel %vm1135_vm2, %v1130_v15, %v5663_v21 }
 0xa7f   :  { %1145 = vrot.lane.b32.xlu1 %v5749_v29, %s5207_s23  ;;  %v1097_v41 = vpop.permute.xlu0 %1096 }
 0xa80   :  { %v1099_v31 = vmul.f32 %v4990_v52, %v1097_v41  ;;  %v5864_v41 = vld [vmem:[%s6808_s5 + $0x8] sm:$0xff] }
 0xa82   :  { %v5757_v32 = vsel %vm1104_vm3, %v1099_v31, %v5671_v24  ;;  %v5872_v31 = vld [vmem:[%s6806_s4 + $0x10] sm:$0xff] }
 0xa83   :  { %1139 = vrot.lane.b32.xlu0 %v5757_v32, %s5207_s23 }
 0xaf1   :  { %v1146_v33 = vpop.permute.xlu1 %1145 }
 0xaf2   :  { %1149 = vst.msk [vmem:[#allocation4 + $0x20] sm:$0xff] %vm72_vm1, %v1146_v33  ;;  %4658 = vmatmul.mubr.msk.f32.vlgmr.msra.gmra.mxu1 %vm72_vm1, %v1146_v33 }
 0xaf3   :  { %4672 = vmatpush3.msra.mxu1 %v5339_v14  ;;  %4679 = vmatprep.mubr.msk.f32.mxu1 %vm5204_vm0, %v5203_v3 }
 0xaf4   :  { %4673 = vmatprep.subr.mxu1 %v5203_v3 }
 0xaf5   :  { %v1140_v21 = vpop.permute.xlu0 %1139  ;;  %4674 = vmatpush3.msra.mxu1 %v5351_v16 }
 0xaf6   :  { %1143 = vst.msk [vmem:[#allocation3 + $0x18] sm:$0xff] %vm72_vm1, %v1140_v21  ;;  %4647 = vmatmul.mubr.msk.f32.vlgmr.msra.gmra.mxu0 %vm72_vm1, %v1140_v21  ;;  %4675 = vmatprep.subr.mxu1 %v5203_v3 }
 0xaf7   :  { %4661 = vmatpush3.msra.mxu0 %v5295_v5  ;;  %4676 = vmatpush3.msra.mxu1 %v5360_v17 }
 0xaf8   :  { %4662 = vmatprep.subr.mxu0 %v5203_v3  ;;  %4677 = vmatprep.subr.mxu1 %v5203_v3 }
 0xaf9   :  { %4663 = vmatpush3.msra.mxu0 %v5306_v7  ;;  %4678 = vmatpush3.msra.mxu1 %v5373_v19 }
 0xafa   :  { %4664 = vmatprep.subr.mxu0 %v5203_v3  ;;  %4668 = vmatprep.mubr.msk.f32.mxu0 %vm5204_vm0, %v5203_v3 }
 0xafb   :  { %4665 = vmatpush3.msra.mxu0 %v5315_v9  ;;  %4693 = vmatprep.subr.mxu1 %v5203_v3 }
 0xafc   :  { %4666 = vmatprep.subr.mxu0 %v5203_v3 }
 0xafd   :  { %4667 = vmatpush3.msra.mxu0 %v5328_v12 }
 0xafe   :  { %4682 = vmatprep.subr.mxu0 %v5203_v3 }
 0xbb2   :  { %v1293_v5 = vpop.f32.mrf.mxu1 }
 0xbb3   :  { %v1297_v7 = vadd.f32 %v1293_v5, %v5451_v53 }
 0xbb4   :  { %v4659_v14 = vpop.f32.mrf.mxu1 }
 0xbb5   :  { %4995 = vtanh.f32 %v1297_v7  ;;  %v4306_v62 = vmul.f32 -1.442695, %v1297_v7 }
 0xbb6   :  { %v1219_v16 = vpop.f32.mrf.mxu0 }
 0xbb7   :  { %v1223_v17 = vadd.f32 %v1219_v16, %v5453_v55 }
 0xbb8   :  { %v4648_v24 = vpop.f32.mrf.mxu0 }
 0xbb9   :  { %4997 = vtanh.f32 %v1223_v17  ;;  %v4305_v12 = vmul.f32 -1.442695, %v1223_v17 }
 0xbba   :  { %4999 = vpow2.f32 %v4306_v62 }
 0xbbb   :  { %5001 = vpow2.f32 %v4305_v12 }
 0xbc2   :  { %v4996_v34 = vpop.eup %4995 }
 0xbc3   :  { %1342 = vrot.lane.b32.xlu1 %v4996_v34, %s5206_s0 }
 0xbc6   :  { %v4998_v9 = vpop.eup %4997 }
 0xbc7   :  { %1311 = vrot.lane.b32.xlu0 %v4998_v9, %s5206_s0  ;;  %v5000_v2 = vpop.eup %4999 }
 0xbc8   :  { %v1336_v45 = vadd.f32 1.0, %v5000_v2  ;;  %v5002_v53 = vpop.eup %5001 }
 0xbc9   :  { %v1305_v35 = vadd.f32 1.0, %v5002_v53 }
 0xbca   :  { %5003 = vrcp.f32 %v1336_v45 }
 0xbcb   :  { %5005 = vrcp.f32 %v1305_v35 }
 0xbd7   :  { %v5004_v36 = vpop.eup %5003 }
 0xbd8   :  { %v5006_v37 = vpop.eup %5005  ;;  %v1340_v54 = vmul.f32 %v5004_v36, %v5797_v47 }
 0xc35   :  { %v1343_v55 = vpop.permute.xlu1 %1342 }
 0xc36   :  { %v1345_v58 = vmul.f32 %v5004_v36, %v1343_v55 }
 0xc38   :  { %1347 = vrot.lane.b32.xlu1 %v1345_v58, %s5207_s23 }
 0xc39   :  { %v1312_v51 = vpop.permute.xlu0 %1311 }
 0xc3a   :  { %v1314_v40 = vmul.f32 %v5006_v37, %v1312_v51 }
 0xc3c   :  { %1316 = vrot.lane.b32.xlu0 %v1314_v40, %s5207_s23  ;;  %1359 = vperm.xlu1 %4930, %v5716_v46  }
 0xc40   :  { %1328 = vperm.xlu1 %4930, %v5711_v20   ;;  %v1309_v20 = vmul.f32 %v5006_v37, %v5806_v8 }
 0xcaa   :  { %v1348_v61 = vpop.permute.xlu1 %1347 }
 0xcab   :  { %v5800_v52 = vadd.f32 %v1348_v61, %v1340_v54 }
 0xcad   :  { %5007 = vtanh.f32 %v5800_v52 }
 0xcae   :  { %v1317_v1 = vpop.permute.xlu0 %1316 }
 0xcaf   :  { %v5810_v46 = vadd.f32 %v1317_v1, %v1309_v20 }
 0xcb1   :  { %5009 = vtanh.f32 %v5810_v46 }
 0xcb7   :  { %v5815_v50 = vpop.permute.xlu1 %1359 }
 0xcb8   :  { %vm1361_vm4 = vcmp.eq.s32.totalorder %v5815_v50, 1 }
 0xcb9   :  { %v5906_v58 = vsel %vm1361_vm4, %v5800_v52, %v5797_v47 }
 0xcba   :  { %v5008_v63 = vpop.eup %5007 }
 0xcbb   :  { %1353 = vrot.lane.b32.xlu0 %v5008_v63, %s5206_s0  ;;  %v5818_v26 = vpop.permute.xlu1 %1328 }
 0xcbc   :  { %vm1330_vm5 = vcmp.eq.s32.totalorder %v5818_v26, 1 }
 0xcbd   :  { %v5915_v54 = vsel %vm1330_vm5, %v5810_v46, %v5806_v8 }
 0xcbe   :  { %v5010_v10 = vpop.eup %5009 }
 0xcbf   :  { %1322 = vrot.lane.b32.xlu0 %v5010_v10, %s5206_s0 }
 0xd2d   :  { %v1354_v22 = vpop.permute.xlu0 %1353 }
 0xd2e   :  { %v1356_v23 = vmul.f32 %v5004_v36, %v1354_v22 }
 0xd30   :  { %v5823_v11 = vsel %vm1361_vm4, %v1356_v23, %v5749_v29  ;;  %v5858_v29 = vld [vmem:[%s6806_s4 + $0x18] sm:$0xff] }
 0xd31   :  { %1371 = vrot.lane.b32.xlu1 %v5823_v11, %s5207_s23  ;;  %v1323_v18 = vpop.permute.xlu0 %1322 }
 0xd32   :  { %v1325_v59 = vmul.f32 %v5006_v37, %v1323_v18 }
 0xd34   :  { %v5831_v13 = vsel %vm1330_vm5, %v1325_v59, %v5757_v32  ;;  %v5882_v32 = vld [vmem:[%s6806_s4 + $0x8] sm:$0xff] }
 0xd35   :  { %1365 = vrot.lane.b32.xlu0 %v5831_v13, %s5207_s23 }
 0xda3   :  { %v1372_v39 = vpop.permute.xlu1 %1371 }
 0xda4   :  { %1375 = vst.msk [vmem:[#allocation4 + $0x18] sm:$0xff] %vm72_vm1, %v1372_v39  ;;  %4680 = vmatmul.mubr.msk.f32.vlgmr.msra.gmra.mxu1 %vm72_vm1, %v1372_v39 }
 0xda5   :  { %4694 = vmatpush3.msra.mxu1 %v5840_v4  ;;  %4701 = vmatprep.mubr.msk.f32.mxu1 %vm5204_vm0, %v5203_v3 }
 0xda6   :  { %4695 = vmatprep.subr.mxu1 %v5203_v3 }
 0xda7   :  { %v1366_v15 = vpop.permute.xlu0 %1365  ;;  %4696 = vmatpush3.msra.mxu1 %v5849_v57 }
 0xda8   :  { %1369 = vst.msk [vmem:[#allocation3 + $0x20] sm:$0xff] %vm72_vm1, %v1366_v15  ;;  %4669 = vmatmul.mubr.msk.f32.vlgmr.msra.gmra.mxu0 %vm72_vm1, %v1366_v15  ;;  %4697 = vmatprep.subr.mxu1 %v5203_v3 }
 0xda9   :  { %4683 = vmatpush3.msra.mxu0 %v5858_v29  ;;  %4698 = vmatpush3.msra.mxu1 %v5864_v41 }
 0xdaa   :  { %4684 = vmatprep.subr.mxu0 %v5203_v3  ;;  %4699 = vmatprep.subr.mxu1 %v5203_v3 }
 0xdab   :  { %4685 = vmatpush3.msra.mxu0 %v5872_v31  ;;  %4700 = vmatpush3.msra.mxu1 %v5373_v19  ;;  %v5890_v19 = vld [vmem:[%s6806_s4] sm:$0xff] }
 0xdac   :  { %4686 = vmatprep.subr.mxu0 %v5203_v3  ;;  %4690 = vmatprep.mubr.msk.f32.mxu0 %vm5204_vm0, %v5203_v3 }
 0xdad   :  { %4687 = vmatpush3.msra.mxu0 %v5882_v32  ;;  %4715 = vmatprep.subr.mxu1 %v5203_v3 }
 0xdae   :  { %4688 = vmatprep.subr.mxu0 %v5203_v3 }
 0xdaf   :  { %4689 = vmatpush3.msra.mxu0 %v5890_v19 }
 0xdb0   :  { %4704 = vmatprep.subr.mxu0 %v5203_v3 }
 0xe64   :  { %v1519_v33 = vpop.f32.mrf.mxu1 }
 0xe65   :  { %v1523_v21 = vadd.f32 %v1519_v33, %v5447_v48 }
 0xe66   :  { %v4681_v5 = vpop.f32.mrf.mxu1 }
 0xe67   :  { %5011 = vtanh.f32 %v1523_v21  ;;  %v4312_v34 = vmul.f32 -1.442695, %v1523_v21 }
 0xe68   :  { %v1445_v7 = vpop.f32.mrf.mxu0 }
 0xe69   :  { %v1449_v14 = vadd.f32 %v1445_v7, %v5458_v60 }
 0xe6a   :  { %v4670_v16 = vpop.f32.mrf.mxu0 }
 0xe6b   :  { %5013 = vtanh.f32 %v1449_v14  ;;  %v4311_v9 = vmul.f32 -1.442695, %v1449_v14 }
 0xe6c   :  { %5015 = vpow2.f32 %v4312_v34 }
 0xe6d   :  { %5017 = vpow2.f32 %v4311_v9 }
 0xe74   :  { %v5012_v17 = vpop.eup %5011 }
 0xe75   :  { %1568 = vrot.lane.b32.xlu1 %v5012_v17, %s5206_s0 }
 0xe78   :  { %v5014_v24 = vpop.eup %5013 }
 0xe79   :  { %1537 = vrot.lane.b32.xlu0 %v5014_v24, %s5206_s0  ;;  %v5016_v62 = vpop.eup %5015 }
 0xe7a   :  { %v1562_v12 = vadd.f32 1.0, %v5016_v62  ;;  %v5018_v48 = vpop.eup %5017 }
 0xe7b   :  { %v1531_v2 = vadd.f32 1.0, %v5018_v48  ;;  %v2074_v48 = vld [vmem:[%s6811_s6 + $0x38] sm:$0xff] }
 0xe7c   :  { %5019 = vrcp.f32 %v1562_v12 }
 0xe7d   :  { %5021 = vrcp.f32 %v1531_v2 }
 0xe89   :  { %v5020_v45 = vpop.eup %5019 }
 0xe8a   :  { %v5022_v35 = vpop.eup %5021  ;;  %v1566_v37 = vmul.f32 %v5020_v45, %v5906_v58 }
 0xee7   :  { %v1569_v60 = vpop.permute.xlu1 %1568 }
 0xee8   :  { %v1571_v53 = vmul.f32 %v5020_v45, %v1569_v60 }
 0xeea   :  { %1573 = vrot.lane.b32.xlu1 %v1571_v53, %s5207_s23 }
 0xeeb   :  { %v1538_v36 = vpop.permute.xlu0 %1537 }
 0xeec   :  { %v1540_v55 = vmul.f32 %v5022_v35, %v1538_v36 }
 0xeee   :  { %1542 = vrot.lane.b32.xlu0 %v1540_v55, %s5207_s23  ;;  %1585 = vperm.xlu1 %4930, %v5630_v49  }
 0xef2   :  { %1554 = vperm.xlu1 %4930, %v5625_v56   ;;  %v1535_v56 = vmul.f32 %v5022_v35, %v5915_v54 }
 0xf5c   :  { %v1574_v51 = vpop.permute.xlu1 %1573 }
 0xf5d   :  { %v5909_v40 = vadd.f32 %v1574_v51, %v1566_v37 }
 0xf5f   :  { %5023 = vtanh.f32 %v5909_v40 }
 0xf60   :  { %v1543_v49 = vpop.permute.xlu0 %1542 }
 0xf61   :  { %v5919_v61 = vadd.f32 %v1543_v49, %v1535_v56  ;;  %v2072_v56 = vld [vmem:[%s6811_s6 + $0x28] sm:$0xff]  ;;  %v2071_v49 = vld [vmem:[%s6811_s6 + $0x20] sm:$0xff] }
 0xf63   :  { %5025 = vtanh.f32 %v5919_v61 }
 0xf69   :  { %v5924_v20 = vpop.permute.xlu1 %1585 }
 0xf6a   :  { %vm1587_vm6 = vcmp.eq.s32.totalorder %v5924_v20, 1  ;;  %v2068_v20 = vld [vmem:[%s6811_s6 + $0x8] sm:$0xff] }
 0xf6b   :  { %v5980_v17 = vsel %vm1587_vm6, %v5909_v40, %v5906_v58  ;;  %v2073_v40 = vld [vmem:[%s6811_s6 + $0x30] sm:$0xff] }
 0xf6c   :  { %v5024_v47 = vpop.eup %5023 }
 0xf6d   :  { %1579 = vrot.lane.b32.xlu0 %v5024_v47, %s5206_s0  ;;  %v5927_v46 = vpop.permute.xlu1 %1554  ;;  %v2069_v47 = vld [vmem:[%s6811_s6 + $0x10] sm:$0xff] }
 0xf6e   :  { %vm1556_vm7 = vcmp.eq.s32.totalorder %v5927_v46, 1  ;;  %v2052_v46 = vld [vmem:[#allocation3 + $0x8] sm:$0xff] }
 0xf6f   :  { %v5989_v62 = vsel %vm1556_vm7, %v5919_v61, %v5915_v54  ;;  %v2070_v61 = vld [vmem:[%s6811_s6 + $0x18] sm:$0xff] }
 0xf70   :  { %v5026_v52 = vpop.eup %5025 }
 0xf71   :  { %1548 = vrot.lane.b32.xlu0 %v5026_v52, %s5206_s0 }
 0xfdf   :  { %v1580_v1 = vpop.permute.xlu0 %1579 }
 0xfe0   :  { %v1582_v8 = vmul.f32 %v5020_v45, %v1580_v1  ;;  %v2067_v1 = vld [vmem:[%s6811_s6] sm:$0xff] }
 0xfe2   :  { %v5932_v63 = vsel %vm1587_vm6, %v1582_v8, %v5823_v11  ;;  %v5194_v11 = vld [vmem:[%s6808_s5] sm:$0xff] }
 0xfe3   :  { %1597 = vrot.lane.b32.xlu1 %v5932_v63, %s5207_s23  ;;  %v1549_v10 = vpop.permute.xlu0 %1548  ;;  %v2051_v8 = vld [vmem:[#allocation3] sm:$0xff] }
 0xfe4   :  { %v1551_v50 = vmul.f32 %v5022_v35, %v1549_v10  ;;  %v2054_v10 = vld [vmem:[#allocation3 + $0x18] sm:$0xff] }
 0xfe6   :  { %v5940_v22 = vsel %vm1556_vm7, %v1551_v50, %v5831_v13  ;;  %v2055_v50 = vld [vmem:[#allocation3 + $0x20] sm:$0xff] }
 0xfe7   :  { %1591 = vrot.lane.b32.xlu0 %v5940_v22, %s5207_s23 }
0x1055   :  { %v1598_v23 = vpop.permute.xlu1 %1597 }
0x1056   :  { %1601 = vst.msk [vmem:[#allocation4 + $0x10] sm:$0xff] %vm72_vm1, %v1598_v23  ;;  %4702 = vmatmul.mubr.msk.f32.vlgmr.msra.gmra.mxu1 %vm72_vm1, %v1598_v23 }
0x1057   :  { %4716 = vmatpush3.msra.mxu1 %v5840_v4  ;;  %4723 = vmatprep.mubr.msk.f32.mxu1 %vm5204_vm0, %v5203_v3 }
0x1058   :  { %4717 = vmatprep.subr.mxu1 %v5203_v3 }
0x1059   :  { %v1592_v26 = vpop.permute.xlu0 %1591  ;;  %4718 = vmatpush3.msra.mxu1 %v5849_v57 }
0x105a   :  { %1595 = vst.msk [vmem:[#allocation3 + $0x28] sm:$0xff] %vm72_vm1, %v1592_v26  ;;  %4691 = vmatmul.mubr.msk.f32.vlgmr.msra.gmra.mxu0 %vm72_vm1, %v1592_v26  ;;  %4719 = vmatprep.subr.mxu1 %v5203_v3 }
0x105b   :  { %4720 = vmatpush3.msra.mxu1 %v5864_v41  ;;  %4705 = vmatpush3.msra.mxu0 %v5858_v29 }
0x105c   :  { %4721 = vmatprep.subr.mxu1 %v5203_v3  ;;  %4706 = vmatprep.subr.mxu0 %v5203_v3 }
0x105d   :  { %4722 = vmatpush3.msra.mxu1 %v5194_v11  ;;  %4707 = vmatpush3.msra.mxu0 %v5872_v31 }
0x105e   :  { %4708 = vmatprep.subr.mxu0 %v5203_v3  ;;  %4712 = vmatprep.mubr.msk.f32.mxu0 %vm5204_vm0, %v5203_v3 }
0x105f   :  { %4709 = vmatpush3.msra.mxu0 %v5882_v32  ;;  %2268 = vmatprep.subr.mxu1 %v2074_v48 }
0x1060   :  { %4710 = vmatprep.subr.mxu0 %v5203_v3 }
0x1061   :  { %4711 = vmatpush3.msra.mxu0 %v5890_v19 }
0x1116   :  { %v1745_v18 = vpop.f32.mrf.mxu1 }
0x1117   :  { %v1749_v59 = vadd.f32 %v1745_v18, %v5443_v43 }
0x1118   :  { %v4703_v13 = vpop.f32.mrf.mxu1 }
0x1119   :  { %5027 = vtanh.f32 %v1749_v59  ;;  %v4318_v41 = vmul.f32 -1.442695, %v1749_v59 }
0x111a   :  { %v1671_v39 = vpop.f32.mrf.mxu0 }
0x111b   :  { %v1675_v4 = vadd.f32 %v1671_v39, %v5462_v0 }
0x111c   :  { %v4692_v15 = vpop.f32.mrf.mxu0 }
0x111d   :  { %5029 = vtanh.f32 %v1675_v4  ;;  %v4317_v31 = vmul.f32 -1.442695, %v1675_v4 }
0x111e   :  { %5031 = vpow2.f32 %v4318_v41 }
0x111f   :  { %5033 = vpow2.f32 %v4317_v31 }
0x1126   :  { %v5028_v57 = vpop.eup %5027 }
0x1127   :  { %1794 = vrot.lane.b32.xlu1 %v5028_v57, %s5206_s0 }
0x112a   :  { %v5030_v29 = vpop.eup %5029 }
0x112b   :  { %1763 = vrot.lane.b32.xlu0 %v5030_v29, %s5206_s0  ;;  %v5032_v32 = vpop.eup %5031 }
0x112c   :  { %v1788_v19 = vadd.f32 1.0, %v5032_v32  ;;  %v5034_v43 = vpop.eup %5033 }
0x112d   :  { %v1757_v33 = vadd.f32 1.0, %v5034_v43 }
0x112e   :  { %5035 = vrcp.f32 %v1788_v19 }
0x112f   :  { %5037 = vrcp.f32 %v1757_v33 }
0x113b   :  { %v5036_v21 = vpop.eup %5035 }
0x113c   :  { %v5038_v7 = vpop.eup %5037  ;;  %v1792_v24 = vmul.f32 %v5036_v21, %v5980_v17 }
0x1199   :  { %v1795_v0 = vpop.permute.xlu1 %1794 }
0x119a   :  { %v1797_v5 = vmul.f32 %v5036_v21, %v1795_v0 }
0x119c   :  { %1799 = vrot.lane.b32.xlu1 %v1797_v5, %s5207_s23 }
0x119d   :  { %v1764_v14 = vpop.permute.xlu0 %1763 }
0x119e   :  { %v1766_v16 = vmul.f32 %v5038_v7, %v1764_v14 }
0x11a0   :  { %1768 = vrot.lane.b32.xlu0 %v1766_v16, %s5207_s23  ;;  %1811 = vperm.xlu1 %4930, %v5546_v44  }
0x11a4   :  { %1780 = vperm.xlu1 %4930, %v5542_v42   ;;  %v1761_v42 = vmul.f32 %v5038_v7, %v5989_v62 }
0x120e   :  { %v1800_v34 = vpop.permute.xlu1 %1799 }
0x120f   :  { %v5983_v9 = vadd.f32 %v1800_v34, %v1792_v24 }
0x1211   :  { %5039 = vtanh.f32 %v5983_v9 }
0x1212   :  { %v1769_v44 = vpop.permute.xlu0 %1768 }
0x1213   :  { %v5993_v12 = vadd.f32 %v1769_v44, %v1761_v42 }
0x1215   :  { %5041 = vtanh.f32 %v5993_v12 }
0x121b   :  { %v6001_v60 = vpop.permute.xlu1 %1811 }
0x121c   :  { %vm1813_vm8 = vcmp.eq.s32.totalorder %v6001_v60, 1  ;;  %v2078_v60 = vld [vmem:[%s6812_s7 + $0x18] sm:$0xff] }
0x121d   :  { %v1815_v24 = vsel %vm1813_vm8, %v5983_v9, %v5980_v17  ;;  %v2082_v17 = vld [vmem:[%s6812_s7 + $0x38] sm:$0xff]  ;;  %v2081_v9 = vld [vmem:[%s6812_s7 + $0x30] sm:$0xff] }
0x121e   :  { %v5040_v2 = vpop.eup %5039  ;;  %2131 = vmatprep.subr.mxu0 %v2082_v17 }
0x121f   :  { %1805 = vrot.lane.b32.xlu0 %v5040_v2, %s5206_s0  ;;  %v6004_v36 = vpop.permute.xlu1 %1780 }
0x1220   :  { %vm1782_vm9 = vcmp.eq.s32.totalorder %v6004_v36, 1  ;;  %v2077_v36 = vld [vmem:[%s6812_s7 + $0x10] sm:$0xff] }
0x1221   :  { %v1784_v48 = vsel %vm1782_vm9, %v5993_v12, %v5989_v62  ;;  %v2080_v62 = vld [vmem:[%s6812_s7 + $0x28] sm:$0xff]  ;;  %v2079_v12 = vld [vmem:[%s6812_s7 + $0x20] sm:$0xff] }
0x1222   :  { %v5042_v45 = vpop.eup %5041 }
0x1223   :  { %1774 = vrot.lane.b32.xlu0 %v5042_v45, %s5206_s0 }
0x1291   :  { %v1806_v53 = vpop.permute.xlu0 %1805 }
0x1292   :  { %v1808_v35 = vmul.f32 %v5036_v21, %v1806_v53  ;;  %v4321_v21 = vld [vmem:[%s6810_s1 + $0x38] sm:$0xff] }
0x1293   :  { %vm1977_vm11 = vcmp.gt.f32.partialorder %v4321_v21, 0.0 }
0x1294   :  { %v6009_v55 = vsel %vm1813_vm8, %v1808_v35, %v5932_v63  ;;  %v2053_v63 = vld [vmem:[#allocation3 + $0x10] sm:$0xff]  ;;  %v6080_v16 = vsel %vm1977_vm11, 1, %v5205_v25 }
0x1295   :  { %1823 = vrot.lane.b32.xlu1 %v6009_v55, %s5207_s23  ;;  %v1775_v58 = vpop.permute.xlu0 %1774 }
0x1296   :  { %v1777_v37 = vmul.f32 %v5038_v7, %v1775_v58 }
0x1298   :  { %v6017_v51 = vsel %vm1782_vm9, %v1777_v37, %v5940_v22  ;;  %v2056_v22 = vld [vmem:[#allocation3 + $0x28] sm:$0xff] }
0x1299   :  { %1817 = vrot.lane.b32.xlu0 %v6017_v51, %s5207_s23  ;;  %v2076_v37 = vld [vmem:[%s6812_s7 + $0x8] sm:$0xff] }
0x1307   :  { %v1824_v54 = vpop.permute.xlu1 %1823 }
0x1308   :  { %1827 = vst.msk [vmem:[#allocation4 + $0x8] sm:$0xff] %vm72_vm1, %v1824_v54  ;;  %4724 = vmatmul.mubr.msk.f32.vlgmr.msra.gmra.mxu1 %vm72_vm1, %v1824_v54 }
0x1309   :  { %2269 = vmatpush1.msra.mxu1 %v2073_v40  ;;  %2308 = vmatprep.mubr.f32.mxu1 %v5203_v3  ;;  %v2075_v40 = vld [vmem:[%s6812_s7] sm:$0xff] }
0x130a   :  { %2270 = vmatprep.subr.mxu1 %v2072_v56 }
0x130b   :  { %2271 = vmatpush1.msra.mxu1 %v2071_v49  ;;  %v1818_v52 = vpop.permute.xlu0 %1817 }
0x130c   :  { %2272 = vmatprep.subr.mxu1 %v2070_v61  ;;  %1821 = vst.msk [vmem:[#allocation3 + $0x30] sm:$0xff] %vm72_vm1, %v1818_v52  ;;  %4713 = vmatmul.mubr.msk.f32.vlgmr.msra.gmra.mxu0 %vm72_vm1, %v1818_v52  ;;  %v6121_v61 = vld [vmem:[%s6813_s10 + $0x18] sm:$0xff] }
0x130d   :  { %2273 = vmatpush1.msra.mxu1 %v2069_v47  ;;  %2171 = vmatprep.mubr.f32.mxu0 %v5203_v3 }
0x130e   :  { %2274 = vmatprep.subr.mxu1 %v2068_v20  ;;  %2132 = vmatpush1.msra.mxu0 %v2081_v9 }
0x130f   :  { %2275 = vmatpush1.msra.mxu1 %v2067_v1  ;;  %2133 = vmatprep.subr.mxu0 %v2080_v62 }
0x1310   :  { %4332 = vmatmul.mubr.msk.f32.vlgmr.msra.gmra.mxu1 %vm72_vm1, %v2051_v8  ;;  %4737 = vmatprep.subr.mxu1 %v5203_v3 }
0x1311   :  { %2314 = vmatprep.mubr.f32.mxu1 %v5203_v3  ;;  %2134 = vmatpush1.msra.mxu0 %v2079_v12 }
0x1312   :  { %2135 = vmatprep.subr.mxu0 %v2078_v60  ;;  %4738 = vmatpush3.msra.mxu1 %v6121_v61 }
0x1313   :  { %v2057_v23 = vld [vmem:[#allocation3 + $0x30] sm:$0xff]  ;;  %2136 = vmatpush1.msra.mxu0 %v2077_v36  ;;  %4739 = vmatprep.subr.mxu1 %v5203_v3 }
0x1314   :  { %4333 = vmatmul.mubr.msk.f32.gmra.mxu1 %vm72_vm1, %v2052_v46  ;;  %2137 = vmatprep.subr.mxu0 %v2076_v37  ;;  %v6131_v46 = vld [vmem:[%s6813_s10 + $0x10] sm:$0xff] }
0x1315   :  { %2320 = vmatprep.mubr.f32.mxu1 %v5203_v3  ;;  %2138 = vmatpush1.msra.mxu0 %v2075_v40 }
0x1316   :  { %4726 = vmatprep.subr.mxu0 %v5203_v3  ;;  %4740 = vmatpush3.msra.mxu1 %v6131_v46 }
0x1317   :  { %4741 = vmatprep.subr.mxu1 %v5203_v3 }
0x1318   :  { %4334 = vmatmul.mubr.msk.f32.gmra.mxu1 %vm72_vm1, %v2053_v63 }
0x1319   :  { %2326 = vmatprep.mubr.f32.mxu1 %v5203_v3 }
0x131c   :  { %4335 = vmatmul.mubr.msk.f32.gmra.mxu1 %vm72_vm1, %v2054_v10 }
0x131d   :  { %2332 = vmatprep.mubr.f32.mxu1 %v5203_v3 }
0x1320   :  { %4336 = vmatmul.mubr.msk.f32.gmra.mxu1 %vm72_vm1, %v2055_v50  ;;  %v6155_v50 = vld [vmem:[%s6814_s9 + $0x18] sm:$0xff] }
0x1321   :  { %2338 = vmatprep.mubr.f32.mxu1 %v5203_v3 }
0x1324   :  { %4337 = vmatmul.mubr.msk.f32.gmra.mxu1 %vm72_vm1, %v2056_v22 }
0x1325   :  { %2344 = vmatprep.mubr.f32.mxu1 %v5203_v3 }
0x1328   :  { %4338 = vmatmul.mubr.msk.f32.gmra.mxu1 %vm72_vm1, %v2057_v23  ;;  %v6161_v23 = vld [vmem:[%s6814_s9 + $0x10] sm:$0xff] }
0x1329   :  { %2350 = vmatprep.mubr.f32.mxu1 %v5203_v3 }
0x13c8   :  { %v1971_v26 = vpop.f32.mrf.mxu1 }
0x13c9   :  { %v1975_v11 = vadd.f32 %v1971_v26, %v5439_v38  ;;  %v2060_v26 = vld [vmem:[#allocation4 + $0x8] sm:$0xff] }
0x13ca   :  { %v4725_v18 = vpop.f32.mrf.mxu1 }
0x13cb   :  { %5043 = vtanh.f32 %v1975_v11  ;;  %v4323_v57 = vmul.f32 -1.442695, %v1975_v11  ;;  %v6170_v18 = vld [vmem:[%s6814_s9 + $0x8] sm:$0xff] }
0x13cc   :  { %v1897_v59 = vpop.f32.mrf.mxu0 }
0x13cd   :  { %v1901_v13 = vadd.f32 %v1897_v59, %v5466_v6  ;;  %v1978_v6 = vld [vmem:[%s6810_s1] sm:$0xff] }
0x13ce   :  { %v4714_v39 = vpop.f32.mrf.mxu0  ;;  %vm1979_vm10 = vcmp.gt.f32.partialorder %v1978_v6, 0.0  ;;  %v6180_v59 = vld [vmem:[%s6814_s9] sm:$0xff] }
0x13cf   :  { %5045 = vtanh.f32 %v1901_v13  ;;  %v4322_v29 = vmul.f32 -1.442695, %v1901_v13  ;;  %v6075_v7 = vsel %vm1979_vm10, 1, %v5205_v25  ;;  %v2061_v13 = vld [vmem:[#allocation4 + $0x10] sm:$0xff]  ;;  %v2062_v39 = vld [vmem:[#allocation4 + $0x18] sm:$0xff] }
0x13d0   :  { %5047 = vpow2.f32 %v4323_v57  ;;  %v2065_v57 = vld [vmem:[#allocation4 + $0x30] sm:$0xff] }
0x13d1   :  { %5049 = vpow2.f32 %v4322_v29  ;;  %v2066_v29 = vld [vmem:[#allocation4 + $0x38] sm:$0xff] }
0x13d8   :  { %v5044_v4 = vpop.eup %5043 }
0x13d9   :  { %2019 = vrot.lane.b32.xlu1 %v5044_v4, %s5206_s0  ;;  %v2063_v4 = vld [vmem:[#allocation4 + $0x20] sm:$0xff] }
0x13dc   :  { %v5046_v15 = vpop.eup %5045 }
0x13dd   :  { %1989 = vrot.lane.b32.xlu0 %v5046_v15, %s5206_s0  ;;  %v5048_v41 = vpop.eup %5047  ;;  %v2064_v15 = vld [vmem:[#allocation4 + $0x28] sm:$0xff] }
0x13de   :  { %v2013_v31 = vadd.f32 1.0, %v5048_v41  ;;  %v5050_v38 = vpop.eup %5049  ;;  %v2310_v41 = vpop.f32.mrf.mxu1 }
0x13df   :  { %v1983_v32 = vadd.f32 1.0, %v5050_v38 }
0x13e0   :  { %5051 = vrcp.f32 %v2013_v31  ;;  %v2312_v31 = vpop.f32.mrf.mxu1 }
0x13e1   :  { %5053 = vrcp.f32 %v1983_v32 }
0x13e2   :  { %v2316_v38 = vpop.f32.mrf.mxu1 }
0x13e4   :  { %v2318_v32 = vpop.f32.mrf.mxu1 }
0x13e6   :  { %v2322_v6 = vpop.f32.mrf.mxu1 }
0x13ed   :  { %v5052_v19 = vpop.eup %5051 }
0x13ee   :  { %v5054_v0 = vpop.eup %5053  ;;  %v2017_v34 = vmul.f32 %v5052_v19, %v1815_v24 }
0x13ef   :  { %v1987_v2 = vmul.f32 %v5054_v0, %v1784_v48 }
0x144b   :  { %v2020_v43 = vpop.permute.xlu1 %2019 }
0x144c   :  { %v2022_v33 = vmul.f32 %v5052_v19, %v2020_v43 }
0x144e   :  { %2024 = vrot.lane.b32.xlu1 %v2022_v33, %s5207_s23 }
0x144f   :  { %v1990_v5 = vpop.permute.xlu0 %1989 }
0x1450   :  { %v1992_v14 = vmul.f32 %v5054_v0, %v1990_v5 }
0x1452   :  { %1994 = vrot.lane.b32.xlu0 %v1992_v14, %s5207_s23  ;;  %2036 = vperm.xlu1 %4930, %v6075_v7  }
0x1456   :  { %2006 = vperm.xlu1 %4930, %v6080_v16  }
0x14c0   :  { %v2025_v42 = vpop.permute.xlu1 %2024 }
0x14c1   :  { %v2027_v44 = vadd.f32 %v2025_v42, %v2017_v34  ;;  %v2357_v42 = vld [vmem:[%s6815_s8] sm:$0x3] }
0x14c2   :  { %v2362_v17 = vrot.slane %v2357_v42, %v64_v28 }
0x14c3   :  { %5055 = vtanh.f32 %v2027_v44  ;;  %v2366_v44 = vrot.slane %v2357_v42, %v68_v30 }
0x14c4   :  { %v1995_v45 = vpop.permute.xlu0 %1994 }
0x14c5   :  { %v1997_v53 = vadd.f32 %v1995_v45, %v1987_v2 }
0x14c7   :  { %5057 = vtanh.f32 %v1997_v53 }
0x14cd   :  { %v2037_v54 = vpop.permute.xlu1 %2036 }
0x14ce   :  { %vm2038_vm12 = vcmp.eq.s32.totalorder %v2037_v54, 1 }
0x14d0   :  { %v5056_v35 = vpop.eup %5055 }
0x14d1   :  { %2030 = vrot.lane.b32.xlu0 %v5056_v35, %s5206_s0  ;;  %v2007_v47 = vpop.permute.xlu1 %2006 }
0x14d2   :  { %vm2008_vm13 = vcmp.eq.s32.totalorder %v2007_v47, 1 }
0x14d4   :  { %v5058_v58 = vpop.eup %5057 }
0x14d5   :  { %2000 = vrot.lane.b32.xlu0 %v5058_v58, %s5206_s0 }
0x1543   :  { %v2031_v56 = vpop.permute.xlu0 %2030 }
0x1544   :  { %v2033_v49 = vmul.f32 %v5052_v19, %v2031_v56  ;;  %v2324_v19 = vpop.f32.mrf.mxu1 }
0x1546   :  { %v2039_v52 = vsel %vm2038_vm12, %v2033_v49, %v6009_v55  ;;  %v6139_v55 = vld [vmem:[%s6813_s10 + $0x8] sm:$0xff]  ;;  %v2328_v43 = vpop.f32.mrf.mxu1 }
0x1547   :  { %2047 = vrot.lane.b32.xlu1 %v2039_v52, %s5207_s23  ;;  %v2001_v20 = vpop.permute.xlu0 %2000  ;;  %4742 = vmatpush3.msra.mxu1 %v6139_v55 }
0x1548   :  { %v2003_v1 = vmul.f32 %v5054_v0, %v2001_v20  ;;  %4743 = vmatprep.subr.mxu1 %v5203_v3  ;;  %v2330_v33 = vpop.f32.mrf.mxu1 }
0x154a   :  { %v2009_v8 = vsel %vm2008_vm13, %v2003_v1, %v6017_v51  ;;  %v6146_v51 = vld [vmem:[%s6813_s10] sm:$0xff]  ;;  %v2334_v21 = vpop.f32.mrf.mxu1 }
0x154b   :  { %2041 = vrot.lane.b32.xlu0 %v2009_v8, %s5207_s23  ;;  %4744 = vmatpush3.msra.mxu1 %v6146_v51 }
0x154c   :  { %4759 = vmatprep.subr.mxu1 %v5203_v3  ;;  %v2336_v0 = vpop.f32.mrf.mxu1 }
0x154e   :  { %v2340_v5 = vpop.f32.mrf.mxu1 }
0x1550   :  { %v2342_v14 = vpop.f32.mrf.mxu1 }
0x1552   :  { %v2346_v24 = vpop.f32.mrf.mxu1 }
0x1554   :  { %v2348_v48 = vpop.f32.mrf.mxu1 }
0x15b9   :  { %v2048_v63 = vpop.permute.xlu1 %2047 }
0x15ba   :  { %2050 = vst.msk [vmem:[#allocation4] sm:$0xff] %vm72_vm1, %v2048_v63 }
0x15bd   :  { %v2042_v10 = vpop.permute.xlu0 %2041 }
0x15be   :  { %2045 = vst.msk [vmem:[#allocation3 + $0x38] sm:$0xff] %vm72_vm1, %v2042_v10 }
0x15c1   :  { %v2059_v22 = vld [vmem:[#allocation4] sm:$0xff] }
0x15c2   :  { %4324 = vmatmul.mubr.msk.f32.vlgmr.msra.gmra.mxu0 %vm72_vm1, %v2059_v22 }
0x15c3   :  { %4727 = vmatpush3.msra.mxu0 %v6155_v50  ;;  %2177 = vmatprep.mubr.f32.mxu0 %v5203_v3 }
0x15c4   :  { %4728 = vmatprep.subr.mxu0 %v5203_v3 }
0x15c5   :  { %v2058_v11 = vld [vmem:[#allocation3 + $0x38] sm:$0xff]  ;;  %4729 = vmatpush3.msra.mxu0 %v6161_v23 }
0x15c6   :  { %4325 = vmatmul.mubr.msk.f32.gmra.mxu0 %vm72_vm1, %v2060_v26  ;;  %4339 = vmatmul.mubr.msk.f32.gmra.mxu1 %vm72_vm1, %v2058_v11 }
0x15c7   :  { %2183 = vmatprep.mubr.f32.mxu0 %v5203_v3  ;;  %4730 = vmatprep.subr.mxu0 %v5203_v3 }
0x15c8   :  { %4731 = vmatpush3.msra.mxu0 %v6170_v18  ;;  %4745 = vmatprep.mubr.msk.f32.mxu1 %vm5204_vm0, %v5203_v3 }
0x15c9   :  { %4732 = vmatprep.subr.mxu0 %v5203_v3 }
0x15ca   :  { %4326 = vmatmul.mubr.msk.f32.gmra.mxu0 %vm72_vm1, %v2061_v13  ;;  %4746 = vmatmul.mubr.f32.vlgmr.msra.gmra.mxu1 %v5203_v3 }
0x15cb   :  { %2189 = vmatprep.mubr.f32.mxu0 %v5203_v3  ;;  %4733 = vmatpush3.msra.mxu0 %v6180_v59 }
0x15cc   :  { %4748 = vmatprep.subr.mxu0 %v5203_v3  ;;  %4760 = vmatpush3.msra.mxu1 %v6121_v61 }
0x15cd   :  { %4761 = vmatprep.subr.mxu1 %v5203_v3  ;;  %4767 = vmatprep.mubr.msk.f32.mxu1 %vm5204_vm0, %v5203_v3 }
0x15ce   :  { %4327 = vmatmul.mubr.msk.f32.gmra.mxu0 %vm72_vm1, %v2062_v39  ;;  %4762 = vmatpush3.msra.mxu1 %v6131_v46 }
0x15cf   :  { %2195 = vmatprep.mubr.f32.mxu0 %v5203_v3  ;;  %4763 = vmatprep.subr.mxu1 %v5203_v3 }
0x15d0   :  { %4764 = vmatpush3.msra.mxu1 %v6139_v55 }
0x15d1   :  { %4765 = vmatprep.subr.mxu1 %v5203_v3 }
0x15d2   :  { %4328 = vmatmul.mubr.msk.f32.gmra.mxu0 %vm72_vm1, %v2063_v4  ;;  %4766 = vmatpush3.msra.mxu1 %v6146_v51 }
0x15d3   :  { %2201 = vmatprep.mubr.f32.mxu0 %v5203_v3  ;;  %4781 = vmatprep.subr.mxu1 %v5203_v3 }
0x15d6   :  { %4329 = vmatmul.mubr.msk.f32.gmra.mxu0 %vm72_vm1, %v2064_v15 }
0x15d7   :  { %2207 = vmatprep.mubr.f32.mxu0 %v5203_v3 }
0x15da   :  { %4330 = vmatmul.mubr.msk.f32.gmra.mxu0 %vm72_vm1, %v2065_v57 }
0x15db   :  { %2213 = vmatprep.mubr.f32.mxu0 %v5203_v3 }
0x15de   :  { %4331 = vmatmul.mubr.msk.f32.gmra.mxu0 %vm72_vm1, %v2066_v29 }
0x15df   :  { %4734 = vmatprep.mubr.msk.f32.mxu0 %vm5204_vm0, %v5203_v3 }
0x15e2   :  { %4735 = vmatmul.mubr.f32.vlgmr.msra.gmra.mxu0 %v5203_v3 }
0x15e3   :  { %4749 = vmatpush3.msra.mxu0 %v6155_v50  ;;  %4756 = vmatprep.mubr.msk.f32.mxu0 %vm5204_vm0, %v5203_v3 }
0x15e4   :  { %4750 = vmatprep.subr.mxu0 %v5203_v3 }
0x15e5   :  { %4751 = vmatpush3.msra.mxu0 %v6161_v23 }
0x15e6   :  { %4752 = vmatprep.subr.mxu0 %v5203_v3 }
0x15e7   :  { %4753 = vmatpush3.msra.mxu0 %v6170_v18 }
0x15e8   :  { %4754 = vmatprep.subr.mxu0 %v5203_v3 }
0x15e9   :  { %4755 = vmatpush3.msra.mxu0 %v6180_v59 }
0x15ea   :  { %4770 = vmatprep.subr.mxu0 %v5203_v3 }
0x1682   :  { %v2173_v34 = vpop.f32.mrf.mxu0 }
0x1684   :  { %v2175_v2 = vpop.f32.mrf.mxu0 }
0x1685   :  { %v2313_v45 = vadd.f32 %v2312_v31, %v2175_v2 }
0x1686   :  { %v2179_v53 = vpop.f32.mrf.mxu0  ;;  %v2352_v35 = vpop.f32.mrf.mxu1 }
0x1687   :  { %v2317_v58 = vadd.f32 %v2316_v38, %v2179_v53  ;;  %v6229_v9 = vadd.f32 %v2366_v44, %v2313_v45 }
0x1688   :  { %v2181_v62 = vpop.f32.mrf.mxu0  ;;  %v2354_v12 = vpop.f32.mrf.mxu1 }
0x1689   :  { %v2319_v60 = vadd.f32 %v2318_v32, %v2181_v62  ;;  %v6231_v36 = vadd.f32 %v2362_v17, %v2317_v58 }
0x168a   :  { %v2185_v37 = vpop.f32.mrf.mxu0  ;;  %v2550_v40 = vpop.f32.mrf.mxu1 }
0x168b   :  { %v2323_v54 = vadd.f32 %v2322_v6, %v2185_v37  ;;  %v6233_v30 = vadd.f32 %v2366_v44, %v2319_v60 }
0x168c   :  { %v2187_v56 = vpop.f32.mrf.mxu0  ;;  %v4747_v49 = vpop.f32.mrf.mxu1 }
0x168d   :  { %v2325_v47 = vadd.f32 %v2324_v19, %v2187_v56  ;;  %v6235_v52 = vadd.f32 %v2362_v17, %v2323_v54 }
0x168e   :  { %v2191_v20 = vpop.f32.mrf.mxu0 }
0x168f   :  { %v2329_v27 = vadd.f32 %v2328_v43, %v2191_v20  ;;  %v6237_v28 = vadd.f32 %v2366_v44, %v2325_v47 }
0x1690   :  { %v2193_v1 = vpop.f32.mrf.mxu0 }
0x1691   :  { %v2331_v8 = vadd.f32 %v2330_v33, %v2193_v1  ;;  %v6239_v63 = vadd.f32 %v2362_v17, %v2329_v27  ;;  %v2311_v33 = vadd.f32 %v2310_v41, %v2173_v34 }
0x1692   :  { %v2197_v10 = vpop.f32.mrf.mxu0 }
0x1693   :  { %v2335_v22 = vadd.f32 %v2334_v21, %v2197_v10  ;;  %v6241_v26 = vadd.f32 %v2366_v44, %v2331_v8  ;;  %v2369_v58 = vadd.f32 %v2362_v17, %v2311_v33 }
0x1694   :  { %v2199_v11 = vpop.f32.mrf.mxu0 }
0x1695   :  { %v2337_v13 = vadd.f32 %v2336_v0, %v2199_v11  ;;  %v6243_v39 = vadd.f32 %v2362_v17, %v2335_v22 }
0x1696   :  { %v2203_v4 = vpop.f32.mrf.mxu0 }
0x1697   :  { %v2341_v15 = vadd.f32 %v2340_v5, %v2203_v4  ;;  %v6245_v57 = vadd.f32 %v2366_v44, %v2337_v13 }
0x1698   :  { %v2205_v29 = vpop.f32.mrf.mxu0 }
0x1699   :  { %v2343_v31 = vadd.f32 %v2342_v14, %v2205_v29  ;;  %v6247_v38 = vadd.f32 %v2362_v17, %v2341_v15 }
0x169a   :  { %v2209_v32 = vpop.f32.mrf.mxu0 }
0x169b   :  { %v2347_v6 = vadd.f32 %v2346_v24, %v2209_v32  ;;  %v6249_v19 = vadd.f32 %v2366_v44, %v2343_v31 }
0x169c   :  { %v2211_v43 = vpop.f32.mrf.mxu0 }
0x169d   :  { %v2349_v21 = vadd.f32 %v2348_v48, %v2211_v43  ;;  %v6251_v42 = vadd.f32 %v2362_v17, %v2347_v6 }
0x169e   :  { %v2215_v0 = vpop.f32.mrf.mxu0 }
0x169f   :  { %v2353_v2 = vadd.f32 %v2352_v35, %v2215_v0  ;;  %v6253_v45 = vadd.f32 %v2366_v44, %v2349_v21 }
0x16a0   :  { %v2217_v5 = vpop.f32.mrf.mxu0 }
0x16a1   :  { %v2355_v53 = vadd.f32 %v2354_v12, %v2217_v5  ;;  %v6255_v62 = vadd.f32 %v2362_v17, %v2353_v2 }
0x16a2   :  { %v2477_v14 = vpop.f32.mrf.mxu0 }
0x16a3   :  { %v2481_v60 = vadd.f32 %v2477_v14, %v2369_v58  ;;  %v2384_v37 = vadd.f32 %v2366_v44, %v2355_v53 }
0x16a4   :  { %v4736_v24 = vpop.f32.mrf.mxu0 }
0x16a5   :  { %5059 = vtanh.f32 %v2481_v60  ;;  %v2554_v54 = vadd.f32 %v2550_v40, %v2384_v37  ;;  %v4341_v48 = vmul.f32 -1.442695, %v2481_v60 }
0x16a7   :  { %5061 = vtanh.f32 %v2554_v54  ;;  %v4342_v35 = vmul.f32 -1.442695, %v2554_v54 }
0x16a8   :  { %5063 = vpow2.f32 %v4341_v48 }
0x16a9   :  { %5065 = vpow2.f32 %v4342_v35 }
0x16b2   :  { %v5060_v41 = vpop.eup %5059 }
0x16b3   :  { %2568 = vrot.lane.b32.xlu1 %v5060_v41, %s5206_s0 }
0x16b4   :  { %v5062_v34 = vpop.eup %5061 }
0x16b5   :  { %2599 = vrot.lane.b32.xlu0 %v5062_v34, %s5206_s0  ;;  %v5064_v12 = vpop.eup %5063 }
0x16b6   :  { %v5066_v17 = vpop.eup %5065  ;;  %v2562_v56 = vadd.f32 1.0, %v5064_v12 }
0x16b7   :  { %v2593_v49 = vadd.f32 1.0, %v5066_v17 }
0x16b8   :  { %5067 = vrcp.f32 %v2562_v56 }
0x16b9   :  { %5069 = vrcp.f32 %v2593_v49 }
0x16c5   :  { %v5068_v44 = vpop.eup %5067 }
0x16c6   :  { %v5070_v20 = vpop.eup %5069  ;;  %v2566_v8 = vmul.f32 0.0, %v5068_v44 }
0x16c7   :  { %v2597_v11 = vmul.f32 0.0, %v5070_v20 }
0x1725   :  { %v2569_v47 = vpop.permute.xlu1 %2568 }
0x1726   :  { %v2571_v40 = vmul.f32 %v5068_v44, %v2569_v47 }
0x1727   :  { %v2600_v27 = vpop.permute.xlu0 %2599 }
0x1728   :  { %2573 = vrot.lane.b32.xlu1 %v2571_v40, %s5207_s23  ;;  %v2602_v1 = vmul.f32 %v5070_v20, %v2600_v27 }
0x172a   :  { %2604 = vrot.lane.b32.xlu0 %v2602_v1, %s5207_s23 }
0x172c   :  { %2585 = vperm.xlu1 %4930, %v6075_v7  }
0x172e   :  { %2616 = vperm.xlu0 %4929, %v6080_v16  }
0x179a   :  { %v2574_v10 = vpop.permute.xlu1 %2573 }
0x179b   :  { %v6263_v22 = vadd.f32 %v2574_v10, %v2566_v8 }
0x179c   :  { %v2605_v13 = vpop.permute.xlu0 %2604 }
0x179d   :  { %5071 = vtanh.f32 %v6263_v22  ;;  %v6266_v4 = vadd.f32 %v2605_v13, %v2597_v11 }
0x179f   :  { %5073 = vtanh.f32 %v6266_v4 }
0x17a7   :  { %v6271_v7 = vpop.permute.xlu1 %2585 }
0x17a8   :  { %vm2587_vm14 = vcmp.eq.s32.totalorder %v6271_v7, 1 }
0x17a9   :  { %v6273_v16 = vpop.permute.xlu0 %2616  ;;  %v6328_v8 = vsel %vm2587_vm14, %v6263_v22, 0.0 }
0x17aa   :  { %v5072_v15 = vpop.eup %5071  ;;  %vm2618_vm15 = vcmp.eq.s32.totalorder %v6273_v16, 1  ;;  %v4379_v16 = vld [vmem:[%s6817_s12] ss:$0 sm:$0xff] }
0x17ab   :  { %2579 = vrot.lane.b32.xlu1 %v5072_v15, %s5206_s0  ;;  %v6334_v13 = vsel %vm2618_vm15, %v6266_v4, 0.0 }
0x17ac   :  { %v5074_v29 = vpop.eup %5073 }
0x17ad   :  { %2610 = vrot.lane.b32.xlu0 %v5074_v29, %s5206_s0 }
0x181d   :  { %v2580_v31 = vpop.permute.xlu1 %2579 }
0x181e   :  { %v2582_v32 = vmul.f32 %v5068_v44, %v2580_v31  ;;  %v4346_v44 = vld [vmem:[%s6810_s1 + $0x30] sm:$0xff] }
0x181f   :  { %v2611_v6 = vpop.permute.xlu0 %2610  ;;  %vm2780_vm3 = vcmp.gt.f32.partialorder %v4346_v44, 0.0 }
0x1820   :  { %v6278_v43 = vsel %vm2587_vm14, %v2582_v32, 0.0  ;;  %v2613_v33 = vmul.f32 %v5070_v20, %v2611_v6  ;;  %v2836_v1 = vsel %vm2780_vm3, 1, %v5205_v25 }
0x1821   :  { %2624 = vrot.lane.b32.xlu1 %v6278_v43, %s5207_s23 }
0x1822   :  { %v6285_v21 = vsel %vm2618_vm15, %v2613_v33, 0.0 }
0x1823   :  { %2702 = vrot.lane.b32.xlu0 %v6285_v21, %s5207_s23 }
0x1893   :  { %v2625_v0 = vpop.permute.xlu1 %2624 }
0x1894   :  { %4757 = vmatmul.mubr.msk.f32.vlgmr.msra.gmra.mxu0 %vm72_vm1, %v2625_v0 }
0x1895   :  { %4771 = vmatpush3.msra.mxu0 %v6155_v50  ;;  %4778 = vmatprep.mubr.msk.f32.mxu0 %vm5204_vm0, %v5203_v3  ;;  %v2703_v2 = vpop.permute.xlu0 %2702 }
0x1896   :  { %4772 = vmatprep.subr.mxu0 %v5203_v3  ;;  %4768 = vmatmul.mubr.msk.f32.vlgmr.msra.gmra.mxu1 %vm72_vm1, %v2703_v2 }
0x1897   :  { %4773 = vmatpush3.msra.mxu0 %v6161_v23  ;;  %4782 = vmatpush3.msra.mxu1 %v6121_v61 }
0x1898   :  { %4774 = vmatprep.subr.mxu0 %v5203_v3  ;;  %4783 = vmatprep.subr.mxu1 %v5203_v3 }
0x1899   :  { %4775 = vmatpush3.msra.mxu0 %v6170_v18  ;;  %4784 = vmatpush3.msra.mxu1 %v6131_v46 }
0x189a   :  { %4776 = vmatprep.subr.mxu0 %v5203_v3  ;;  %4785 = vmatprep.subr.mxu1 %v5203_v3 }
0x189b   :  { %4777 = vmatpush3.msra.mxu0 %v6180_v59  ;;  %4786 = vmatpush3.msra.mxu1 %v6139_v55 }
0x189c   :  { %4789 = vmatprep.mubr.msk.f32.mxu1 %vm5204_vm0, %v5203_v3  ;;  %4787 = vmatprep.subr.mxu1 %v5203_v3 }
0x189d   :  { %4792 = vmatprep.subr.mxu0 %v5203_v3  ;;  %4788 = vmatpush3.msra.mxu1 %v6146_v51 }
0x189e   :  { %4803 = vmatprep.subr.mxu1 %v5203_v3 }
0x1954   :  { %v2694_v5 = vpop.f32.mrf.mxu0 }
0x1955   :  { %v2698_v53 = vadd.f32 %v2694_v5, %v6231_v36 }
0x1956   :  { %v4758_v58 = vpop.f32.mrf.mxu0  ;;  %v2772_v14 = vpop.f32.mrf.mxu1 }
0x1957   :  { %5075 = vtanh.f32 %v2698_v53  ;;  %v2776_v60 = vadd.f32 %v2772_v14, %v6253_v45  ;;  %v4347_v41 = vmul.f32 -1.442695, %v2698_v53  ;;  %v4345_v45 = vld [vmem:[%s6810_s1 + $0x8] sm:$0xff] }
0x1958   :  { %v4769_v37 = vpop.f32.mrf.mxu1  ;;  %vm2778_vm2 = vcmp.gt.f32.partialorder %v4345_v45, 0.0 }
0x1959   :  { %5077 = vtanh.f32 %v2776_v60  ;;  %v4348_v34 = vmul.f32 -1.442695, %v2776_v60  ;;  %v2805_v27 = vsel %vm2778_vm2, 1, %v5205_v25 }
0x195a   :  { %5079 = vpow2.f32 %v4347_v41 }
0x195b   :  { %5081 = vpow2.f32 %v4348_v34 }
0x1964   :  { %v5076_v24 = vpop.eup %5075 }
0x1965   :  { %2790 = vrot.lane.b32.xlu1 %v5076_v24, %s5206_s0 }
0x1966   :  { %v5078_v54 = vpop.eup %5077 }
0x1967   :  { %2821 = vrot.lane.b32.xlu0 %v5078_v54, %s5206_s0  ;;  %v5080_v48 = vpop.eup %5079 }
0x1968   :  { %v5082_v35 = vpop.eup %5081  ;;  %v2784_v36 = vadd.f32 1.0, %v5080_v48 }
0x1969   :  { %v2815_v12 = vadd.f32 1.0, %v5082_v35 }
0x196a   :  { %5083 = vrcp.f32 %v2784_v36 }
0x196b   :  { %5085 = vrcp.f32 %v2815_v12 }
0x1977   :  { %v5084_v17 = vpop.eup %5083 }
0x1978   :  { %v5086_v47 = vpop.eup %5085  ;;  %v2788_v10 = vmul.f32 %v5084_v17, %v6328_v8 }
0x1979   :  { %v2819_v29 = vmul.f32 %v5086_v47, %v6334_v13 }
0x19d7   :  { %v2791_v56 = vpop.permute.xlu1 %2790 }
0x19d8   :  { %v2793_v49 = vmul.f32 %v5084_v17, %v2791_v56 }
0x19d9   :  { %v2822_v40 = vpop.permute.xlu0 %2821 }
0x19da   :  { %2795 = vrot.lane.b32.xlu1 %v2793_v49, %s5207_s23  ;;  %v2824_v20 = vmul.f32 %v5086_v47, %v2822_v40  ;;  %v4352_v40 = vld [vmem:[%s6810_s1 + $0x28] sm:$0xff] }
0x19db   :  { %vm3002_vm7 = vcmp.gt.f32.partialorder %v4352_v40, 0.0 }
0x19dc   :  { %2826 = vrot.lane.b32.xlu0 %v2824_v20, %s5207_s23 }
0x19de   :  { %2807 = vperm.xlu1 %4930, %v2805_v27  }
0x19e0   :  { %2838 = vperm.xlu0 %4929, %v2836_v1  }
0x1a4c   :  { %v2796_v11 = vpop.permute.xlu1 %2795 }
0x1a4d   :  { %v6336_v15 = vadd.f32 %v2796_v11, %v2788_v10  ;;  %v3058_v11 = vsel %vm3002_vm7, 1, %v5205_v25 }
0x1a4e   :  { %v2827_v31 = vpop.permute.xlu0 %2826 }
0x1a4f   :  { %5087 = vtanh.f32 %v6336_v15  ;;  %v6340_v32 = vadd.f32 %v2827_v31, %v2819_v29 }
0x1a51   :  { %5089 = vtanh.f32 %v6340_v32 }
0x1a59   :  { %v6345_v33 = vpop.permute.xlu1 %2807 }
0x1a5a   :  { %vm2809_vm4 = vcmp.eq.s32.totalorder %v6345_v33, 1  ;;  %v4107_v33 = vld [vmem:[%s6816_s11 + $0x30] sm:$0xff] }
0x1a5b   :  { %v6347_v4 = vpop.permute.xlu0 %2838  ;;  %v6405_v29 = vsel %vm2809_vm4, %v6336_v15, %v6328_v8 }
0x1a5c   :  { %v5088_v22 = vpop.eup %5087  ;;  %vm2840_vm5 = vcmp.eq.s32.totalorder %v6347_v4, 1  ;;  %v4108_v4 = vld [vmem:[%s6816_s11 + $0x38] sm:$0xff] }
0x1a5d   :  { %2801 = vrot.lane.b32.xlu1 %v5088_v22, %s5206_s0 }
0x1a5e   :  { %v5090_v6 = vpop.eup %5089 }
0x1a5f   :  { %2832 = vrot.lane.b32.xlu0 %v5090_v6, %s5206_s0 }
0x1acf   :  { %v2802_v0 = vpop.permute.xlu1 %2801 }
0x1ad0   :  { %v2804_v2 = vmul.f32 %v5084_v17, %v2802_v0  ;;  %v6414_v0 = vsel %vm2840_vm5, %v6340_v32, %v6334_v13 }
0x1ad1   :  { %v2833_v5 = vpop.permute.xlu0 %2832 }
0x1ad2   :  { %v6353_v53 = vsel %vm2809_vm4, %v2804_v2, %v6278_v43  ;;  %v2835_v58 = vmul.f32 %v5086_v47, %v2833_v5 }
0x1ad3   :  { %2846 = vrot.lane.b32.xlu1 %v6353_v53, %s5207_s23 }
0x1ad4   :  { %v6361_v14 = vsel %vm2840_vm5, %v2835_v58, %v6285_v21 }
0x1ad5   :  { %2924 = vrot.lane.b32.xlu0 %v6361_v14, %s5207_s23 }
0x1b45   :  { %v2847_v60 = vpop.permute.xlu1 %2846 }
0x1b46   :  { %4779 = vmatmul.mubr.msk.f32.vlgmr.msra.gmra.mxu0 %vm72_vm1, %v2847_v60 }
0x1b47   :  { %4793 = vmatpush3.msra.mxu0 %v6155_v50  ;;  %4800 = vmatprep.mubr.msk.f32.mxu0 %vm5204_vm0, %v5203_v3  ;;  %v2925_v43 = vpop.permute.xlu0 %2924 }
0x1b48   :  { %4794 = vmatprep.subr.mxu0 %v5203_v3  ;;  %4790 = vmatmul.mubr.msk.f32.vlgmr.msra.gmra.mxu1 %vm72_vm1, %v2925_v43 }
0x1b49   :  { %4795 = vmatpush3.msra.mxu0 %v6161_v23  ;;  %4804 = vmatpush3.msra.mxu1 %v6121_v61 }
0x1b4a   :  { %4796 = vmatprep.subr.mxu0 %v5203_v3  ;;  %4805 = vmatprep.subr.mxu1 %v5203_v3 }
0x1b4b   :  { %4797 = vmatpush3.msra.mxu0 %v6170_v18  ;;  %4806 = vmatpush3.msra.mxu1 %v6131_v46 }
0x1b4c   :  { %4798 = vmatprep.subr.mxu0 %v5203_v3  ;;  %4807 = vmatprep.subr.mxu1 %v5203_v3 }
0x1b4d   :  { %4799 = vmatpush3.msra.mxu0 %v6180_v59  ;;  %4808 = vmatpush3.msra.mxu1 %v6139_v55 }
0x1b4e   :  { %4811 = vmatprep.mubr.msk.f32.mxu1 %vm5204_vm0, %v5203_v3  ;;  %4809 = vmatprep.subr.mxu1 %v5203_v3 }
0x1b4f   :  { %4814 = vmatprep.subr.mxu0 %v5203_v3  ;;  %4810 = vmatpush3.msra.mxu1 %v6146_v51 }
0x1b50   :  { %4825 = vmatprep.subr.mxu1 %v5203_v3 }
0x1c06   :  { %v2916_v21 = vpop.f32.mrf.mxu0 }
0x1c07   :  { %v2920_v37 = vadd.f32 %v2916_v21, %v6235_v52 }
0x1c08   :  { %v4780_v24 = vpop.f32.mrf.mxu0  ;;  %v2994_v54 = vpop.f32.mrf.mxu1 }
0x1c09   :  { %5091 = vtanh.f32 %v2920_v37  ;;  %v2998_v41 = vadd.f32 %v2994_v54, %v6249_v19  ;;  %v4353_v36 = vmul.f32 -1.442695, %v2920_v37  ;;  %v4351_v19 = vld [vmem:[%s6810_s1 + $0x10] sm:$0xff] }
0x1c0a   :  { %v4791_v34 = vpop.f32.mrf.mxu1  ;;  %vm3000_vm6 = vcmp.gt.f32.partialorder %v4351_v19, 0.0 }
0x1c0b   :  { %5093 = vtanh.f32 %v2998_v41  ;;  %v4354_v12 = vmul.f32 -1.442695, %v2998_v41  ;;  %v3027_v10 = vsel %vm3000_vm6, 1, %v5205_v25 }
0x1c0c   :  { %5095 = vpow2.f32 %v4353_v36 }
0x1c0d   :  { %5097 = vpow2.f32 %v4354_v12 }
0x1c16   :  { %v5092_v48 = vpop.eup %5091 }
0x1c17   :  { %3012 = vrot.lane.b32.xlu1 %v5092_v48, %s5206_s0 }
0x1c18   :  { %v5094_v35 = vpop.eup %5093 }
0x1c19   :  { %3043 = vrot.lane.b32.xlu0 %v5094_v35, %s5206_s0  ;;  %v5096_v45 = vpop.eup %5095 }
0x1c1a   :  { %v5098_v17 = vpop.eup %5097  ;;  %v3006_v52 = vadd.f32 1.0, %v5096_v45 }
0x1c1b   :  { %v3037_v56 = vadd.f32 1.0, %v5098_v17 }
0x1c1c   :  { %5099 = vrcp.f32 %v3006_v52 }
0x1c1d   :  { %5101 = vrcp.f32 %v3037_v56 }
0x1c29   :  { %v5100_v49 = vpop.eup %5099 }
0x1c2a   :  { %v5102_v20 = vpop.eup %5101  ;;  %v3010_v31 = vmul.f32 %v5100_v49, %v6405_v29 }
0x1c2b   :  { %v3041_v2 = vmul.f32 %v5102_v20, %v6414_v0 }
0x1c89   :  { %v3013_v44 = vpop.permute.xlu1 %3012 }
0x1c8a   :  { %v3015_v47 = vmul.f32 %v5100_v49, %v3013_v44 }
0x1c8b   :  { %v3044_v27 = vpop.permute.xlu0 %3043 }
0x1c8c   :  { %3017 = vrot.lane.b32.xlu1 %v3015_v47, %s5207_s23  ;;  %v3046_v1 = vmul.f32 %v5102_v20, %v3044_v27  ;;  %v4358_v27 = vld [vmem:[%s6810_s1 + $0x20] sm:$0xff] }
0x1c8d   :  { %vm3224_vm11 = vcmp.gt.f32.partialorder %v4358_v27, 0.0 }
0x1c8e   :  { %3048 = vrot.lane.b32.xlu0 %v3046_v1, %s5207_s23 }
0x1c90   :  { %3029 = vperm.xlu1 %4930, %v3027_v10  }
0x1c92   :  { %3060 = vperm.xlu0 %4929, %v3058_v11  }
0x1cfe   :  { %v3018_v22 = vpop.permute.xlu1 %3017 }
0x1cff   :  { %v6408_v6 = vadd.f32 %v3018_v22, %v3010_v31  ;;  %v3280_v22 = vsel %vm3224_vm11, 1, %v5205_v25 }
0x1d00   :  { %v3049_v5 = vpop.permute.xlu0 %3048 }
0x1d01   :  { %5103 = vtanh.f32 %v6408_v6  ;;  %v6418_v58 = vadd.f32 %v3049_v5, %v3041_v2 }
0x1d03   :  { %5105 = vtanh.f32 %v6418_v58 }
0x1d0b   :  { %v6423_v60 = vpop.permute.xlu1 %3029 }
0x1d0c   :  { %vm3031_vm8 = vcmp.eq.s32.totalorder %v6423_v60, 1 }
0x1d0d   :  { %v6425_v43 = vpop.permute.xlu0 %3060  ;;  %v6483_v2 = vsel %vm3031_vm8, %v6408_v6, %v6405_v29 }
0x1d0e   :  { %v5104_v8 = vpop.eup %5103  ;;  %vm3062_vm9 = vcmp.eq.s32.totalorder %v6425_v43, 1 }
0x1d0f   :  { %3023 = vrot.lane.b32.xlu1 %v5104_v8, %s5206_s0 }
0x1d10   :  { %v5106_v15 = vpop.eup %5105 }
0x1d11   :  { %3054 = vrot.lane.b32.xlu0 %v5106_v15, %s5206_s0 }
0x1d81   :  { %v3024_v13 = vpop.permute.xlu1 %3023 }
0x1d82   :  { %v3026_v32 = vmul.f32 %v5100_v49, %v3024_v13  ;;  %v6492_v13 = vsel %vm3062_vm9, %v6418_v58, %v6414_v0 }
0x1d83   :  { %v3055_v21 = vpop.permute.xlu0 %3054 }
0x1d84   :  { %v6431_v37 = vsel %vm3031_vm8, %v3026_v32, %v6353_v53  ;;  %v3057_v24 = vmul.f32 %v5102_v20, %v3055_v21 }
0x1d85   :  { %3068 = vrot.lane.b32.xlu1 %v6431_v37, %s5207_s23 }
0x1d86   :  { %v6439_v54 = vsel %vm3062_vm9, %v3057_v24, %v6361_v14 }
0x1d87   :  { %3146 = vrot.lane.b32.xlu0 %v6439_v54, %s5207_s23 }
0x1df7   :  { %v3069_v41 = vpop.permute.xlu1 %3068 }
0x1df8   :  { %4801 = vmatmul.mubr.msk.f32.vlgmr.msra.gmra.mxu0 %vm72_vm1, %v3069_v41 }
0x1df9   :  { %4815 = vmatpush3.msra.mxu0 %v6155_v50  ;;  %4822 = vmatprep.mubr.msk.f32.mxu0 %vm5204_vm0, %v5203_v3  ;;  %v3147_v53 = vpop.permute.xlu0 %3146 }
0x1dfa   :  { %4816 = vmatprep.subr.mxu0 %v5203_v3  ;;  %4812 = vmatmul.mubr.msk.f32.vlgmr.msra.gmra.mxu1 %vm72_vm1, %v3147_v53 }
0x1dfb   :  { %4817 = vmatpush3.msra.mxu0 %v6161_v23  ;;  %4826 = vmatpush3.msra.mxu1 %v6121_v61 }
0x1dfc   :  { %4818 = vmatprep.subr.mxu0 %v5203_v3  ;;  %4827 = vmatprep.subr.mxu1 %v5203_v3 }
0x1dfd   :  { %4819 = vmatpush3.msra.mxu0 %v6170_v18  ;;  %4828 = vmatpush3.msra.mxu1 %v6131_v46 }
0x1dfe   :  { %4820 = vmatprep.subr.mxu0 %v5203_v3  ;;  %4829 = vmatprep.subr.mxu1 %v5203_v3 }
0x1dff   :  { %4821 = vmatpush3.msra.mxu0 %v6180_v59  ;;  %4830 = vmatpush3.msra.mxu1 %v6139_v55 }
0x1e00   :  { %4833 = vmatprep.mubr.msk.f32.mxu1 %vm5204_vm0, %v5203_v3  ;;  %4831 = vmatprep.subr.mxu1 %v5203_v3 }
0x1e01   :  { %4836 = vmatprep.subr.mxu0 %v5203_v3  ;;  %4832 = vmatpush3.msra.mxu1 %v6146_v51 }
0x1e02   :  { %4847 = vmatprep.subr.mxu1 %v5203_v3 }
0x1eb8   :  { %v3138_v14 = vpop.f32.mrf.mxu0 }
0x1eb9   :  { %v3142_v34 = vadd.f32 %v3138_v14, %v6239_v63 }
0x1eba   :  { %v4802_v48 = vpop.f32.mrf.mxu0  ;;  %v3216_v35 = vpop.f32.mrf.mxu1 }
0x1ebb   :  { %5107 = vtanh.f32 %v3142_v34  ;;  %v3220_v36 = vadd.f32 %v3216_v35, %v6245_v57  ;;  %v4359_v52 = vmul.f32 -1.442695, %v3142_v34  ;;  %v4357_v57 = vld [vmem:[%s6810_s1 + $0x18] sm:$0xff] }
0x1ebc   :  { %v4813_v12 = vpop.f32.mrf.mxu1  ;;  %vm3222_vm10 = vcmp.gt.f32.partialorder %v4357_v57, 0.0 }
0x1ebd   :  { %5109 = vtanh.f32 %v3220_v36  ;;  %v4360_v56 = vmul.f32 -1.442695, %v3220_v36  ;;  %v3249_v31 = vsel %vm3222_vm10, 1, %v5205_v25 }
0x1ebe   :  { %5111 = vpow2.f32 %v4359_v52 }
0x1ebf   :  { %5113 = vpow2.f32 %v4360_v56 }
0x1ec8   :  { %v5108_v45 = vpop.eup %5107 }
0x1ec9   :  { %3234 = vrot.lane.b32.xlu1 %v5108_v45, %s5206_s0 }
0x1eca   :  { %v5110_v17 = vpop.eup %5109 }
0x1ecb   :  { %3265 = vrot.lane.b32.xlu0 %v5110_v17, %s5206_s0  ;;  %v5112_v19 = vpop.eup %5111 }
0x1ecc   :  { %v5114_v49 = vpop.eup %5113  ;;  %v3228_v63 = vadd.f32 1.0, %v5112_v19 }
0x1ecd   :  { %v3259_v44 = vadd.f32 1.0, %v5114_v49 }
0x1ece   :  { %5115 = vrcp.f32 %v3228_v63 }
0x1ecf   :  { %5117 = vrcp.f32 %v3259_v44 }
0x1edb   :  { %v5116_v47 = vpop.eup %5115 }
0x1edc   :  { %v5118_v1 = vpop.eup %5117  ;;  %v3232_v5 = vmul.f32 %v5116_v47, %v6483_v2 }
0x1edd   :  { %v3263_v25 = vmul.f32 %v5118_v1, %v6492_v13 }
0x1f3b   :  { %v3235_v40 = vpop.permute.xlu1 %3234 }
0x1f3c   :  { %v3237_v20 = vmul.f32 %v5116_v47, %v3235_v40 }
0x1f3d   :  { %v3266_v10 = vpop.permute.xlu0 %3265 }
0x1f3e   :  { %3239 = vrot.lane.b32.xlu1 %v3237_v20, %s5207_s23  ;;  %v3268_v11 = vmul.f32 %v5118_v1, %v3266_v10 }
0x1f40   :  { %3270 = vrot.lane.b32.xlu0 %v3268_v11, %s5207_s23 }
0x1f42   :  { %3251 = vperm.xlu1 %4930, %v3249_v31  }
0x1f44   :  { %3282 = vperm.xlu0 %4929, %v3280_v22  }
0x1fb0   :  { %v3240_v8 = vpop.permute.xlu1 %3239 }
0x1fb1   :  { %v6486_v15 = vadd.f32 %v3240_v8, %v3232_v5 }
0x1fb2   :  { %v3271_v32 = vpop.permute.xlu0 %3270 }
0x1fb3   :  { %5119 = vtanh.f32 %v6486_v15  ;;  %v6496_v21 = vadd.f32 %v3271_v32, %v3263_v25  ;;  %v6589_v32 = vld [vmem:[%s6814_s9 + $0x18] sm:$0xff] }
0x1fb5   :  { %5121 = vtanh.f32 %v6496_v21 }
0x1fbd   :  { %v6501_v24 = vpop.permute.xlu1 %3251 }
0x1fbe   :  { %vm3253_vm12 = vcmp.eq.s32.totalorder %v6501_v24, 1 }
0x1fbf   :  { %v6503_v41 = vpop.permute.xlu0 %3282  ;;  %v6553_v44 = vsel %vm3253_vm12, %v6486_v15, %v6483_v2 }
0x1fc0   :  { %v5120_v29 = vpop.eup %5119  ;;  %vm3284_vm13 = vcmp.eq.s32.totalorder %v6503_v41, 1 }
0x1fc1   :  { %3245 = vrot.lane.b32.xlu1 %v5120_v29, %s5206_s0  ;;  %v6562_v20 = vsel %vm3284_vm13, %v6496_v21, %v6492_v13  ;;  %v6599_v29 = vld [vmem:[%s6814_s9 + $0x10] sm:$0xff] }
0x1fc2   :  { %v5122_v6 = vpop.eup %5121 }
0x1fc3   :  { %3276 = vrot.lane.b32.xlu0 %v5122_v6, %s5206_s0  ;;  %v6605_v6 = vld [vmem:[%s6813_s10 + $0x18] sm:$0xff] }
0x2033   :  { %v3246_v0 = vpop.permute.xlu1 %3245 }
0x2034   :  { %v3248_v58 = vmul.f32 %v5116_v47, %v3246_v0  ;;  %v6613_v0 = vld [vmem:[%s6814_s9 + $0x8] sm:$0xff] }
0x2035   :  { %v3277_v53 = vpop.permute.xlu0 %3276 }
0x2036   :  { %v6509_v14 = vsel %vm3253_vm12, %v3248_v58, %v6431_v37  ;;  %v3279_v34 = vmul.f32 %v5118_v1, %v3277_v53  ;;  %v6619_v58 = vld [vmem:[%s6813_s10 + $0x10] sm:$0xff]  ;;  %v6627_v53 = vld [vmem:[%s6814_s9] sm:$0xff] }
0x2037   :  { %3288 = vrot.lane.b32.xlu1 %v6509_v14, %s5207_s23 }
0x2038   :  { %v6517_v48 = vsel %vm3284_vm13, %v3279_v34, %v6439_v54  ;;  %v6643_v34 = vld [vmem:[%s6813_s10] sm:$0xff] }
0x2039   :  { %3364 = vrot.lane.b32.xlu0 %v6517_v48, %s5207_s23 }
0x20a9   :  { %v3289_v35 = vpop.permute.xlu1 %3288 }
0x20aa   :  { %4823 = vmatmul.mubr.msk.f32.vlgmr.msra.gmra.mxu0 %vm72_vm1, %v3289_v35 }
0x20ab   :  { %4837 = vmatpush3.msra.mxu0 %v6155_v50  ;;  %4844 = vmatprep.mubr.msk.f32.mxu0 %vm5204_vm0, %v5203_v3  ;;  %v3365_v37 = vpop.permute.xlu0 %3364 }
0x20ac   :  { %4838 = vmatprep.subr.mxu0 %v5203_v3  ;;  %4834 = vmatmul.mubr.msk.f32.vlgmr.msra.gmra.mxu1 %vm72_vm1, %v3365_v37 }
0x20ad   :  { %4839 = vmatpush3.msra.mxu0 %v6161_v23  ;;  %4848 = vmatpush3.msra.mxu1 %v6121_v61 }
0x20ae   :  { %4840 = vmatprep.subr.mxu0 %v5203_v3  ;;  %4849 = vmatprep.subr.mxu1 %v5203_v3 }
0x20af   :  { %4841 = vmatpush3.msra.mxu0 %v6170_v18  ;;  %4850 = vmatpush3.msra.mxu1 %v6131_v46 }
0x20b0   :  { %4842 = vmatprep.subr.mxu0 %v5203_v3  ;;  %4851 = vmatprep.subr.mxu1 %v5203_v3 }
0x20b1   :  { %4843 = vmatpush3.msra.mxu0 %v6180_v59  ;;  %4852 = vmatpush3.msra.mxu1 %v6139_v55 }
0x20b2   :  { %4855 = vmatprep.mubr.msk.f32.mxu1 %vm5204_vm0, %v5203_v3  ;;  %4853 = vmatprep.subr.mxu1 %v5203_v3 }
0x20b3   :  { %4858 = vmatprep.subr.mxu0 %v5203_v3  ;;  %4854 = vmatpush3.msra.mxu1 %v6146_v51 }
0x20b4   :  { %4869 = vmatprep.subr.mxu1 %v5203_v3 }
0x216a   :  { %v3358_v61 = vpop.f32.mrf.mxu0 }
0x216b   :  { %v3362_v46 = vadd.f32 %v3358_v61, %v6243_v39 }
0x216c   :  { %v4824_v50 = vpop.f32.mrf.mxu0  ;;  %v3434_v23 = vpop.f32.mrf.mxu1 }
0x216d   :  { %5123 = vtanh.f32 %v3362_v46  ;;  %v3438_v18 = vadd.f32 %v3434_v23, %v6241_v26  ;;  %v4363_v36 = vmul.f32 -1.442695, %v3362_v46 }
0x216e   :  { %v4835_v55 = vpop.f32.mrf.mxu1 }
0x216f   :  { %5125 = vtanh.f32 %v3438_v18  ;;  %v4364_v51 = vmul.f32 -1.442695, %v3438_v18 }
0x2170   :  { %5127 = vpow2.f32 %v4363_v36 }
0x2171   :  { %5129 = vpow2.f32 %v4364_v51 }
0x217a   :  { %v5124_v59 = vpop.eup %5123 }
0x217b   :  { %3448 = vrot.lane.b32.xlu1 %v5124_v59, %s5206_s0 }
0x217c   :  { %v5126_v54 = vpop.eup %5125 }
0x217d   :  { %3474 = vrot.lane.b32.xlu0 %v5126_v54, %s5206_s0  ;;  %v5128_v12 = vpop.eup %5127 }
0x217e   :  { %v5130_v45 = vpop.eup %5129  ;;  %v3442_v39 = vadd.f32 1.0, %v5128_v12 }
0x217f   :  { %v3468_v17 = vadd.f32 1.0, %v5130_v45 }
0x2180   :  { %5131 = vrcp.f32 %v3442_v39 }
0x2181   :  { %5133 = vrcp.f32 %v3468_v17 }
0x218d   :  { %v5132_v52 = vpop.eup %5131 }
0x218e   :  { %v5134_v19 = vpop.eup %5133  ;;  %v3446_v57 = vmul.f32 %v5132_v52, %v6553_v44 }
0x218f   :  { %v3472_v27 = vmul.f32 %v5134_v19, %v6562_v20 }
0x21ed   :  { %v3449_v26 = vpop.permute.xlu1 %3448 }
0x21ee   :  { %v3451_v56 = vmul.f32 %v5132_v52, %v3449_v26 }
0x21ef   :  { %v3475_v49 = vpop.permute.xlu0 %3474 }
0x21f0   :  { %3453 = vrot.lane.b32.xlu1 %v3451_v56, %s5207_s23  ;;  %v3477_v63 = vmul.f32 %v5134_v19, %v3475_v49 }
0x21f2   :  { %3479 = vrot.lane.b32.xlu0 %v3477_v63, %s5207_s23 }
0x2262   :  { %v3454_v47 = vpop.permute.xlu1 %3453 }
0x2263   :  { %v6556_v40 = vadd.f32 %v3454_v47, %v3446_v57 }
0x2264   :  { %v3480_v1 = vpop.permute.xlu0 %3479 }
0x2265   :  { %5135 = vtanh.f32 %v6556_v40  ;;  %v6566_v10 = vadd.f32 %v3480_v1, %v3472_v27  ;;  %v6657_v26 = vsel %vm3284_vm13, %v6556_v40, %v6553_v44 }
0x2267   :  { %5137 = vtanh.f32 %v6566_v10  ;;  %v6666_v63 = vsel %vm3253_vm12, %v6566_v10, %v6562_v20 }
0x2272   :  { %v5136_v11 = vpop.eup %5135 }
0x2273   :  { %3459 = vrot.lane.b32.xlu1 %v5136_v11, %s5206_s0 }
0x2274   :  { %v5138_v31 = vpop.eup %5137 }
0x2275   :  { %3485 = vrot.lane.b32.xlu0 %v5138_v31, %s5206_s0 }
0x22e5   :  { %v3460_v22 = vpop.permute.xlu1 %3459 }
0x22e6   :  { %v3462_v2 = vmul.f32 %v5132_v52, %v3460_v22 }
0x22e7   :  { %v3486_v5 = vpop.permute.xlu0 %3485 }
0x22e8   :  { %v6574_v8 = vsel %vm3284_vm13, %v3462_v2, %v6509_v14  ;;  %v3488_v15 = vmul.f32 %v5134_v19, %v3486_v5  ;;  %v6633_v14 = vld [vmem:[%s6813_s10 + $0x8] sm:$0xff] }
0x22e9   :  { %3492 = vrot.lane.b32.xlu1 %v6574_v8, %s5207_s23 }
0x22ea   :  { %v6581_v13 = vsel %vm3253_vm12, %v3488_v15, %v6517_v48 }
0x22eb   :  { %3568 = vrot.lane.b32.xlu0 %v6581_v13, %s5207_s23 }
0x235b   :  { %v3493_v25 = vpop.permute.xlu1 %3492 }
0x235c   :  { %4845 = vmatmul.mubr.msk.f32.vlgmr.msra.gmra.mxu0 %vm72_vm1, %v3493_v25 }
0x235d   :  { %4859 = vmatpush3.msra.mxu0 %v6589_v32  ;;  %4866 = vmatprep.mubr.msk.f32.mxu0 %vm5204_vm0, %v5203_v3  ;;  %v3569_v21 = vpop.permute.xlu0 %3568 }
0x235e   :  { %4860 = vmatprep.subr.mxu0 %v5203_v3  ;;  %4856 = vmatmul.mubr.msk.f32.vlgmr.msra.gmra.mxu1 %vm72_vm1, %v3569_v21 }
0x235f   :  { %4861 = vmatpush3.msra.mxu0 %v6599_v29  ;;  %4870 = vmatpush3.msra.mxu1 %v6605_v6 }
0x2360   :  { %4862 = vmatprep.subr.mxu0 %v5203_v3  ;;  %4871 = vmatprep.subr.mxu1 %v5203_v3 }
0x2361   :  { %4863 = vmatpush3.msra.mxu0 %v6613_v0  ;;  %4872 = vmatpush3.msra.mxu1 %v6619_v58 }
0x2362   :  { %4864 = vmatprep.subr.mxu0 %v5203_v3  ;;  %4873 = vmatprep.subr.mxu1 %v5203_v3 }
0x2363   :  { %4865 = vmatpush3.msra.mxu0 %v6627_v53  ;;  %4874 = vmatpush3.msra.mxu1 %v6633_v14 }
0x2364   :  { %4877 = vmatprep.mubr.msk.f32.mxu1 %vm5204_vm0, %v5203_v3  ;;  %4875 = vmatprep.subr.mxu1 %v5203_v3 }
0x2365   :  { %4880 = vmatprep.subr.mxu0 %v5203_v3  ;;  %4876 = vmatpush3.msra.mxu1 %v6643_v34 }
0x2366   :  { %4891 = vmatprep.subr.mxu1 %v5203_v3 }
0x241c   :  { %v3562_v48 = vpop.f32.mrf.mxu0 }
0x241d   :  { %v3566_v35 = vadd.f32 %v3562_v48, %v6247_v38 }
0x241e   :  { %v4846_v37 = vpop.f32.mrf.mxu0  ;;  %v3638_v61 = vpop.f32.mrf.mxu1 }
0x241f   :  { %5139 = vtanh.f32 %v3566_v35  ;;  %v3642_v46 = vadd.f32 %v3638_v61, %v6237_v28  ;;  %v4367_v55 = vmul.f32 -1.442695, %v3566_v35 }
0x2420   :  { %v4857_v50 = vpop.f32.mrf.mxu1 }
0x2421   :  { %5141 = vtanh.f32 %v3642_v46  ;;  %v4368_v59 = vmul.f32 -1.442695, %v3642_v46 }
0x2422   :  { %5143 = vpow2.f32 %v4367_v55 }
0x2423   :  { %5145 = vpow2.f32 %v4368_v59 }
0x242c   :  { %v5140_v23 = vpop.eup %5139 }
0x242d   :  { %3652 = vrot.lane.b32.xlu1 %v5140_v23, %s5206_s0 }
0x242e   :  { %v5142_v18 = vpop.eup %5141 }
0x242f   :  { %3678 = vrot.lane.b32.xlu0 %v5142_v18, %s5206_s0  ;;  %v5144_v54 = vpop.eup %5143 }
0x2430   :  { %v5146_v36 = vpop.eup %5145  ;;  %v3646_v38 = vadd.f32 1.0, %v5144_v54 }
0x2431   :  { %v3672_v51 = vadd.f32 1.0, %v5146_v36 }
0x2432   :  { %5147 = vrcp.f32 %v3646_v38 }
0x2433   :  { %5149 = vrcp.f32 %v3672_v51 }
0x243f   :  { %v5148_v12 = vpop.eup %5147 }
0x2440   :  { %v5150_v39 = vpop.eup %5149  ;;  %v3650_v56 = vmul.f32 %v5148_v12, %v6657_v26 }
0x2441   :  { %v3676_v57 = vmul.f32 %v5150_v39, %v6666_v63 }
0x249f   :  { %v3653_v28 = vpop.permute.xlu1 %3652 }
0x24a0   :  { %v3655_v45 = vmul.f32 %v5148_v12, %v3653_v28 }
0x24a1   :  { %v3679_v17 = vpop.permute.xlu0 %3678 }
0x24a2   :  { %3657 = vrot.lane.b32.xlu1 %v3655_v45, %s5207_s23  ;;  %v3681_v52 = vmul.f32 %v5150_v39, %v3679_v17 }
0x24a4   :  { %3683 = vrot.lane.b32.xlu0 %v3681_v52, %s5207_s23 }
0x2514   :  { %v3658_v19 = vpop.permute.xlu1 %3657 }
0x2515   :  { %v6660_v49 = vadd.f32 %v3658_v19, %v3650_v56 }
0x2516   :  { %v3684_v47 = vpop.permute.xlu0 %3683 }
0x2517   :  { %5151 = vtanh.f32 %v6660_v49  ;;  %v6670_v27 = vadd.f32 %v3684_v47, %v3676_v57  ;;  %v3668_v61 = vsel %vm3062_vm9, %v6660_v49, %v6657_v26 }
0x2519   :  { %5153 = vtanh.f32 %v6670_v27  ;;  %v3694_v18 = vsel %vm3031_vm8, %v6670_v27, %v6666_v63 }
0x2524   :  { %v5152_v41 = vpop.eup %5151 }
0x2525   :  { %3663 = vrot.lane.b32.xlu1 %v5152_v41, %s5206_s0 }
0x2526   :  { %v5154_v44 = vpop.eup %5153 }
0x2527   :  { %3689 = vrot.lane.b32.xlu0 %v5154_v44, %s5206_s0 }
0x2597   :  { %v3664_v40 = vpop.permute.xlu1 %3663 }
0x2598   :  { %v3666_v1 = vmul.f32 %v5148_v12, %v3664_v40 }
0x2599   :  { %v3690_v24 = vpop.permute.xlu0 %3689 }
0x259a   :  { %v6678_v20 = vsel %vm3062_vm9, %v3666_v1, %v6574_v8  ;;  %v3692_v10 = vmul.f32 %v5150_v39, %v3690_v24 }
0x259b   :  { %3696 = vrot.lane.b32.xlu1 %v6678_v20, %s5207_s23 }
0x259c   :  { %v6685_v11 = vsel %vm3031_vm8, %v3692_v10, %v6581_v13 }
0x259d   :  { %3772 = vrot.lane.b32.xlu0 %v6685_v11, %s5207_s23 }
0x260d   :  { %v3697_v31 = vpop.permute.xlu1 %3696 }
0x260e   :  { %4867 = vmatmul.mubr.msk.f32.vlgmr.msra.gmra.mxu0 %vm72_vm1, %v3697_v31 }
0x260f   :  { %4881 = vmatpush3.msra.mxu0 %v6589_v32  ;;  %4888 = vmatprep.mubr.msk.f32.mxu0 %vm5204_vm0, %v5203_v3  ;;  %v3773_v22 = vpop.permute.xlu0 %3772 }
0x2610   :  { %4882 = vmatprep.subr.mxu0 %v5203_v3  ;;  %4878 = vmatmul.mubr.msk.f32.vlgmr.msra.gmra.mxu1 %vm72_vm1, %v3773_v22 }
0x2611   :  { %4883 = vmatpush3.msra.mxu0 %v6599_v29  ;;  %4892 = vmatpush3.msra.mxu1 %v6605_v6 }
0x2612   :  { %4884 = vmatprep.subr.mxu0 %v5203_v3  ;;  %4893 = vmatprep.subr.mxu1 %v5203_v3 }
0x2613   :  { %4885 = vmatpush3.msra.mxu0 %v6613_v0  ;;  %4894 = vmatpush3.msra.mxu1 %v6619_v58 }
0x2614   :  { %4886 = vmatprep.subr.mxu0 %v5203_v3  ;;  %4895 = vmatprep.subr.mxu1 %v5203_v3 }
0x2615   :  { %4887 = vmatpush3.msra.mxu0 %v6627_v53  ;;  %4896 = vmatpush3.msra.mxu1 %v6633_v14 }
0x2616   :  { %4899 = vmatprep.mubr.msk.f32.mxu1 %vm5204_vm0, %v5203_v3  ;;  %4897 = vmatprep.subr.mxu1 %v5203_v3 }
0x2617   :  { %4902 = vmatprep.subr.mxu0 %v5203_v3  ;;  %4898 = vmatpush3.msra.mxu1 %v6643_v34 }
0x2618   :  { %4913 = vmatprep.subr.mxu1 %v5203_v3 }
0x26ce   :  { %v3766_v2 = vpop.f32.mrf.mxu0 }
0x26cf   :  { %v3770_v5 = vadd.f32 %v3766_v2, %v6251_v42 }
0x26d0   :  { %v4868_v8 = vpop.f32.mrf.mxu0  ;;  %v3842_v15 = vpop.f32.mrf.mxu1 }
0x26d1   :  { %5155 = vtanh.f32 %v3770_v5  ;;  %v3846_v13 = vadd.f32 %v3842_v15, %v6233_v30  ;;  %v4371_v29 = vmul.f32 -1.442695, %v3770_v5 }
0x26d2   :  { %v4879_v25 = vpop.f32.mrf.mxu1 }
0x26d3   :  { %5157 = vtanh.f32 %v3846_v13  ;;  %v4372_v6 = vmul.f32 -1.442695, %v3846_v13 }
0x26d4   :  { %5159 = vpow2.f32 %v4371_v29  ;;  %v4103_v29 = vld [vmem:[%s6816_s11 + $0x10] sm:$0xff] }
0x26d5   :  { %5161 = vpow2.f32 %v4372_v6  ;;  %v4102_v6 = vld [vmem:[%s6816_s11 + $0x8] sm:$0xff] }
0x26de   :  { %v5156_v32 = vpop.eup %5155 }
0x26df   :  { %3856 = vrot.lane.b32.xlu1 %v5156_v32, %s5206_s0 }
0x26e0   :  { %v5158_v21 = vpop.eup %5157 }
0x26e1   :  { %3882 = vrot.lane.b32.xlu0 %v5158_v21, %s5206_s0  ;;  %v5160_v0 = vpop.eup %5159  ;;  %v4104_v21 = vld [vmem:[%s6816_s11 + $0x18] sm:$0xff] }
0x26e2   :  { %v5162_v58 = vpop.eup %5161  ;;  %v3850_v42 = vadd.f32 1.0, %v5160_v0  ;;  %v4106_v0 = vld [vmem:[%s6816_s11 + $0x28] sm:$0xff] }
0x26e3   :  { %v3876_v53 = vadd.f32 1.0, %v5162_v58  ;;  %v4101_v58 = vld [vmem:[%s6816_s11] sm:$0xff] }
0x26e4   :  { %5163 = vrcp.f32 %v3850_v42 }
0x26e5   :  { %5165 = vrcp.f32 %v3876_v53 }
0x26f1   :  { %v5164_v14 = vpop.eup %5163 }
0x26f2   :  { %v5166_v48 = vpop.eup %5165  ;;  %v3854_v46 = vmul.f32 %v5164_v14, %v3668_v61 }
0x26f3   :  { %v3880_v55 = vmul.f32 %v5166_v48, %v3694_v18 }
0x2751   :  { %v3857_v30 = vpop.permute.xlu1 %3856 }
0x2752   :  { %v3859_v34 = vmul.f32 %v5164_v14, %v3857_v30 }
0x2753   :  { %v3883_v35 = vpop.permute.xlu0 %3882 }
0x2754   :  { %3861 = vrot.lane.b32.xlu1 %v3859_v34, %s5207_s23  ;;  %v3885_v37 = vmul.f32 %v5166_v48, %v3883_v35 }
0x2756   :  { %3887 = vrot.lane.b32.xlu0 %v3885_v37, %s5207_s23 }
0x27c6   :  { %v3862_v50 = vpop.permute.xlu1 %3861 }
0x27c7   :  { %v3864_v23 = vadd.f32 %v3862_v50, %v3854_v46 }
0x27c8   :  { %v3888_v59 = vpop.permute.xlu0 %3887 }
0x27c9   :  { %5167 = vtanh.f32 %v3864_v23  ;;  %v3890_v54 = vadd.f32 %v3888_v59, %v3880_v55  ;;  %v3872_v22 = vsel %vm2840_vm5, %v3864_v23, %v3668_v61 }
0x27cb   :  { %5169 = vtanh.f32 %v3890_v54  ;;  %v3898_v15 = vsel %vm2809_vm4, %v3890_v54, %v3694_v18 }
0x27d6   :  { %v5168_v36 = vpop.eup %5167 }
0x27d7   :  { %3867 = vrot.lane.b32.xlu1 %v5168_v36, %s5206_s0 }
0x27d8   :  { %v5170_v38 = vpop.eup %5169 }
0x27d9   :  { %3893 = vrot.lane.b32.xlu0 %v5170_v38, %s5206_s0 }
0x2849   :  { %v3868_v43 = vpop.permute.xlu1 %3867 }
0x284a   :  { %v3870_v51 = vmul.f32 %v5164_v14, %v3868_v43  ;;  %v4105_v14 = vld [vmem:[%s6816_s11 + $0x20] sm:$0xff] }
0x284b   :  { %v3894_v12 = vpop.permute.xlu0 %3893 }
0x284c   :  { %v6730_v28 = vsel %vm2840_vm5, %v3870_v51, %v6678_v20  ;;  %v3896_v60 = vmul.f32 %v5166_v48, %v3894_v12 }
0x284d   :  { %3900 = vrot.lane.b32.xlu1 %v6730_v28, %s5207_s23 }
0x284e   :  { %v6737_v45 = vsel %vm2809_vm4, %v3896_v60, %v6685_v11 }
0x284f   :  { %3976 = vrot.lane.b32.xlu0 %v6737_v45, %s5207_s23 }
0x28bf   :  { %v3901_v39 = vpop.permute.xlu1 %3900 }
0x28c0   :  { %4889 = vmatmul.mubr.msk.f32.vlgmr.msra.gmra.mxu0 %vm72_vm1, %v3901_v39 }
0x28c1   :  { %4910 = vmatprep.mubr.msk.f32.mxu0 %vm5204_vm0, %v5203_v3  ;;  %v3977_v17 = vpop.permute.xlu0 %3976  ;;  %4903 = vmatpush3.msra.mxu0 %v4108_v4 }
0x28c2   :  { %4900 = vmatmul.mubr.msk.f32.vlgmr.msra.gmra.mxu1 %vm72_vm1, %v3977_v17  ;;  %4904 = vmatprep.subr.mxu0 %v5203_v3 }
0x28c3   :  { %4921 = vmatprep.mubr.msk.f32.mxu1 %vm5204_vm0, %v5203_v3  ;;  %4914 = vmatpush3.msra.mxu1 %v4104_v21 }
0x28c4   :  { %4915 = vmatprep.subr.mxu1 %v5203_v3  ;;  %4905 = vmatpush3.msra.mxu0 %v4107_v33 }
0x28c5   :  { %4916 = vmatpush3.msra.mxu1 %v4103_v29  ;;  %4906 = vmatprep.subr.mxu0 %v5203_v3 }
0x28c6   :  { %4917 = vmatprep.subr.mxu1 %v5203_v3  ;;  %4907 = vmatpush3.msra.mxu0 %v4106_v0 }
0x28c7   :  { %4918 = vmatpush3.msra.mxu1 %v4102_v6  ;;  %4908 = vmatprep.subr.mxu0 %v5203_v3 }
0x28c8   :  { %4919 = vmatprep.subr.mxu1 %v5203_v3  ;;  %4909 = vmatpush3.msra.mxu0 %v4105_v14 }
0x28c9   :  { %4920 = vmatpush3.msra.mxu1 %v4101_v58 }
0x2980   :  { %v3970_v52 = vpop.f32.mrf.mxu0 }
0x2981   :  { %v3974_v26 = vadd.f32 %v3970_v52, %v6255_v62 }
0x2982   :  { %v4890_v56 = vpop.f32.mrf.mxu0  ;;  %v4046_v19 = vpop.f32.mrf.mxu1 }
0x2983   :  { %5171 = vtanh.f32 %v3974_v26  ;;  %v4050_v49 = vadd.f32 %v4046_v19, %v6229_v9  ;;  %v4375_v27 = vmul.f32 -1.442695, %v3974_v26 }
0x2984   :  { %v4901_v63 = vpop.f32.mrf.mxu1 }
0x2985   :  { %5173 = vtanh.f32 %v4050_v49  ;;  %v4376_v41 = vmul.f32 -1.442695, %v4050_v49 }
0x2986   :  { %5175 = vpow2.f32 %v4375_v27 }
0x2987   :  { %5177 = vpow2.f32 %v4376_v41 }
0x2990   :  { %v5172_v57 = vpop.eup %5171 }
0x2991   :  { %4060 = vrot.lane.b32.xlu1 %v5172_v57, %s5206_s0 }
0x2992   :  { %v5174_v47 = vpop.eup %5173 }
0x2993   :  { %4085 = vrot.lane.b32.xlu0 %v5174_v47, %s5206_s0  ;;  %v5176_v44 = vpop.eup %5175 }
0x2994   :  { %v5178_v40 = vpop.eup %5177  ;;  %v4054_v62 = vadd.f32 1.0, %v5176_v44 }
0x2995   :  { %v4079_v1 = vadd.f32 1.0, %v5178_v40 }
0x2996   :  { %5179 = vrcp.f32 %v4054_v62 }
0x2997   :  { %5181 = vrcp.f32 %v4079_v1 }
0x29a3   :  { %v5180_v24 = vpop.eup %5179 }
0x29a4   :  { %v5182_v10 = vpop.eup %5181  ;;  %v4058_v2 = vmul.f32 %v5180_v24, %v3872_v22 }
0x29a5   :  { %v4083_v13 = vmul.f32 %v5182_v10, %v3898_v15 }
0x2a03   :  { %v4061_v9 = vpop.permute.xlu1 %4060 }
0x2a04   :  { %v4063_v20 = vmul.f32 %v5180_v24, %v4061_v9 }
0x2a05   :  { %v4086_v11 = vpop.permute.xlu0 %4085 }
0x2a06   :  { %4065 = vrot.lane.b32.xlu1 %v4063_v20, %s5207_s23  ;;  %v4088_v31 = vmul.f32 %v5182_v10, %v4086_v11 }
0x2a08   :  { %4090 = vrot.lane.b32.xlu0 %v4088_v31, %s5207_s23 }
0x2a78   :  { %v4066_v5 = vpop.permute.xlu1 %4065 }
0x2a79   :  { %v4068_v8 = vadd.f32 %v4066_v5, %v4058_v2 }
0x2a7a   :  { %v4091_v25 = vpop.permute.xlu0 %4090 }
0x2a7b   :  { %5183 = vtanh.f32 %v4068_v8  ;;  %v4093_v32 = vadd.f32 %v4091_v25, %v4083_v13 }
0x2a7d   :  { %5185 = vtanh.f32 %v4093_v32 }
0x2a88   :  { %v5184_v42 = vpop.eup %5183 }
0x2a89   :  { %4071 = vrot.lane.b32.xlu1 %v5184_v42, %s5206_s0 }
0x2a8a   :  { %v5186_v53 = vpop.eup %5185 }
0x2a8b   :  { %4096 = vrot.lane.b32.xlu0 %v5186_v53, %s5206_s0 }
0x2afb   :  { %v4072_v30 = vpop.permute.xlu1 %4071 }
0x2afc   :  { %v4074_v34 = vmul.f32 %v5180_v24, %v4072_v30 }
0x2afd   :  { %v4097_v48 = vpop.permute.xlu0 %4096 }
0x2afe   :  { %v4075_v35 = vsel %vm2618_vm15, %v4074_v34, %v6730_v28  ;;  %v4099_v37 = vmul.f32 %v5182_v10, %v4097_v48 }
0x2aff   :  { %4185 = vrot.lane.b32.xlu0 %v4075_v35, %s5207_s23 }
0x2b00   :  { %v4100_v3 = vsel %vm2587_vm14, %v4099_v37, %v6737_v45 }
0x2b01   :  { %4110 = vrot.lane.b32.xlu1 %v4100_v3, %s5207_s23 }
0x2b71   :  { %v4186_v61 = vpop.permute.xlu0 %4185 }
0x2b72   :  { %4922 = vmatmul.mubr.msk.f32.vlgmr.msra.gmra.mxu1 %vm72_vm1, %v4186_v61 }
0x2b73   :  { %v4111_v46 = vpop.permute.xlu1 %4110 }
0x2b74   :  { %4911 = vmatmul.mubr.msk.f32.vlgmr.msra.gmra.mxu0 %vm72_vm1, %v4111_v46 }
0x2c32   :  { %v4255_v50 = vpop.f32.mrf.mxu1 }
0x2c34   :  { %v4923_v23 = vpop.f32.mrf.mxu1  ;;  %v4180_v18 = vpop.f32.mrf.mxu0 }
0x2c35   :  { %v4256_v55 = vadd.f32 %v4255_v50, %v4180_v18 }
0x2c36   :  { %v4912_v59 = vpop.f32.mrf.mxu0 }
0x2c37   :  { %v4266_v54 = vadd.f32 %v4379_v16, %v4256_v55 }
0x2c39   :  { %4267 = vst [vmem:[%s6818_s13] sm:$0xff] %v4266_v54 }

</bundles_post_ra>
